<compile_context>
chip_gen: v6e
topology: v6e:2x2x1
jax: 0.10.0
libtpu: 0.0.40
codegen_flags: <defaults>
</compile_context>

<pallas_src>
import jax
import jax.numpy as jnp
from jax import lax
from jax.experimental import pallas as pl
from jax.experimental.pallas import tpu as pltpu

EPS = 1e-5


def _round_up(x, m):
    return (x + m - 1) // m * m


# --------------------------------------------------------------------------
# Kernel 1: in-kernel im2col (9 shifted-window dots) producing the conv output
#           in (Cout, H*W) layout, plus per-image per-channel sum and
#           sum-of-squares partials for the BatchNorm batch statistics.
# --------------------------------------------------------------------------
def _make_conv_stats_kernel(H, W, Cout):
    HW = H * W

    def kernel(x_ref, w_ref, y_ref, sum_ref, ssq_ref, acc_ref):
        # x_ref  : (1, H+2, W+2, Cin_p)  compute dtype (halo-padded image)
        # w_ref  : (9, Cout_p, Cin_p)    compute dtype
        # y_ref  : (1, Cout, HW)         compute dtype (already NCHW-ordered)
        # sum_ref: (1, Cout_p, 1)        f32  per-image partial channel sums
        # ssq_ref: (1, Cout_p, 1)        f32  per-image partial sum-of-squares
        # acc_ref: (Cout_p, HW)          f32  VMEM scratch accumulator
        x = x_ref[0]                                    # (H+2, W+2, Cin_p)

        def tap(kh, kw):
            # Shifted 3x3 tap window, flattened to (HW, Cin_p).
            xs = x[kh:kh + H, kw:kw + W, :].reshape(HW, -1)
            # (Cout_p, Cin_p) x (HW, Cin_p) contracted on the last dims
            # -> (Cout_p, HW); f32 accumulation on the MXU.
            return lax.dot_general(
                w_ref[kh * 3 + kw], xs,
                dimension_numbers=(((1,), (1,)), ((), ())),
                preferred_element_type=jnp.float32)

        acc_ref[...] = tap(0, 0)                        # init folded into tap 0
        for idx in range(1, 9):
            acc_ref[...] += tap(idx // 3, idx % 3)

        acc = acc_ref[...]                              # (Cout_p, HW) f32
        sum_ref[0] = jnp.sum(acc, axis=1, keepdims=True)
        ssq_ref[0] = jnp.sum(acc * acc, axis=1, keepdims=True)
        y_ref[0] = acc[:Cout, :].astype(y_ref.dtype)

    return kernel


# --------------------------------------------------------------------------
# Kernel 2: BatchNorm finalize (batch stats -> scale/shift) fused with the
#           elementwise affine + ReLU on the (Cout, H*W) channels-major layout.
# --------------------------------------------------------------------------
def _make_bn_relu_kernel(Cout, inv_cnt):
    def kernel(sum_ref, ssq_ref, gamma_ref, beta_ref, y_ref, o_ref):
        # sum_ref, ssq_ref : (N, Cout_p, 1) f32  per-image partials (full arrays)
        # gamma_ref, beta_ref : (Cout_p, 1) f32
        # y_ref : (1, Cout, HW) compute dtype ; o_ref : (1, Cout, HW) f32
        s = jnp.sum(sum_ref[...], axis=0)               # (Cout_p, 1)
        sq = jnp.sum(ssq_ref[...], axis=0)              # (Cout_p, 1)
        mean = s * inv_cnt
        var = sq * inv_cnt - mean * mean                # biased variance
        inv_std = lax.rsqrt(var + EPS)                  # EUP, off the VPU path
        scale = gamma_ref[...] * inv_std                # (Cout_p, 1)
        shift = beta_ref[...] - mean * scale            # (Cout_p, 1)

        y = y_ref[0].astype(jnp.float32)                # (Cout, HW)
        o_ref[0] = jnp.maximum(y * scale[:Cout] + shift[:Cout], 0.0)

    return kernel


def conv_bn_relu(x_nchw, weight, bias, gamma, beta, *, compute_dtype=jnp.bfloat16):
    """Forward pass of the `conv` module.

    x_nchw : (N, Cin, H, W)  float32
    weight : (Cout, Cin, 3, 3)  (PyTorch Conv2d layout)
    bias   : (Cout,)   -- mathematically cancels under training-mode BN
    gamma, beta : (Cout,)  BatchNorm affine params
    returns: (N, Cout, H, W)  float32
    """
    del bias  # training-mode BN subtracts the batch mean -> bias cancels exactly
    N, Cin, H, W = x_nchw.shape
    Cout = weight.shape[0]
    HW = H * W
    Cin_p = _round_up(Cin, 8)      # sublane-aligned contraction dim
    Cout_p = _round_up(Cout, 128)  # lane-dense channel dim for MXU / stats

    # ---- glue: NCHW -> NHWC, cast to compute dtype, zero-pad halo + channels --
    x = jnp.transpose(x_nchw, (0, 2, 3, 1)).astype(compute_dtype)
    x = jnp.pad(x, ((0, 0), (1, 1), (1, 1), (0, Cin_p - Cin)))   # (N, H+2, W+2, Cin_p)

    # Weight: (Cout, Cin, 3, 3) -> (kh*3+kw, Cout_p, Cin_p), zero-padded.
    w = jnp.transpose(weight, (2, 3, 0, 1)).reshape(9, Cout, Cin)
    w = jnp.pad(w, ((0, 0), (0, Cout_p - Cout), (0, Cin_p - Cin)))
    w = w.astype(compute_dtype)

    kernel1 = _make_conv_stats_kernel(H, W, Cout)

    # ---- Pallas call 1: conv (in-kernel im2col) + per-image BN partials -----
    y_conv, ch_sum, ch_ssq = pl.pallas_call(
        kernel1,
        out_shape=(
            jax.ShapeDtypeStruct((N, Cout, HW), compute_dtype),
            jax.ShapeDtypeStruct((N, Cout_p, 1), jnp.float32),
            jax.ShapeDtypeStruct((N, Cout_p, 1), jnp.float32),
        ),
        grid_spec=pltpu.PrefetchScalarGridSpec(
            num_scalar_prefetch=0,
            grid=(N,),
            in_specs=[
                pl.BlockSpec((1, H + 2, W + 2, Cin_p), lambda n: (n, 0, 0, 0)),
                pl.BlockSpec((9, Cout_p, Cin_p), lambda n: (0, 0, 0)),
            ],
            out_specs=[
                pl.BlockSpec((1, Cout, HW), lambda n: (n, 0, 0)),
                pl.BlockSpec((1, Cout_p, 1), lambda n: (n, 0, 0)),
                pl.BlockSpec((1, Cout_p, 1), lambda n: (n, 0, 0)),
            ],
            scratch_shapes=[pltpu.VMEM((Cout_p, HW), jnp.float32)],
        ),
        compiler_params=pltpu.CompilerParams(
            dimension_semantics=("parallel",)),   # independent per image (v7x 2-TC)
    )(x, w)

    # ---- glue: pad the BN affine params to the lane-dense channel count -----
    gamma_p = jnp.pad(gamma.astype(jnp.float32), (0, Cout_p - Cout)).reshape(Cout_p, 1)
    beta_p = jnp.pad(beta.astype(jnp.float32), (0, Cout_p - Cout)).reshape(Cout_p, 1)

    kernel2 = _make_bn_relu_kernel(Cout, 1.0 / float(N * HW))

    # ---- Pallas call 2: fused BN finalize + affine + ReLU (lane-dense H*W) ---
    out = pl.pallas_call(
        kernel2,
        out_shape=jax.ShapeDtypeStruct((N, Cout, HW), jnp.float32),
        grid_spec=pltpu.PrefetchScalarGridSpec(
            num_scalar_prefetch=0,
            grid=(N,),
            in_specs=[
                pl.BlockSpec((N, Cout_p, 1), lambda n: (0, 0, 0)),
                pl.BlockSpec((N, Cout_p, 1), lambda n: (0, 0, 0)),
                pl.BlockSpec((Cout_p, 1), lambda n: (0, 0)),
                pl.BlockSpec((Cout_p, 1), lambda n: (0, 0)),
                pl.BlockSpec((1, Cout, HW), lambda n: (n, 0, 0)),
            ],
            out_specs=pl.BlockSpec((1, Cout, HW), lambda n: (n, 0, 0)),
        ),
        compiler_params=pltpu.CompilerParams(
            dimension_semantics=("parallel",)),
    )(ch_sum, ch_ssq, gamma_p, beta_p, y_conv)

    # (N, Cout, H*W) is already NCHW order; reshape is free (contiguous).
    return out.reshape(N, Cout, H, W)


# --------------------------------------------------------------------------
# Pure-JAX reference (for correctness check only).
# --------------------------------------------------------------------------
def reference(x_nchw, weight, bias, gamma, beta):
    x = jnp.transpose(x_nchw, (0, 2, 3, 1))
    w_hwio = jnp.transpose(weight, (2, 3, 1, 0))
    y = lax.conv_general_dilated(
        x, w_hwio, window_strides=(1, 1), padding=((1, 1), (1, 1)),
        dimension_numbers=("NHWC", "HWIO", "NHWC"))
    y = y + bias
    mean = y.mean(axis=(0, 1, 2))
    var = y.var(axis=(0, 1, 2))     # biased, matches BN normalization
    y = (y - mean) * (gamma / jnp.sqrt(var + EPS)) + beta
    y = jnp.maximum(y, 0.0)
    return jnp.transpose(y, (0, 3, 1, 2))


if __name__ == "__main__":
    key = jax.random.PRNGKey(0)
    k_x, k_w, k_b, k_g, k_be = jax.random.split(key, 5)

    N, Cin, H, W = 2, 4, 16, 16
    Cout = 8

    x = jax.random.normal(k_x, (N, Cin, H, W), dtype=jnp.float32)
    weight = jax.random.normal(k_w, (Cout, Cin, 3, 3), dtype=jnp.float32) * 0.1
    bias = jax.random.normal(k_b, (Cout,), dtype=jnp.float32) * 0.1
    gamma = 1.0 + 0.1 * jax.random.normal(k_g, (Cout,), dtype=jnp.float32)
    beta = 0.1 * jax.random.normal(k_be, (Cout,), dtype=jnp.float32)

    ref = jax.block_until_ready(reference(x, weight, bias, gamma, beta))

    # Default (performance) path: bf16 matmul inputs / bf16 intermediate.
    out_bf16 = jax.block_until_ready(conv_bn_relu(x, weight, bias, gamma, beta))
    assert out_bf16.shape == (N, Cout, H, W), out_bf16.shape
    assert jnp.allclose(out_bf16, ref, atol=2e-2, rtol=2e-2), \
        float(jnp.max(jnp.abs(out_bf16 - ref)))

    # Full-precision path: tight check against the f32 reference.
    out_f32 = jax.block_until_ready(
        conv_bn_relu(x, weight, bias, gamma, beta, compute_dtype=jnp.float32))
    assert jnp.allclose(out_f32, ref, atol=1e-4, rtol=1e-4), \
        float(jnp.max(jnp.abs(out_f32 - ref)))

    print("KERNEL_OK")
</pallas_src>

<mosaic_0001>
module attributes {stable_mosaic.version = 11 : i64} {
  func.func @kernel(%arg0: i32, %arg1: memref<1x18x18x8xbf16, #tpu.memory_space<vmem>>, %arg2: memref<9x128x8xbf16, #tpu.memory_space<vmem>>, %arg3: memref<1x8x256xbf16, #tpu.memory_space<vmem>>, %arg4: memref<1x128x1xf32, #tpu.memory_space<vmem>>, %arg5: memref<1x128x1xf32, #tpu.memory_space<vmem>>, %arg6: memref<128x256xf32, #tpu.memory_space<vmem>>) attributes {dimension_semantics = [#tpu.dimension_semantics<parallel>], iteration_bounds = array<i64: 2>, scalar_prefetch = 0 : i64, scratch_operands = 1 : i64, tpu.core_type = #tpu.core_type<tc>, window_params = [{transform_indices = @transform_0, window_bounds = array<i64: 1, 18, 18, 8>}, {pipeline_mode = #tpu.pipeline_mode<synchronous>, transform_indices = @transform_1, window_bounds = array<i64: 9, 128, 8>}, {transform_indices = @transform_2, window_bounds = array<i64: 1, 8, 256>}, {transform_indices = @transform_3, window_bounds = array<i64: 1, 128, 1>}, {transform_indices = @transform_4, window_bounds = array<i64: 1, 128, 1>}]} {
    %c0 = arith.constant 0 : index
    %c0_0 = arith.constant 0 : index
    %c0_1 = arith.constant 0 : index
    %c0_2 = arith.constant 0 : index
    %0 = vector.load %arg1[%c0, %c0_0, %c0_1, %c0_2] : memref<1x18x18x8xbf16, #tpu.memory_space<vmem>>, vector<1x18x18x8xbf16>
    %1 = vector.shape_cast %0 : vector<1x18x18x8xbf16> to vector<18x18x8xbf16>
    %2 = vector.extract_strided_slice %1 {offsets = [0, 0, 0], sizes = [16, 16, 8], strides = [1, 1, 1]} : vector<18x18x8xbf16> to vector<16x16x8xbf16>
    %3 = vector.shape_cast %2 : vector<16x16x8xbf16> to vector<256x8xbf16>
    %c0_3 = arith.constant 0 : index
    %c0_4 = arith.constant 0 : index
    %c0_5 = arith.constant 0 : index
    %4 = vector.load %arg2[%c0_3, %c0_4, %c0_5] : memref<9x128x8xbf16, #tpu.memory_space<vmem>>, vector<1x128x8xbf16>
    %5 = vector.shape_cast %4 : vector<1x128x8xbf16> to vector<128x8xbf16>
    %cst = arith.constant dense<0.000000e+00> : vector<128x256xf32>
    %6 = tpu.matmul %5, %3, %cst {dimension_numbers = #tpu.dot_dimension_numbers<[1], [1], [0], [0], [0, 0, 1, 0], [], []>} : vector<128x8xbf16>, vector<256x8xbf16>, vector<128x256xf32> -> vector<128x256xf32>
    %c0_6 = arith.constant 0 : index
    %c0_7 = arith.constant 0 : index
    %7 = vector.load %arg6[%c0_6, %c0_7] : memref<128x256xf32, #tpu.memory_space<vmem>>, vector<128x256xf32>
    tpu.vector_store %arg6[%c0_6, %c0_7], %6 {strides = array<i32>} : memref<128x256xf32, #tpu.memory_space<vmem>>, vector<128x256xf32>,
    %c0_8 = arith.constant 0 : index
    %c0_9 = arith.constant 0 : index
    %8 = vector.load %arg6[%c0_8, %c0_9] : memref<128x256xf32, #tpu.memory_space<vmem>>, vector<128x256xf32>
    %9 = vector.extract_strided_slice %1 {offsets = [0, 1, 0], sizes = [16, 16, 8], strides = [1, 1, 1]} : vector<18x18x8xbf16> to vector<16x16x8xbf16>
    %10 = vector.shape_cast %9 : vector<16x16x8xbf16> to vector<256x8xbf16>
    %c1 = arith.constant 1 : index
    %c0_10 = arith.constant 0 : index
    %c0_11 = arith.constant 0 : index
    %11 = vector.load %arg2[%c1, %c0_10, %c0_11] : memref<9x128x8xbf16, #tpu.memory_space<vmem>>, vector<1x128x8xbf16>
    %12 = vector.shape_cast %11 : vector<1x128x8xbf16> to vector<128x8xbf16>
    %cst_12 = arith.constant dense<0.000000e+00> : vector<128x256xf32>
    %13 = tpu.matmul %12, %10, %cst_12 {dimension_numbers = #tpu.dot_dimension_numbers<[1], [1], [0], [0], [0, 0, 1, 0], [], []>} : vector<128x8xbf16>, vector<256x8xbf16>, vector<128x256xf32> -> vector<128x256xf32>
    %14 = arith.addf %8, %13 : vector<128x256xf32>
    %c0_13 = arith.constant 0 : index
    %c0_14 = arith.constant 0 : index
    %15 = vector.load %arg6[%c0_13, %c0_14] : memref<128x256xf32, #tpu.memory_space<vmem>>, vector<128x256xf32>
    tpu.vector_store %arg6[%c0_13, %c0_14], %14 {strides = array<i32>} : memref<128x256xf32, #tpu.memory_space<vmem>>, vector<128x256xf32>,
    %c0_15 = arith.constant 0 : index
    %c0_16 = arith.constant 0 : index
    %16 = vector.load %arg6[%c0_15, %c0_16] : memref<128x256xf32, #tpu.memory_space<vmem>>, vector<128x256xf32>
    %17 = vector.extract_strided_slice %1 {offsets = [0, 2, 0], sizes = [16, 16, 8], strides = [1, 1, 1]} : vector<18x18x8xbf16> to vector<16x16x8xbf16>
    %18 = vector.shape_cast %17 : vector<16x16x8xbf16> to vector<256x8xbf16>
    %c2 = arith.constant 2 : index
    %c0_17 = arith.constant 0 : index
    %c0_18 = arith.constant 0 : index
    %19 = vector.load %arg2[%c2, %c0_17, %c0_18] : memref<9x128x8xbf16, #tpu.memory_space<vmem>>, vector<1x128x8xbf16>
    %20 = vector.shape_cast %19 : vector<1x128x8xbf16> to vector<128x8xbf16>
    %cst_19 = arith.constant dense<0.000000e+00> : vector<128x256xf32>
    %21 = tpu.matmul %20, %18, %cst_19 {dimension_numbers = #tpu.dot_dimension_numbers<[1], [1], [0], [0], [0, 0, 1, 0], [], []>} : vector<128x8xbf16>, vector<256x8xbf16>, vector<128x256xf32> -> vector<128x256xf32>
    %22 = arith.addf %16, %21 : vector<128x256xf32>
    %c0_20 = arith.constant 0 : index
    %c0_21 = arith.constant 0 : index
    %23 = vector.load %arg6[%c0_20, %c0_21] : memref<128x256xf32, #tpu.memory_space<vmem>>, vector<128x256xf32>
    tpu.vector_store %arg6[%c0_20, %c0_21], %22 {strides = array<i32>} : memref<128x256xf32, #tpu.memory_space<vmem>>, vector<128x256xf32>,
    %c0_22 = arith.constant 0 : index
    %c0_23 = arith.constant 0 : index
    %24 = vector.load %arg6[%c0_22, %c0_23] : memref<128x256xf32, #tpu.memory_space<vmem>>, vector<128x256xf32>
    %25 = vector.extract_strided_slice %1 {offsets = [1, 0, 0], sizes = [16, 16, 8], strides = [1, 1, 1]} : vector<18x18x8xbf16> to vector<16x16x8xbf16>
    %26 = vector.shape_cast %25 : vector<16x16x8xbf16> to vector<256x8xbf16>
    %c3 = arith.constant 3 : index
    %c0_24 = arith.constant 0 : index
    %c0_25 = arith.constant 0 : index
    %27 = vector.load %arg2[%c3, %c0_24, %c0_25] : memref<9x128x8xbf16, #tpu.memory_space<vmem>>, vector<1x128x8xbf16>
    %28 = vector.shape_cast %27 : vector<1x128x8xbf16> to vector<128x8xbf16>
    %cst_26 = arith.constant dense<0.000000e+00> : vector<128x256xf32>
    %29 = tpu.matmul %28, %26, %cst_26 {dimension_numbers = #tpu.dot_dimension_numbers<[1], [1], [0], [0], [0, 0, 1, 0], [], []>} : vector<128x8xbf16>, vector<256x8xbf16>, vector<128x256xf32> -> vector<128x256xf32>
    %30 = arith.addf %24, %29 : vector<128x256xf32>
    %c0_27 = arith.constant 0 : index
    %c0_28 = arith.constant 0 : index
    %31 = vector.load %arg6[%c0_27, %c0_28] : memref<128x256xf32, #tpu.memory_space<vmem>>, vector<128x256xf32>
    tpu.vector_store %arg6[%c0_27, %c0_28], %30 {strides = array<i32>} : memref<128x256xf32, #tpu.memory_space<vmem>>, vector<128x256xf32>,
    %c0_29 = arith.constant 0 : index
    %c0_30 = arith.constant 0 : index
    %32 = vector.load %arg6[%c0_29, %c0_30] : memref<128x256xf32, #tpu.memory_space<vmem>>, vector<128x256xf32>
    %33 = vector.extract_strided_slice %1 {offsets = [1, 1, 0], sizes = [16, 16, 8], strides = [1, 1, 1]} : vector<18x18x8xbf16> to vector<16x16x8xbf16>
    %34 = vector.shape_cast %33 : vector<16x16x8xbf16> to vector<256x8xbf16>
    %c4 = arith.constant 4 : index
    %c0_31 = arith.constant 0 : index
    %c0_32 = arith.constant 0 : index
    %35 = vector.load %arg2[%c4, %c0_31, %c0_32] : memref<9x128x8xbf16, #tpu.memory_space<vmem>>, vector<1x128x8xbf16>
    %36 = vector.shape_cast %35 : vector<1x128x8xbf16> to vector<128x8xbf16>
    %cst_33 = arith.constant dense<0.000000e+00> : vector<128x256xf32>
    %37 = tpu.matmul %36, %34, %cst_33 {dimension_numbers = #tpu.dot_dimension_numbers<[1], [1], [0], [0], [0, 0, 1, 0], [], []>} : vector<128x8xbf16>, vector<256x8xbf16>, vector<128x256xf32> -> vector<128x256xf32>
    %38 = arith.addf %32, %37 : vector<128x256xf32>
    %c0_34 = arith.constant 0 : index
    %c0_35 = arith.constant 0 : index
    %39 = vector.load %arg6[%c0_34, %c0_35] : memref<128x256xf32, #tpu.memory_space<vmem>>, vector<128x256xf32>
    tpu.vector_store %arg6[%c0_34, %c0_35], %38 {strides = array<i32>} : memref<128x256xf32, #tpu.memory_space<vmem>>, vector<128x256xf32>,
    %c0_36 = arith.constant 0 : index
    %c0_37 = arith.constant 0 : index
    %40 = vector.load %arg6[%c0_36, %c0_37] : memref<128x256xf32, #tpu.memory_space<vmem>>, vector<128x256xf32>
    %41 = vector.extract_strided_slice %1 {offsets = [1, 2, 0], sizes = [16, 16, 8], strides = [1, 1, 1]} : vector<18x18x8xbf16> to vector<16x16x8xbf16>
    %42 = vector.shape_cast %41 : vector<16x16x8xbf16> to vector<256x8xbf16>
    %c5 = arith.constant 5 : index
    %c0_38 = arith.constant 0 : index
    %c0_39 = arith.constant 0 : index
    %43 = vector.load %arg2[%c5, %c0_38, %c0_39] : memref<9x128x8xbf16, #tpu.memory_space<vmem>>, vector<1x128x8xbf16>
    %44 = vector.shape_cast %43 : vector<1x128x8xbf16> to vector<128x8xbf16>
    %cst_40 = arith.constant dense<0.000000e+00> : vector<128x256xf32>
    %45 = tpu.matmul %44, %42, %cst_40 {dimension_numbers = #tpu.dot_dimension_numbers<[1], [1], [0], [0], [0, 0, 1, 0], [], []>} : vector<128x8xbf16>, vector<256x8xbf16>, vector<128x256xf32> -> vector<128x256xf32>
    %46 = arith.addf %40, %45 : vector<128x256xf32>
    %c0_41 = arith.constant 0 : index
    %c0_42 = arith.constant 0 : index
    %47 = vector.load %arg6[%c0_41, %c0_42] : memref<128x256xf32, #tpu.memory_space<vmem>>, vector<128x256xf32>
    tpu.vector_store %arg6[%c0_41, %c0_42], %46 {strides = array<i32>} : memref<128x256xf32, #tpu.memory_space<vmem>>, vector<128x256xf32>,
    %c0_43 = arith.constant 0 : index
    %c0_44 = arith.constant 0 : index
    %48 = vector.load %arg6[%c0_43, %c0_44] : memref<128x256xf32, #tpu.memory_space<vmem>>, vector<128x256xf32>
    %49 = vector.extract_strided_slice %1 {offsets = [2, 0, 0], sizes = [16, 16, 8], strides = [1, 1, 1]} : vector<18x18x8xbf16> to vector<16x16x8xbf16>
    %50 = vector.shape_cast %49 : vector<16x16x8xbf16> to vector<256x8xbf16>
    %c6 = arith.constant 6 : index
    %c0_45 = arith.constant 0 : index
    %c0_46 = arith.constant 0 : index
    %51 = vector.load %arg2[%c6, %c0_45, %c0_46] : memref<9x128x8xbf16, #tpu.memory_space<vmem>>, vector<1x128x8xbf16>
    %52 = vector.shape_cast %51 : vector<1x128x8xbf16> to vector<128x8xbf16>
    %cst_47 = arith.constant dense<0.000000e+00> : vector<128x256xf32>
    %53 = tpu.matmul %52, %50, %cst_47 {dimension_numbers = #tpu.dot_dimension_numbers<[1], [1], [0], [0], [0, 0, 1, 0], [], []>} : vector<128x8xbf16>, vector<256x8xbf16>, vector<128x256xf32> -> vector<128x256xf32>
    %54 = arith.addf %48, %53 : vector<128x256xf32>
    %c0_48 = arith.constant 0 : index
    %c0_49 = arith.constant 0 : index
    %55 = vector.load %arg6[%c0_48, %c0_49] : memref<128x256xf32, #tpu.memory_space<vmem>>, vector<128x256xf32>
    tpu.vector_store %arg6[%c0_48, %c0_49], %54 {strides = array<i32>} : memref<128x256xf32, #tpu.memory_space<vmem>>, vector<128x256xf32>,
    %c0_50 = arith.constant 0 : index
    %c0_51 = arith.constant 0 : index
    %56 = vector.load %arg6[%c0_50, %c0_51] : memref<128x256xf32, #tpu.memory_space<vmem>>, vector<128x256xf32>
    %57 = vector.extract_strided_slice %1 {offsets = [2, 1, 0], sizes = [16, 16, 8], strides = [1, 1, 1]} : vector<18x18x8xbf16> to vector<16x16x8xbf16>
    %58 = vector.shape_cast %57 : vector<16x16x8xbf16> to vector<256x8xbf16>
    %c7 = arith.constant 7 : index
    %c0_52 = arith.constant 0 : index
    %c0_53 = arith.constant 0 : index
    %59 = vector.load %arg2[%c7, %c0_52, %c0_53] : memref<9x128x8xbf16, #tpu.memory_space<vmem>>, vector<1x128x8xbf16>
    %60 = vector.shape_cast %59 : vector<1x128x8xbf16> to vector<128x8xbf16>
    %cst_54 = arith.constant dense<0.000000e+00> : vector<128x256xf32>
    %61 = tpu.matmul %60, %58, %cst_54 {dimension_numbers = #tpu.dot_dimension_numbers<[1], [1], [0], [0], [0, 0, 1, 0], [], []>} : vector<128x8xbf16>, vector<256x8xbf16>, vector<128x256xf32> -> vector<128x256xf32>
    %62 = arith.addf %56, %61 : vector<128x256xf32>
    %c0_55 = arith.constant 0 : index
    %c0_56 = arith.constant 0 : index
    %63 = vector.load %arg6[%c0_55, %c0_56] : memref<128x256xf32, #tpu.memory_space<vmem>>, vector<128x256xf32>
    tpu.vector_store %arg6[%c0_55, %c0_56], %62 {strides = array<i32>} : memref<128x256xf32, #tpu.memory_space<vmem>>, vector<128x256xf32>,
    %c0_57 = arith.constant 0 : index
    %c0_58 = arith.constant 0 : index
    %64 = vector.load %arg6[%c0_57, %c0_58] : memref<128x256xf32, #tpu.memory_space<vmem>>, vector<128x256xf32>
    %65 = vector.extract_strided_slice %1 {offsets = [2, 2, 0], sizes = [16, 16, 8], strides = [1, 1, 1]} : vector<18x18x8xbf16> to vector<16x16x8xbf16>
    %66 = vector.shape_cast %65 : vector<16x16x8xbf16> to vector<256x8xbf16>
    %c8 = arith.constant 8 : index
    %c0_59 = arith.constant 0 : index
    %c0_60 = arith.constant 0 : index
    %67 = vector.load %arg2[%c8, %c0_59, %c0_60] : memref<9x128x8xbf16, #tpu.memory_space<vmem>>, vector<1x128x8xbf16>
    %68 = vector.shape_cast %67 : vector<1x128x8xbf16> to vector<128x8xbf16>
    %cst_61 = arith.constant dense<0.000000e+00> : vector<128x256xf32>
    %69 = tpu.matmul %68, %66, %cst_61 {dimension_numbers = #tpu.dot_dimension_numbers<[1], [1], [0], [0], [0, 0, 1, 0], [], []>} : vector<128x8xbf16>, vector<256x8xbf16>, vector<128x256xf32> -> vector<128x256xf32>
    %70 = arith.addf %64, %69 : vector<128x256xf32>
    %c0_62 = arith.constant 0 : index
    %c0_63 = arith.constant 0 : index
    %71 = vector.load %arg6[%c0_62, %c0_63] : memref<128x256xf32, #tpu.memory_space<vmem>>, vector<128x256xf32>
    tpu.vector_store %arg6[%c0_62, %c0_63], %70 {strides = array<i32>} : memref<128x256xf32, #tpu.memory_space<vmem>>, vector<128x256xf32>,
    %c0_64 = arith.constant 0 : index
    %c0_65 = arith.constant 0 : index
    %72 = vector.load %arg6[%c0_64, %c0_65] : memref<128x256xf32, #tpu.memory_space<vmem>>, vector<128x256xf32>
    %cst_66 = arith.constant dense<0.000000e+00> : vector<128xf32>
    %73 = vector.multi_reduction <add>, %72, %cst_66 [1] : vector<128x256xf32> to vector<128xf32>
    %74 = vector.shape_cast %73 : vector<128xf32> to vector<128x1xf32>
    %c0_67 = arith.constant 0 : index
    %c0_68 = arith.constant 0 : index
    %c0_69 = arith.constant 0 : index
    %75 = vector.load %arg4[%c0_67, %c0_68, %c0_69] : memref<1x128x1xf32, #tpu.memory_space<vmem>>, vector<1x128x1xf32>
    %76 = vector.shape_cast %75 : vector<1x128x1xf32> to vector<128x1xf32>
    %77 = vector.shape_cast %74 : vector<128x1xf32> to vector<1x128x1xf32>
    tpu.vector_store %arg4[%c0_67, %c0_68, %c0_69], %77 {strides = array<i32>} : memref<1x128x1xf32, #tpu.memory_space<vmem>>, vector<1x128x1xf32>,
    %78 = arith.mulf %72, %72 : vector<128x256xf32>
    %cst_70 = arith.constant dense<0.000000e+00> : vector<128xf32>
    %79 = vector.multi_reduction <add>, %78, %cst_70 [1] : vector<128x256xf32> to vector<128xf32>
    %80 = vector.shape_cast %79 : vector<128xf32> to vector<128x1xf32>
    %c0_71 = arith.constant 0 : index
    %c0_72 = arith.constant 0 : index
    %c0_73 = arith.constant 0 : index
    %81 = vector.load %arg5[%c0_71, %c0_72, %c0_73] : memref<1x128x1xf32, #tpu.memory_space<vmem>>, vector<1x128x1xf32>
    %82 = vector.shape_cast %81 : vector<1x128x1xf32> to vector<128x1xf32>
    %83 = vector.shape_cast %80 : vector<128x1xf32> to vector<1x128x1xf32>
    tpu.vector_store %arg5[%c0_71, %c0_72, %c0_73], %83 {strides = array<i32>} : memref<1x128x1xf32, #tpu.memory_space<vmem>>, vector<1x128x1xf32>,
    %84 = vector.extract_strided_slice %72 {offsets = [0, 0], sizes = [8, 256], strides = [1, 1]} : vector<128x256xf32> to vector<8x256xf32>
    %85 = arith.truncf %84 : vector<8x256xf32> to vector<8x256xbf16>
    %c0_74 = arith.constant 0 : index
    %c0_75 = arith.constant 0 : index
    %c0_76 = arith.constant 0 : index
    %86 = vector.load %arg3[%c0_74, %c0_75, %c0_76] : memref<1x8x256xbf16, #tpu.memory_space<vmem>>, vector<1x8x256xbf16>
    %87 = vector.shape_cast %86 : vector<1x8x256xbf16> to vector<8x256xbf16>
    %88 = vector.shape_cast %85 : vector<8x256xbf16> to vector<1x8x256xbf16>
    tpu.vector_store %arg3[%c0_74, %c0_75, %c0_76], %88 {strides = array<i32>} : memref<1x8x256xbf16, #tpu.memory_space<vmem>>, vector<1x8x256xbf16>,
    return
  }
  func.func @transform_0(%arg0: i32) -> (i32, i32, i32, i32) {
    %c0_i32 = arith.constant 0 : i32
    %c0_i32_0 = arith.constant 0 : i32
    %c0_i32_1 = arith.constant 0 : i32
    %c0_i32_2 = arith.constant 0 : i32
    return %arg0, %c0_i32, %c0_i32_0, %c0_i32_1 : i32, i32, i32, i32
  }
  func.func @transform_1(%arg0: i32) -> (i32, i32, i32) {
    %c0_i32 = arith.constant 0 : i32
    %c0_i32_0 = arith.constant 0 : i32
    %c0_i32_1 = arith.constant 0 : i32
    %c0_i32_2 = arith.constant 0 : i32
    return %c0_i32, %c0_i32_0, %c0_i32_1 : i32, i32, i32
  }
  func.func @transform_2(%arg0: i32) -> (i32, i32, i32) {
    %c0_i32 = arith.constant 0 : i32
    %c0_i32_0 = arith.constant 0 : i32
    %c0_i32_1 = arith.constant 0 : i32
    return %arg0, %c0_i32, %c0_i32_0 : i32, i32, i32
  }
  func.func @transform_3(%arg0: i32) -> (i32, i32, i32) {
    %c0_i32 = arith.constant 0 : i32
    %c0_i32_0 = arith.constant 0 : i32
    %c0_i32_1 = arith.constant 0 : i32
    return %arg0, %c0_i32, %c0_i32_0 : i32, i32, i32
  }
  func.func @transform_4(%arg0: i32) -> (i32, i32, i32) {
    %c0_i32 = arith.constant 0 : i32
    %c0_i32_0 = arith.constant 0 : i32
    %c0_i32_1 = arith.constant 0 : i32
    return %arg0, %c0_i32, %c0_i32_0 : i32, i32, i32
  }
}

</mosaic_0001>

<bundles_post_ra>
// kernel: tpu_custom_call.1
= control target key start
LH: loop header
LB: loop body
LE: loop exit
PB: predicated region body
PF: predicated region fallthrough
CT: control target
= control target key end

     0   :  { %10 = vsyncpa [#allocation4], 0  ;;  %s7075_s0 = inlined_call_operand.vmem [shape: bf16[2,18,18,8], index: 0, kind: input, shape index: {}]   ;;  %s7076_s1 = inlined_call_operand.vmem [shape: bf16[9,128,8], index: 1, kind: input, shape index: {}]   ;;  %s7077_s2 = inlined_call_operand.hbm [shape: bf16[2,8,256], index: 2, kind: output, shape index: {0}]   ;;  %s7078_s3 = inlined_call_operand.vmem [shape: f32[2,128,1], index: 3, kind: output, shape index: {1}]   ;;  %s7079_s4 = inlined_call_operand.vmem [shape: f32[2,128,1], index: 4, kind: output, shape index: {2}]  }
   0x1   :  { %12 = vsyncpa [#allocation4 + $0x1], 0  ;;  %s5073_s15 = smov 0   ;;  %s5075_s16 = smov 0  }
   0x2   :  { %s5077_s17 = smov 0   ;;  %s5079_s18 = smov 0  }
   0x3 LB: > { %s5094_s19 = sadd.s32 4294967295, %s5045_s18   ;;  %s4106_s20 = sadd.s32 4294967294, %s5045_s18   ;;  %s5045_s18 = sphi %s5079_s18, %s7301_s18   ;;  %s5041_s17 = sphi %s5077_s17, %s7300_s17   ;;  %s5037_s16 = sphi %s5075_s16, %s7299_s16   ;;  %s5033_s15 = sphi %s5073_s15, %s7298_s15  }
   0x4   : > { %s5098_s21 = sadd.s32 1, %s5045_s18   ;;  %s72_s22 = sadd.s32 1, %s5041_s17 }
   0x5   : > { %s69_s23 = ssub.s32 %s5045_s18, %s5098_s21  ;;  %p82_p0 = scmp.ne.s32.totalorder %s5041_s17, %s5037_s16 }
   0x6   : > { %p70_p1 = scmp.eq.s32.totalorder %s69_s23, 0  ;;  %p83_p2 = scmp.eq.s32.totalorder %s5094_s19, 1 }
   0x7   : > { %p88_p3 = scmp.ne.s32.totalorder %s5037_s16, %s5033_s15  ;;  %p89_p4 = scmp.eq.s32.totalorder %s4106_s20, 1 }
   0x8   : > { %s5109_s24 = scalar_select %p70_p1, %s5041_s17, %s72_s22  }
   0x9   : > { %p5111_p5 = por %p83_p2, %p82_p0  ;;  %p5115_p6 = por %p89_p4, %p88_p3 }
   0xa   : > { %p4109_p7 = scmp.ge.s32.totalorder %s5045_s18, 1  ;;  %p170_p8 = scmp.lt.s32.totalorder %s5045_s18, 3 }
   0xc   : > { %p171_p9 = pnand %p4109_p7, %p170_p8 }
   0xe   : > { %174 = sbr.rel (%p171_p9) target bundleno = 769 (0x301), region = 28 }
  0x13   : > { %p206_p10 = scmp.lt.s32.totalorder %s5094_s19, 1  ;;  %v5128_v0 = vld [vmem:[%s7076_s1] sm:$0xff]   ;;  %vm412_vm0 = vcmask 64512   ;;  %vm662_vm1 = vsmask.f32 3328  ;;  %vm1451_vm2 = vcmask 1042432  }
  0x14   : > { %4486 = vmatprep.mubr.msk.bf16.mxu0 %vm412_vm0, %v5128_v0  ;;  %v4912_v1 = vld [vmem:[%s7076_s1 + $0x40] sm:$0xff]   ;;  %vm1452_vm3 = vcmask 1046532   ;;  %vm663_vm4 = vsmask.f32 7440  ;;  %v4948_v47 = vld [vmem:[%s7076_s1 + $0x148] sm:$0xff]   ;;  %s4469_s14 = sshll.u32 %s5094_s19, 7 }
  0x15   : > { %s5123_s27 = scalar_select %p206_p10, %s5094_s19, 1  ;;  %4518 = vmatprep.mubr.msk.bf16.mxu1 %vm412_vm0, %v4912_v1  ;;  %vm5156_vm5 = vmor %vm1451_vm2, %vm1452_vm3 }
  0x16   : > { %vm5225_vm6 = vmor %vm662_vm1, %vm663_vm4  ;;  %s3989_s23 = scalar_lea.hbm %s7077_s2, %s4469_s14  ;;  %s5047_s5 = smov [#allocation3]  }
  0x17   : > { %s4854_s30 = smul.u32 216, %s5123_s27  ;;  %s4989_s6 = sshll.u32 %s5047_s5, 4  ;;  %s4990_s6 = int_to_ptr.vmem [resolvable:$false] %s4989_s6 }
  0x18   : > { %s4991_s7 = scalar_lea.vmem %s4990_s6, 256 }
  0x19   : > { %s5139_s9 = scalar_lea.vmem %s7075_s0, %s4854_s30 }
  0x1a   : > { %v267_v2 = vld [vmem:[%s5139_s9 + $0xb4] sm:$0xf]  ;;  %v5144_v3 = vld [vmem:[%s5139_s9 + $0xb8] sm:$0xf]  ;;  %v5165_v15 = vld [vmem:[%s5139_s9 + $0xa8] sm:$0xf] }
  0x1b   : > { %v5147_v4 = vld [vmem:[%s5139_s9 + $0x54] sm:$0xf]  ;;  %v5150_v5 = vcombine.low %v267_v2, %v5144_v3  ;;  %v1026_v6 = vshrl.u32 %v267_v2, 16  ;;  %v1029_v7 = vshll.u32 %v267_v2, 16  ;;  %v1039_v8 = vshrl.u32 %v5144_v3, 16 }
  0x1c   : > { %v5154_v9 = vld [vmem:[%s5139_s9 + $0x58] sm:$0xf]  ;;  %v4211_v11 = vrot.slane %v267_v2, 9  ;;  %v7080_v12 = vrot.slane %v5144_v3, 5  ;;  %v834_v14 = vshrl.u32 %v5147_v4, 16  ;;  %v837_v16 = vshll.u32 %v5147_v4, 16 }
  0x1d   : > { %7151 = vst [vmem:[#allocation6_spill] sm:$0xff] %v5150_v5  ;;  %v4131_v13 = vcombine.low %v5147_v4, %v5154_v9  ;;  %4774 = vmatprep.subr.msk.bf16.mxu0 %vm412_vm0, %v5150_v5  ;;  %v847_v17 = vshrl.u32 %v5154_v9, 16  ;;  %v5172_v18 = vld [vmem:[%s5139_s9 + $0xac] sm:$0xf]  ;;  %v1002_v19 = vshrl.u32 %v5165_v15, 16  ;;  %v1005_v20 = vshll.u32 %v5165_v15, 16 }
  0x1e   : > { %v5181_v22 = vcombine.low %v5165_v15, %v5172_v18  ;;  %v1015_v23 = vshrl.u32 %v5172_v18, 16  ;;  %v5185_v24 = vld [vmem:[%s5139_s9 + $0x48] sm:$0xf]  ;;  %v5188_v25 = vld [vmem:[%s5139_s9 + $0x4c] sm:$0xf]  ;;  %v5194_v26 = vsel %vm5156_vm5, %v4211_v11, %v7080_v12  ;;  %v1028_v32 = vrot.slane %v1026_v6, 4 }
  0x1f   : > { %v5177_v21 = vsel %vm412_vm0, %v4131_v13, 0  ;;  %v4130_v27 = vcombine.low %v5185_v24, %v5188_v25  ;;  %v810_v28 = vshrl.u32 %v5185_v24, 16  ;;  %v813_v29 = vshll.u32 %v5185_v24, 16  ;;  %v5203_v31 = vld [vmem:[%s5139_s9 + $0xbc] sm:$0x1] }
  0x20   : > { %7154 = vst [vmem:[#allocation7_spill] sm:$0xff] %v5177_v21  ;;  %7155 = vst [vmem:[#allocation8_spill] sm:$0xff] %v5181_v22  ;;  %4471 = vmatpush3.bf16.xpose.msra.mxu0 %v5177_v21  ;;  %v823_v30 = vshrl.u32 %v5188_v25, 16  ;;  %v1031_v33 = vrot.slane %v1029_v7, 5  ;;  %v1035_v34 = vshll.u32 %v5144_v3, 16  ;;  %v1041_v35 = vrot.slane %v1039_v8, 4 }
  0x21   : > { %4775 = vmatprep.subr.msk.bf16.mxu0 %vm412_vm0, %v5181_v22  ;;  %v5209_v36 = vld [vmem:[%s5139_s9 + $0x5c] sm:$0x1]  ;;  %v5212_v37 = vsel %vm412_vm0, %v4130_v27, 0  ;;  %v1045_v38 = vshll.u32 %v5203_v31, 16  ;;  %v836_v40 = vrot.slane %v834_v14, 4  ;;  %v839_v44 = vrot.slane %v837_v16, 5 }
  0x22   : > { %7156 = vst [vmem:[#allocation9_spill] sm:$0xff] %v5212_v37  ;;  %v5217_v41 = vld [vmem:[%s5139_s9 + $0x9c] sm:$0xf]  ;;  %v1032_v42 = vor.u32 %v1031_v33, %v1028_v32  ;;  %v1037_v43 = vrot.slane %v1035_v34, 5  ;;  %v843_v45 = vshll.u32 %v5154_v9, 16  ;;  %v849_v49 = vrot.slane %v847_v17, 4 }
  0x23   : > { %v5221_v46 = vld [vmem:[%s5139_s9 + $0xa0] sm:$0xf]  ;;  %v1047_v48 = vrot.slane %v1045_v38, 5  ;;  %v853_v50 = vshll.u32 %v5209_v36, 16  ;;  %v840_v54 = vor.u32 %v839_v44, %v836_v40  ;;  %v5235_v56 = vld [vmem:[%s5139_s9 + $0x3c] sm:$0xf] }
  0x24   : > { %v5232_v51 = vcombine.low %v5217_v41, %v5221_v46  ;;  %v1033_v52 = vrot.slane %v1032_v42, 4  ;;  %v1042_v53 = vor.u32 %v1041_v35, %v1037_v43  ;;  %v845_v55 = vrot.slane %v843_v45, 5  ;;  %v5238_v57 = vld [vmem:[%s5139_s9 + $0x40] sm:$0xf]  ;;  %v5252_v13 = vld [vmem:[%s5139_s9 + $0xb0] sm:$0x1] }
  0x25   : > { %v855_v58 = vrot.slane %v853_v50, 5  ;;  %v978_v59 = vshrl.u32 %v5217_v41, 16  ;;  %v981_v60 = vshll.u32 %v5217_v41, 16  ;;  %v991_v61 = vshrl.u32 %v5221_v46, 16  ;;  %v5267_v38 = vld [vmem:[%s5139_s9 + $0x50] sm:$0x1] }
  0x26   : > { %7159 = vst [vmem:[#allocation10_spill] sm:$0xff] %v5232_v51  ;;  %v1038_v62 = vsel %vm5225_vm6, %v1033_v52, %v1037_v43  ;;  %v1043_v63 = vrot.slane %v1042_v53, 4  ;;  %v841_v1 = vrot.slane %v840_v54, 4  ;;  %v850_v2 = vor.u32 %v849_v49, %v845_v55  ;;  %v5277_v49 = vld [vmem:[%s5139_s9 + $0x90] sm:$0xf] }
  0x27   : > { %v4129_v6 = vcombine.low %v5235_v56, %v5238_v57  ;;  %v786_v7 = vshrl.u32 %v5235_v56, 16  ;;  %v789_v8 = vshll.u32 %v5235_v56, 16  ;;  %v799_v11 = vshrl.u32 %v5238_v57, 16  ;;  %v5280_v50 = vld [vmem:[%s5139_s9 + $0x94] sm:$0xf] }
  0x28   : > { %4473 = vmatpush3.bf16.xpose.msra.mxu0 %v5212_v37  ;;  %v1048_v14 = vsel %vm5225_vm6, %v1043_v63, %v1047_v48  ;;  %v846_v16 = vsel %vm5225_vm6, %v841_v1, %v845_v55  ;;  %v851_v17 = vrot.slane %v850_v2, 4  ;;  %v1004_v27 = vrot.slane %v1002_v19, 4  ;;  %v5290_v63 = vld [vmem:[%s5139_s9 + $0x30] sm:$0xf] }
  0x29   : > { %4776 = vmatprep.subr.msk.bf16.mxu0 %vm412_vm0, %v5232_v51  ;;  %v5260_v32 = vcombine.low %v1038_v62, %v1048_v14  ;;  %v5263_v33 = vsel %vm412_vm0, %v4129_v6, 0  ;;  %v1007_v34 = vrot.slane %v1005_v20, 5  ;;  %v1011_v35 = vshll.u32 %v5172_v18, 16 }
  0x2a   : > { %7161 = vst [vmem:[#allocation12_spill] sm:$0xff] %v5263_v33  ;;  %v856_v40 = vsel %vm5225_vm6, %v851_v17, %v855_v58  ;;  %v1017_v42 = vrot.slane %v1015_v23, 4  ;;  %v1021_v43 = vshll.u32 %v5252_v13, 16  ;;  %v812_v19 = vrot.slane %v810_v28, 4 }
  0x2b   : > { %7160 = vst [vmem:[#allocation11_spill] sm:$0xff] %v5260_v32  ;;  %4782 = vmatprep.subr.msk.bf16.mxu1 %vm412_vm0, %v5260_v32  ;;  %v4179_v44 = vcombine.low %v846_v16, %v856_v40  ;;  %v1008_v20 = vor.u32 %v1007_v34, %v1004_v27  ;;  %v1013_v45 = vrot.slane %v1011_v35, 5  ;;  %v815_v48 = vrot.slane %v813_v29, 5  ;;  %v5293_v29 = vld [vmem:[%s5139_s9 + $0x34] sm:$0xf] }
  0x2c   : > { %v1023_v52 = vrot.slane %v1021_v43, 5  ;;  %v819_v53 = vshll.u32 %v5188_v25, 16  ;;  %v825_v23 = vrot.slane %v823_v30, 4  ;;  %v829_v28 = vshll.u32 %v5267_v38, 16  ;;  %v5312_v43 = vld [vmem:[%s5139_s9 + $0xa4] sm:$0x1] }
  0x2d   : > { %v5287_v54 = vsel %vm412_vm0, %v4179_v44, 0  ;;  %v1009_v55 = vrot.slane %v1008_v20, 4  ;;  %v1018_v58 = vor.u32 %v1017_v42, %v1013_v45  ;;  %v816_v62 = vor.u32 %v815_v48, %v812_v19 }
  0x2e   : > { %7162 = vst [vmem:[#allocation13_spill] sm:$0xff] %v5287_v54  ;;  %4503 = vmatpush3.bf16.xpose.msra.mxu1 %v5287_v54  ;;  %v821_v1 = vrot.slane %v819_v53, 5  ;;  %v831_v2 = vrot.slane %v829_v28, 5  ;;  %v5298_v30 = vcombine.low %v5277_v49, %v5280_v50  ;;  %v954_v6 = vshrl.u32 %v5277_v49, 16 }
  0x2f   : > { %v1014_v14 = vsel %vm5225_vm6, %v1009_v55, %v1013_v45  ;;  %v1019_v16 = vrot.slane %v1018_v58, 4  ;;  %v817_v17 = vrot.slane %v816_v62, 4  ;;  %v957_v27 = vshll.u32 %v5277_v49, 16  ;;  %v5328_v55 = vld [vmem:[%s5139_s9 + $0x44] sm:$0x1] }
  0x30   : > { %7163 = vst [vmem:[#allocation14_spill] sm:$0xff] %v5298_v30  ;;  %4475 = vmatpush3.bf16.xpose.msra.mxu0 %v5263_v33  ;;  %v826_v34 = vor.u32 %v825_v23, %v821_v1  ;;  %v967_v35 = vshrl.u32 %v5280_v50, 16  ;;  %v4128_v40 = vcombine.low %v5290_v63, %v5293_v29  ;;  %v762_v42 = vshrl.u32 %v5290_v63, 16 }
  0x31   : > { %4777 = vmatprep.subr.msk.bf16.mxu0 %vm412_vm0, %v5298_v30  ;;  %v1024_v19 = vsel %vm5225_vm6, %v1019_v16, %v1023_v52  ;;  %v822_v44 = vsel %vm5225_vm6, %v817_v17, %v821_v1  ;;  %v980_v28 = vrot.slane %v978_v59, 4  ;;  %v983_v52 = vrot.slane %v981_v60, 5 }
  0x32   : > { %v5320_v48 = vcombine.low %v1014_v14, %v1024_v19  ;;  %v827_v53 = vrot.slane %v826_v34, 4  ;;  %v5323_v23 = vsel %vm412_vm0, %v4128_v40, 0  ;;  %v987_v58 = vshll.u32 %v5221_v46, 16  ;;  %v5337_v14 = vld [vmem:[%s5139_s9 + $0x84] sm:$0xf] }
  0x33   : > { %7165 = vst [vmem:[#allocation16_spill] sm:$0xff] %v5323_v23  ;;  %v993_v62 = vrot.slane %v991_v61, 4  ;;  %v997_v1 = vshll.u32 %v5312_v43, 16  ;;  %v788_v16 = vrot.slane %v786_v7, 4  ;;  %v791_v60 = vrot.slane %v789_v8, 5 }
  0x34   : > { %7164 = vst [vmem:[#allocation15_spill] sm:$0xff] %v5320_v48  ;;  %4783 = vmatprep.subr.msk.bf16.mxu1 %vm412_vm0, %v5320_v48  ;;  %v832_v59 = vsel %vm5225_vm6, %v827_v53, %v831_v2  ;;  %v795_v17 = vshll.u32 %v5238_v57, 16  ;;  %v5349_v61 = vld [vmem:[%s5139_s9 + $0x88] sm:$0xf]  ;;  %v984_v40 = vor.u32 %v983_v52, %v980_v28  ;;  %v989_v19 = vrot.slane %v987_v58, 5 }
  0x35   : > { %v4178_v34 = vcombine.low %v822_v44, %v832_v59  ;;  %v999_v39 = vrot.slane %v997_v1, 5  ;;  %v792_v12 = vor.u32 %v791_v60, %v788_v16  ;;  %v801_v2 = vrot.slane %v799_v11, 4  ;;  %v5363_v28 = vld [vmem:[%s5139_s9 + $0x24] sm:$0xf]  ;;  %v5366_v52 = vld [vmem:[%s5139_s9 + $0x28] sm:$0xf] }
  0x36   : > { %v797_v45 = vrot.slane %v795_v17, 5  ;;  %v805_v7 = vshll.u32 %v5328_v55, 16  ;;  %v985_v8 = vrot.slane %v984_v40, 4  ;;  %v994_v20 = vor.u32 %v993_v62, %v989_v19  ;;  %7168 = vst [vmem:[#allocation19_spill] sm:$0xff] %v5366_v52  ;;  %v5423_v59 = vld [vmem:[%s5139_s9 + $0x1c] sm:$0xf] }
  0x37   : > { %v5355_v53 = vsel %vm412_vm0, %v4178_v34, 0  ;;  %v5360_v44 = vcombine.low %v5337_v14, %v5349_v61  ;;  %v793_v11 = vrot.slane %v792_v12, 4  ;;  %v933_v60 = vshll.u32 %v5337_v14, 16  ;;  %7175 = vst [vmem:[#allocation25_spill] sm:$0xff] %v5423_v59 }
  0x38   : > { %7166 = vst [vmem:[#allocation17_spill] sm:$0xff] %v5355_v53  ;;  %4477 = vmatpush3.bf16.xpose.msra.mxu0 %v5323_v23  ;;  %4505 = vmatpush3.bf16.xpose.msra.mxu1 %v5355_v53  ;;  %v802_v58 = vor.u32 %v801_v2, %v797_v45  ;;  %v807_v1 = vrot.slane %v805_v7, 5  ;;  %v990_v16 = vsel %vm5225_vm6, %v985_v8, %v989_v19  ;;  %v995_v62 = vrot.slane %v994_v20, 4  ;;  %v5382_v20 = vld [vmem:[%s5139_s9 + $0x98] sm:$0x1] }
  0x39   : > { %7167 = vst [vmem:[#allocation18_spill] sm:$0xff] %v5360_v44  ;;  %4778 = vmatprep.subr.msk.bf16.mxu0 %vm412_vm0, %v5360_v44  ;;  %v798_v12 = vsel %vm5225_vm6, %v793_v11, %v797_v45  ;;  %v4127_v40 = vcombine.low %v5363_v28, %v5366_v52  ;;  %v956_v17 = vrot.slane %v954_v6, 4  ;;  %v5403_v7 = vld [vmem:[%s5139_s9 + $0x78] sm:$0xf]  ;;  %v963_v6 = vshll.u32 %v5280_v50, 16 }
  0x3a   : > { %v803_v34 = vrot.slane %v802_v58, 4  ;;  %v1000_v19 = vsel %vm5225_vm6, %v995_v62, %v999_v39  ;;  %v959_v39 = vrot.slane %v957_v27, 5  ;;  %v5400_v62 = vld [vmem:[%s5139_s9 + $0x38] sm:$0x1]  ;;  %7171 = vst [vmem:[#allocation22_spill] sm:$0xff] %v5403_v7  ;;  %v764_v27 = vrot.slane %v762_v42, 4 }
  0x3b   : > { %v5390_v45 = vcombine.low %v990_v16, %v1000_v19  ;;  %v5395_v58 = vsel %vm412_vm0, %v4127_v40, 0  ;;  %v969_v16 = vrot.slane %v967_v35, 4  ;;  %v973_v19 = vshll.u32 %v5382_v20, 16  ;;  %v5465_v44 = vld [vmem:[%s5139_s9 + $0x6c] sm:$0xf] }
  0x3c   : > { %v808_v11 = vsel %vm5225_vm6, %v803_v34, %v807_v1  ;;  %7170 = vst [vmem:[#allocation21_spill] sm:$0xff] %v5395_v58  ;;  %v5410_v1 = vld [vmem:[%s5139_s9 + $0x7c] sm:$0xf]  ;;  %v960_v34 = vor.u32 %v959_v39, %v956_v17  ;;  %v7173_v40 = vshll.u32 %v5290_v63, 16  ;;  %v965_v53 = vrot.slane %v963_v6, 5  ;;  %7182 = vst [vmem:[#allocation30_spill] sm:$0xff] %v5465_v44 }
  0x3d   : > { %7169 = vst [vmem:[#allocation20_spill] sm:$0xff] %v5390_v45  ;;  %v4177_v8 = vcombine.low %v798_v12, %v808_v11  ;;  %7172 = vst [vmem:[#allocation23_spill] sm:$0xff] %v5410_v1  ;;  %4784 = vmatprep.subr.msk.bf16.mxu1 %vm412_vm0, %v5390_v45  ;;  %v771_v12 = vshll.u32 %v5293_v29, 16  ;;  %v5420_v11 = vld [vmem:[%s5139_s9 + $0x18] sm:$0xf]  ;;  %v975_v17 = vrot.slane %v973_v19, 5 }
  0x3e   : > { %v767_v2 = vrot.slane %v7173_v40, 5  ;;  %7174 = vst [vmem:[#allocation24_spill] sm:$0xff] %v5420_v11  ;;  %v7177_v39 = vshrl.u32 %v5293_v29, 16  ;;  %v961_v40 = vrot.slane %v960_v34, 4  ;;  %v781_v54 = vshll.u32 %v5400_v62, 16 }
  0x3f   : > { %v5426_v35 = vsel %vm412_vm0, %v4177_v8, 0  ;;  %v773_v48 = vrot.slane %v771_v12, 5  ;;  %v970_v32 = vor.u32 %v969_v16, %v965_v53  ;;  %v5435_v8 = vcombine.low %v5403_v7, %v5410_v1 }
  0x40   : > { %7176 = vst [vmem:[#allocation26_spill] sm:$0xff] %v5426_v35  ;;  %4479 = vmatpush3.bf16.xpose.msra.mxu0 %v5395_v58  ;;  %v777_v42 = vrot.slane %v7177_v39, 4  ;;  %4507 = vmatpush3.bf16.xpose.msra.mxu1 %v5426_v35  ;;  %v768_v45 = vor.u32 %v767_v2, %v764_v27  ;;  %v966_v19 = vsel %vm5225_vm6, %v961_v40, %v965_v53  ;;  %v783_v34 = vrot.slane %v781_v54, 5  ;;  %v5442_v2 = vld [vmem:[%s5139_s9 + $0x8c] sm:$0x1] }
  0x41   : > { %7178 = vst [vmem:[#allocation27_spill] sm:$0xff] %v5435_v8  ;;  %v971_v16 = vrot.slane %v970_v32, 4  ;;  %4779 = vmatprep.subr.msk.bf16.mxu0 %vm412_vm0, %v5435_v8  ;;  %v4126_v12 = vcombine.low %v5420_v11, %v5423_v59  ;;  %v5455_v40 = vld [vmem:[%s5139_s9 + $0x2c] sm:$0x1]  ;;  %v7181_v58 = vshrl.u32 %v5337_v14, 16  ;;  %v935_v6 = vrot.slane %v933_v60, 5 }
  0x42   : > { %v769_v39 = vrot.slane %v768_v45, 4  ;;  %v778_v35 = vor.u32 %v777_v42, %v773_v48  ;;  %7179 = vst [vmem:[#allocation28_spill] sm:$0xff] %v5455_v40  ;;  %v7186_v54 = vshrl.u32 %v5363_v28, 16  ;;  %v915_v22 = vshll.u32 %v5410_v1, 16 }
  0x43   : > { %v976_v32 = vsel %vm5225_vm6, %v971_v16, %v975_v17  ;;  %v5460_v27 = vsel %vm412_vm0, %v4126_v12, 0  ;;  %v932_v8 = vrot.slane %v7181_v58, 4  ;;  %v939_v17 = vshll.u32 %v5349_v61, 16 }
  0x44   : > { %v774_v53 = vsel %vm5225_vm6, %v769_v39, %v773_v48  ;;  %v779_v45 = vrot.slane %v778_v35, 4  ;;  %7180 = vst [vmem:[#allocation29_spill] sm:$0xff] %v5460_v27  ;;  %v5468_v48 = vld [vmem:[%s5139_s9 + $0x70] sm:$0xf]  ;;  %v5470_v35 = vcombine.low %v966_v19, %v976_v32  ;;  %v7185_v16 = vshrl.u32 %v5349_v61, 16 }
  0x45   : > { %7183 = vst [vmem:[#allocation31_spill] sm:$0xff] %v5468_v48  ;;  %v936_v60 = vor.u32 %v935_v6, %v932_v8  ;;  %v949_v58 = vshll.u32 %v5442_v2, 16  ;;  %v740_v23 = vrot.slane %v7186_v54, 4  ;;  %v941_v19 = vrot.slane %v939_v17, 5  ;;  %v5492_v8 = vld [vmem:[%s5139_s9 + $0x10] sm:$0xf] }
  0x46   : > { %7184 = vst [vmem:[#allocation32_spill] sm:$0xff] %v5470_v35  ;;  %v784_v39 = vsel %vm5225_vm6, %v779_v45, %v783_v34  ;;  %v945_v12 = vrot.slane %v7185_v16, 4  ;;  %4785 = vmatprep.subr.msk.bf16.mxu1 %vm412_vm0, %v5470_v35  ;;  %v7187_v34 = vshll.u32 %v5363_v28, 16  ;;  %v747_v32 = vshll.u32 %v5366_v52, 16 }
  0x47   : > { %v4176_v42 = vcombine.low %v774_v53, %v784_v39  ;;  %v7188_v16 = vshrl.u32 %v5366_v52, 16  ;;  %v5489_v39 = vld [vmem:[%s5139_s9 + $0xc] sm:$0xf]  ;;  %v937_v54 = vrot.slane %v936_v60, 4  ;;  %v757_v17 = vshll.u32 %v5455_v40, 16 }
  0x48   : > { %4481 = vmatpush3.bf16.xpose.msra.mxu0 %v5460_v27  ;;  %v743_v45 = vrot.slane %v7187_v34, 5  ;;  %7189 = vst [vmem:[#allocation33_spill] sm:$0xff] %v5489_v39  ;;  %v951_v27 = vrot.slane %v949_v58, 5  ;;  %v946_v34 = vor.u32 %v945_v12, %v941_v19  ;;  %v749_v30 = vrot.slane %v747_v32, 5  ;;  %v5508_v58 = vld [vmem:[%s5139_s9 + $0x80] sm:$0x1] }
  0x49   : > { %v753_v53 = vrot.slane %v7188_v16, 4  ;;  %v5495_v6 = vsel %vm412_vm0, %v4176_v42, 0  ;;  %v5501_v16 = vcombine.low %v5465_v44, %v5468_v48  ;;  %v942_v33 = vsel %vm5225_vm6, %v937_v54, %v941_v19  ;;  %7192 = vst [vmem:[#allocation36_spill] sm:$0xff] %v5508_v58 }
  0x4a   : > { %7190 = vst [vmem:[#allocation34_spill] sm:$0xff] %v5495_v6  ;;  %4509 = vmatpush3.bf16.xpose.msra.mxu1 %v5495_v6  ;;  %v744_v35 = vor.u32 %v743_v45, %v740_v23  ;;  %v759_v51 = vrot.slane %v757_v17, 5  ;;  %v947_v37 = vrot.slane %v946_v34, 4  ;;  %v895_v23 = vshrl.u32 %v5468_v48, 16  ;;  %v5519_v17 = vld [vmem:[%s5139_s9 + $0x20] sm:$0x1] }
  0x4b   : > { %7191 = vst [vmem:[#allocation35_spill] sm:$0xff] %v5501_v16  ;;  %v754_v12 = vor.u32 %v753_v53, %v749_v30  ;;  %4780 = vmatprep.subr.msk.bf16.mxu0 %vm412_vm0, %v5501_v16  ;;  %v4125_v19 = vcombine.low %v5489_v39, %v5492_v8  ;;  %7193 = vst [vmem:[#allocation37_spill] sm:$0xff] %v5519_v17  ;;  %v7194_v60 = vshrl.u32 %v5403_v7, 16  ;;  %v7197_v54 = vshll.u32 %v5403_v7, 16 }
  0x4c   : > { %v745_v6 = vrot.slane %v744_v35, 4  ;;  %v952_v35 = vsel %vm5225_vm6, %v947_v37, %v951_v27  ;;  %v5536_v37 = vld [vmem:[%s5139_s9 + $0x60] sm:$0xf]  ;;  %v5539_v27 = vld [vmem:[%s5139_s9 + $0x64] sm:$0xf]  ;;  %v917_v21 = vrot.slane %v915_v22, 5 }
  0x4d   : > { %v755_v34 = vrot.slane %v754_v12, 4  ;;  %v908_v42 = vrot.slane %v7194_v60, 4  ;;  %v5527_v16 = vcombine.low %v942_v33, %v952_v35  ;;  %v5530_v45 = vsel %vm412_vm0, %v4125_v19, 0  ;;  %7198 = vst [vmem:[#allocation40_spill] sm:$0xff] %v5536_v37 }
  0x4e   : > { %v750_v53 = vsel %vm5225_vm6, %v745_v6, %v749_v30  ;;  %7196 = vst [vmem:[#allocation39_spill] sm:$0xff] %v5530_v45  ;;  %v911_v32 = vrot.slane %v7197_v54, 5  ;;  %v7199_v33 = vshrl.u32 %v5410_v1, 16  ;;  %v925_v60 = vshll.u32 %v5508_v58, 16 }
  0x4f   : > { %7195 = vst [vmem:[#allocation38_spill] sm:$0xff] %v5527_v16  ;;  %v760_v30 = vsel %vm5225_vm6, %v755_v34, %v759_v51  ;;  %v7200_v12 = vshrl.u32 %v5420_v11, 16  ;;  %4786 = vmatprep.subr.msk.bf16.mxu1 %vm412_vm0, %v5527_v16  ;;  %v7201_v5 = vshll.u32 %v5420_v11, 16  ;;  %v5554_v51 = vld [vmem:[%s5139_s9] sm:$0xf]  ;;  %v7202_v58 = vshrl.u32 %v5423_v59, 16 }
  0x50   : > { %4483 = vmatpush3.bf16.xpose.msra.mxu0 %v5530_v45  ;;  %v921_v6 = vrot.slane %v7199_v33, 4  ;;  %v4175_v54 = vcombine.low %v750_v53, %v760_v30  ;;  %v912_v35 = vor.u32 %v911_v32, %v908_v42  ;;  %v5557_v34 = vld [vmem:[%s5139_s9 + $0x4] sm:$0xf]  ;;  %v927_v33 = vrot.slane %v925_v60, 5 }
  0x51   : > { %v716_v19 = vrot.slane %v7200_v12, 4  ;;  %v719_v7 = vrot.slane %v7201_v5, 5  ;;  %v723_v45 = vshll.u32 %v5423_v59, 16  ;;  %v729_v12 = vrot.slane %v7202_v58, 4  ;;  %v5573_v58 = vld [vmem:[%s5139_s9 + $0x74] sm:$0x1] }
  0x52   : > { %v733_v1 = vshll.u32 %v5519_v17, 16  ;;  %v5564_v53 = vsel %vm412_vm0, %v4175_v54, 0  ;;  %v913_v22 = vrot.slane %v912_v35, 4  ;;  %v922_v42 = vor.u32 %v921_v6, %v917_v21  ;;  %7204 = vst [vmem:[#allocation42_spill] sm:$0xff] %v5573_v58 }
  0x53   : > { %7203 = vst [vmem:[#allocation41_spill] sm:$0xff] %v5564_v53  ;;  %v720_v32 = vor.u32 %v719_v7, %v716_v19  ;;  %4511 = vmatpush3.bf16.xpose.msra.mxu1 %v5564_v53  ;;  %v725_v5 = vrot.slane %v723_v45, 5  ;;  %v5569_v60 = vcombine.low %v5536_v37, %v5539_v27  ;;  %v858_v16 = vshrl.u32 %v5536_v37, 16 }
  0x54   : > { %v735_v30 = vrot.slane %v733_v1, 5  ;;  %v918_v54 = vsel %vm5225_vm6, %v913_v22, %v917_v21  ;;  %v923_v17 = vrot.slane %v922_v42, 4  ;;  %v861_v7 = vshll.u32 %v5536_v37, 16  ;;  %v5591_v42 = vld [vmem:[%s5139_s9 + $0x14] sm:$0x1] }
  0x55   : > { %v721_v35 = vrot.slane %v720_v32, 4  ;;  %v730_v6 = vor.u32 %v729_v12, %v725_v5  ;;  %4781 = vmatprep.subr.msk.bf16.mxu0 %vm412_vm0, %v5569_v60  ;;  %v871_v1 = vshrl.u32 %v5539_v27, 16  ;;  %v4124_v45 = vcombine.low %v5554_v51, %v5557_v34 }
  0x56   : > { %v928_v53 = vsel %vm5225_vm6, %v923_v17, %v927_v33  ;;  %v7206_v11 = vshrl.u32 %v5465_v44, 16  ;;  %v7207_v17 = vshll.u32 %v5465_v44, 16  ;;  %v901_v12 = vshll.u32 %v5573_v58, 16 }
  0x57   : > { %v726_v21 = vsel %vm5225_vm6, %v721_v35, %v725_v5  ;;  %v5593_v32 = vcombine.low %v918_v54, %v928_v53  ;;  %v731_v37 = vrot.slane %v730_v6, 4  ;;  %v438_v59 = vsel %vm412_vm0, %v4124_v45, 0 }
  0x58   : > { %v884_v19 = vrot.slane %v7206_v11, 4  ;;  %4485 = vmatpush3.bf16.xpose.msra.mxu0 %v438_v59  ;;  %v887_v33 = vrot.slane %v7207_v17, 5  ;;  %v891_v5 = vshll.u32 %v5468_v48, 16  ;;  %v897_v35 = vrot.slane %v895_v23, 4 }
  0x59   : > { %7205 = vst [vmem:[#allocation43_spill] sm:$0xff] %v5593_v32  ;;  %4787 = vmatprep.subr.msk.bf16.mxu1 %vm412_vm0, %v5593_v32  ;;  %v736_v53 = vsel %vm5225_vm6, %v731_v37, %v735_v30  ;;  %v7208_v54 = vshrl.u32 %v5489_v39, 16  ;;  %v7209_v59 = vshll.u32 %v5489_v39, 16  ;;  %v699_v45 = vshll.u32 %v5492_v8, 16  ;;  %v5615_v37 = vld [vmem:[%s5139_s9 + $0x68] sm:$0x1] }
  0x5a   : > { %v4174_v17 = vcombine.low %v726_v21, %v736_v53  ;;  %v888_v22 = vor.u32 %v887_v33, %v884_v19  ;;  %v893_v48 = vrot.slane %v891_v5, 5  ;;  %v903_v23 = vrot.slane %v901_v12, 5  ;;  %v4911_v19 = vld [vmem:[%s7076_s1 + $0x8] sm:$0xff]  }
  0x5b   : > { %v692_v6 = vrot.slane %v7208_v54, 4  ;;  %v695_v11 = vrot.slane %v7209_v59, 5  ;;  %v701_v58 = vrot.slane %v699_v45, 5  ;;  %v7210_v40 = vshrl.u32 %v5492_v8, 16  ;;  %v5652_v45 = vld [vmem:[%s5139_s9 + $0x8] sm:$0x1] }
  0x5c   : > { %v709_v52 = vshll.u32 %v5591_v42, 16  ;;  %v5618_v30 = vsel %vm412_vm0, %v4174_v17, 0  ;;  %v889_v54 = vrot.slane %v888_v22, 4  ;;  %v898_v59 = vor.u32 %v897_v35, %v893_v48 }
  0x5d   : > { %v696_v44 = vor.u32 %v695_v11, %v692_v6  ;;  %v705_v32 = vrot.slane %v7210_v40, 4  ;;  %v7211_v39 = vrot.slane %v5144_v3, 5  ;;  %4513 = vmatpush3.bf16.xpose.msra.mxu1 %v5618_v30  ;;  %v860_v5 = vrot.slane %v858_v16, 4 }
  0x5e   : > { %v711_v33 = vrot.slane %v709_v52, 5  ;;  %v894_v53 = vsel %vm5225_vm6, %v889_v54, %v893_v48  ;;  %v899_v6 = vrot.slane %v898_v59, 4  ;;  %v7212_v22 = vrot.slane %v5203_v31, 5 }
  0x5f   : > { %v1563_v21 = vrot.slane %v7211_v39, 4  ;;  %v697_v12 = vrot.slane %v696_v44, 4  ;;  %v706_v40 = vor.u32 %v705_v32, %v701_v58  ;;  %v863_v39 = vrot.slane %v861_v7, 5  ;;  %4487 = vmatmul.mubr.msk.bf16.vlgmr.msra.gmra.mxu0 %vm412_vm0, %v5128_v0 }
  0x60   : > { %v867_v52 = vshll.u32 %v5539_v27, 16  ;;  %v904_v31 = vsel %vm5225_vm6, %v899_v6, %v903_v23  ;;  %v873_v16 = vrot.slane %v871_v1, 4  ;;  %v877_v7 = vshll.u32 %v5615_v37, 16  ;;  %4488 = vmatprep.mubr.msk.bf16.mxu0 %vm412_vm0, %v4911_v19 }
  0x61   : > { %v1565_v3 = vsel %vm5156_vm5, %v1563_v21, %v7212_v22  ;;  %v702_v35 = vsel %vm5225_vm6, %v697_v12, %v701_v58  ;;  %v707_v11 = vrot.slane %v706_v40, 4  ;;  %v864_v48 = vor.u32 %v863_v39, %v860_v5 }
  0x62   : > { %v5637_v44 = vcombine.low %v5194_v26, %v1565_v3  ;;  %v5644_v32 = vcombine.low %v894_v53, %v904_v31  ;;  %v869_v0 = vrot.slane %v867_v52, 5  ;;  %v4203_v26 = vrot.slane %v5147_v4, 9  ;;  %v4914_v4 = vld [vmem:[%s7076_s1 + $0x10] sm:$0xff]  }
  0x63   : > { %v712_v58 = vsel %vm5225_vm6, %v707_v11, %v711_v33  ;;  %v865_v23 = vrot.slane %v864_v48, 4  ;;  %v879_v1 = vrot.slane %v877_v7, 5  ;;  %v1505_v54 = vrot.slane %v5154_v9, 5 }
  0x64   : > { %4790 = vmatprep.subr.msk.bf16.mxu0 %vm412_vm0, %v5637_v44  ;;  %v4173_v17 = vcombine.low %v702_v35, %v712_v58  ;;  %4788 = vmatprep.subr.msk.bf16.mxu1 %vm412_vm0, %v5644_v32  ;;  %v874_v59 = vor.u32 %v873_v16, %v869_v0  ;;  %v1508_v21 = vrot.slane %v5209_v36, 5  ;;  %v7213_v12 = vshrl.u32 %v5554_v51, 16 }
  0x65   : > { %v7214_v33 = vshll.u32 %v5554_v51, 16  ;;  %v870_v9 = vsel %vm5225_vm6, %v865_v23, %v869_v0  ;;  %v1506_v6 = vsel %vm5156_vm5, %v4203_v26, %v1505_v54  ;;  %v1507_v36 = vrot.slane %v1505_v54, 4 }
  0x66   : > { %v668_v40 = vrot.slane %v7213_v12, 4  ;;  %v5666_v53 = vsel %vm412_vm0, %v4173_v17, 0  ;;  %v875_v22 = vrot.slane %v874_v59, 4  ;;  %v675_v39 = vshll.u32 %v5557_v34, 16  ;;  %v5685_v17 = vld [vmem:[%s5139_s9 + $0xc0] sm:$0xf] }
  0x67   : > { %v671_v5 = vrot.slane %v7214_v33, 5  ;;  %4515 = vmatpush3.bf16.xpose.msra.mxu1 %v5666_v53  ;;  %v7215_v35 = vshrl.u32 %v5557_v34, 16  ;;  %v1509_v52 = vsel %vm5156_vm5, %v1507_v36, %v1508_v21  ;;  %v685_v31 = vshll.u32 %v5652_v45, 16  ;;  %4489 = vmatmul.mubr.msk.bf16.gmra.mxu0 %vm412_vm0, %v4911_v19  ;;  %v5697_v12 = vld [vmem:[%s5139_s9 + $0xc4] sm:$0xf] }
  0x68   : > { %v4210_v48 = vrot.slane %v5165_v15, 9  ;;  %v1554_v16 = vrot.slane %v5172_v18, 5  ;;  %v880_v7 = vsel %vm5225_vm6, %v875_v22, %v879_v1  ;;  %v4243_v58 = vcombine.low %v1506_v6, %v1509_v52  ;;  %4490 = vmatprep.mubr.msk.bf16.mxu0 %vm412_vm0, %v4914_v4 }
  0x69   : > { %v672_v3 = vor.u32 %v671_v5, %v668_v40  ;;  %v681_v11 = vrot.slane %v7215_v35, 4  ;;  %v677_v26 = vrot.slane %v675_v39, 5  ;;  %v5687_v23 = vcombine.low %v870_v9, %v880_v7 }
  0x6a   : > { %v687_v54 = vrot.slane %v685_v31, 5  ;;  %v1556_v59 = vrot.slane %v1554_v16, 4  ;;  %v5691_v15 = vsel %vm412_vm0, %v4243_v58, 0  ;;  %v1555_v1 = vsel %vm5156_vm5, %v4210_v48, %v1554_v16 }
  0x6b   : > { %v673_v0 = vrot.slane %v672_v3, 4  ;;  %v682_v18 = vor.u32 %v681_v11, %v677_v26  ;;  %v1557_v21 = vrot.slane %v5252_v13, 5  ;;  %4789 = vmatprep.subr.msk.bf16.mxu1 %vm412_vm0, %v5687_v23  ;;  %4535 = vmatpush3.bf16.xpose.msra.mxu0 %v5691_v15  ;;  %v4202_v19 = vrot.slane %v5185_v24, 9 }
  0x6c   : > { %v1498_v40 = vrot.slane %v5188_v25, 5  ;;  %v1501_v33 = vrot.slane %v5267_v38, 5  ;;  %v5715_v24 = vcombine.low %v5685_v17, %v5697_v12  ;;  %v4916_v25 = vld [vmem:[%s7076_s1 + $0x18] sm:$0xff]   ;;  %v5724_v3 = vsel %vm412_vm0, %v5569_v60, 0 }
  0x6d   : > { %v678_v5 = vsel %vm5225_vm6, %v673_v0, %v677_v26  ;;  %v683_v9 = vrot.slane %v682_v18, 4  ;;  %v1558_v13 = vsel %vm5156_vm5, %v1556_v59, %v1557_v21  ;;  %v4209_v39 = vrot.slane %v5217_v41, 9  ;;  %v5761_v59 = vld [vmem:[%s7076_s1 + $0x48] sm:$0xff]  }
  0x6e   : > { %v5709_v6 = vcombine.low %v1555_v1, %v1558_v13  ;;  %v1499_v36 = vsel %vm5156_vm5, %v4202_v19, %v1498_v40  ;;  %v1500_v22 = vrot.slane %v1498_v40, 4  ;;  %v1547_v35 = vrot.slane %v5221_v46, 5  ;;  %v4918_v40 = vld [vmem:[%s7076_s1 + $0x20] sm:$0xff]  }
  0x6f   : > { %v688_v38 = vsel %vm5225_vm6, %v683_v9, %v687_v54  ;;  %v1550_v31 = vrot.slane %v5312_v43, 5  ;;  %v4201_v48 = vrot.slane %v5235_v56, 9  ;;  %4491 = vmatmul.mubr.msk.bf16.gmra.mxu0 %vm412_vm0, %v4914_v4  ;;  %v1491_v46 = vrot.slane %v5238_v57, 5 }
  0x70   : > { %v4172_v11 = vcombine.low %v678_v5, %v688_v38  ;;  %4791 = vmatprep.subr.msk.bf16.mxu0 %vm412_vm0, %v5709_v6  ;;  %v1502_v52 = vsel %vm5156_vm5, %v1500_v22, %v1501_v33  ;;  %v1548_v60 = vsel %vm5156_vm5, %v4209_v39, %v1547_v35  ;;  %v1549_v41 = vrot.slane %v1547_v35, 4  ;;  %4492 = vmatprep.mubr.msk.bf16.mxu0 %vm412_vm0, %v4916_v25 }
  0x71   : > { %v4242_v16 = vcombine.low %v1499_v36, %v1502_v52  ;;  %v1494_v58 = vrot.slane %v5328_v55, 5  ;;  %v4208_v0 = vrot.slane %v5277_v49, 9  ;;  %v1540_v43 = vrot.slane %v5280_v50, 5 }
  0x72   : > { %v1179_v7 = vsel %vm412_vm0, %v4172_v11, 0  ;;  %v1551_v4 = vsel %vm5156_vm5, %v1549_v41, %v1550_v31  ;;  %v1492_v57 = vsel %vm5156_vm5, %v4201_v48, %v1491_v46  ;;  %v1493_v26 = vrot.slane %v1491_v46, 4  ;;  %v7217_v11 = vld [vmem:[#allocation28_spill] sm:$0xff]  ;;  %v7218_v31 = vld [vmem:[#allocation22_spill] sm:$0xff] }
  0x73   : > { %4517 = vmatpush3.bf16.xpose.msra.mxu1 %v1179_v7  ;;  %v5744_v56 = vsel %vm412_vm0, %v4242_v16, 0  ;;  %v5753_v55 = vcombine.low %v1548_v60, %v1551_v4  ;;  %v1541_v49 = vsel %vm5156_vm5, %v4208_v0, %v1540_v43  ;;  %v1542_v50 = vrot.slane %v1540_v43, 4  ;;  %v4984_v48 = vld [vmem:[%s7076_s1 + $0x40] sm:$0xff]   ;;  %v7223_v4 = vld [vmem:[#allocation6_spill] sm:$0xff] }
  0x74   : > { %4537 = vmatpush3.bf16.xpose.msra.mxu0 %v5744_v56  ;;  %4798 = vmatprep.subr.msk.bf16.mxu1 %vm412_vm0, %v5715_v24  ;;  %v1543_v54 = vrot.slane %v5382_v20, 5  ;;  %v1495_v18 = vsel %vm5156_vm5, %v1493_v26, %v1494_v58  ;;  %v4200_v1 = vrot.slane %v5290_v63, 9  ;;  %v1484_v21 = vrot.slane %v5293_v29, 5  ;;  %v7220_v60 = vld [vmem:[#allocation36_spill] sm:$0xff] }
  0x75   : > { %v1487_v19 = vrot.slane %v5400_v62, 5  ;;  %4792 = vmatprep.subr.msk.bf16.mxu0 %vm412_vm0, %v5753_v55  ;;  %v4241_v20 = vcombine.low %v1492_v57, %v1495_v18  ;;  %v4207_v5 = vrot.slane %v5337_v14, 9  ;;  %v1533_v9 = vrot.slane %v5349_v61, 5  ;;  %v7216_v61 = vld [vmem:[#allocation19_spill] sm:$0xff]  ;;  %v7222_v0 = vld [vmem:[#allocation24_spill] sm:$0xff]  ;;  %v4917_v18 = vld [vmem:[%s7076_s1 + $0x50] sm:$0xff]  }
  0x76   : > { %v1544_v33 = vsel %vm5156_vm5, %v1542_v50, %v1543_v54  ;;  %v1485_v29 = vsel %vm5156_vm5, %v4200_v1, %v1484_v21  ;;  %v1486_v62 = vrot.slane %v1484_v21, 4  ;;  %v1536_v13 = vrot.slane %v5442_v2, 5  ;;  %v7224_v50 = vld [vmem:[#allocation25_spill] sm:$0xff] }
  0x77   : > { %v5777_v63 = vcombine.low %v1541_v49, %v1544_v33  ;;  %v5783_v36 = vsel %vm412_vm0, %v4241_v20, 0  ;;  %v1534_v22 = vsel %vm5156_vm5, %v4207_v5, %v1533_v9  ;;  %v1535_v38 = vrot.slane %v1533_v9, 4  ;;  %4493 = vmatmul.mubr.msk.bf16.gmra.mxu0 %vm412_vm0, %v4916_v25  ;;  %v7219_v25 = vld [vmem:[#allocation23_spill] sm:$0xff]  ;;  %v7225_v21 = vld [vmem:[#allocation37_spill] sm:$0xff]  ;;  %v7226_v20 = vld [vmem:[#allocation30_spill] sm:$0xff] }
  0x78   : > { %v4199_v39 = vrot.slane %v5363_v28, 9  ;;  %v1488_v14 = vsel %vm5156_vm5, %v1486_v62, %v1487_v19  ;;  %v1477_v35 = vrot.slane %v7216_v61, 5  ;;  %v1480_v52 = vrot.slane %v7217_v11, 5  ;;  %4494 = vmatprep.mubr.msk.bf16.mxu0 %vm412_vm0, %v4918_v40  ;;  %v7227_v5 = vld [vmem:[#allocation31_spill] sm:$0xff]  ;;  %v4920_v62 = vld [vmem:[%s7076_s1 + $0x28] sm:$0xff]  }
  0x79   : > { %v4206_v2 = vrot.slane %v7218_v31, 9  ;;  %v1537_v28 = vsel %vm5156_vm5, %v1535_v38, %v1536_v13  ;;  %v1526_v16 = vrot.slane %v7219_v25, 5  ;;  %v1529_v41 = vrot.slane %v7220_v60, 5 }
  0x7a   : > { %4519 = vmatmul.mubr.msk.bf16.vlgmr.msra.gmra.mxu1 %vm412_vm0, %v4984_v48  ;;  %v5806_v46 = vcombine.low %v1534_v22, %v1537_v28  ;;  %v1478_v7 = vsel %vm5156_vm5, %v4199_v39, %v1477_v35  ;;  %v1479_v58 = vrot.slane %v1477_v35, 4  ;;  %v4198_v43 = vrot.slane %v7222_v0, 9  ;;  %v7229_v35 = vld [vmem:[#allocation42_spill] sm:$0xff] }
  0x7b   : > { %4567 = vmatpush3.bf16.xpose.msra.mxu1 %v5724_v3  ;;  %4520 = vmatprep.mubr.msk.bf16.mxu1 %vm412_vm0, %v5761_v59  ;;  %v4240_v57 = vcombine.low %v1485_v29, %v1488_v14  ;;  %v1527_v26 = vsel %vm5156_vm5, %v4206_v2, %v1526_v16  ;;  %v1528_v49 = vrot.slane %v1526_v16, 4  ;;  %v1470_v54 = vrot.slane %v7224_v50, 5  ;;  %v7230_v2 = vld [vmem:[#allocation33_spill] sm:$0xff] }
  0x7c   : > { %7221 = vst [vmem:[#allocation19_spill] sm:$0xff] %v5806_v46  ;;  %4539 = vmatpush3.bf16.xpose.msra.mxu0 %v5783_v36  ;;  %4799 = vmatprep.subr.msk.bf16.mxu1 %vm412_vm0, %v7223_v4  ;;  %v1481_v1 = vsel %vm5156_vm5, %v1479_v58, %v1480_v52  ;;  %v1473_v19 = vrot.slane %v7225_v21, 5  ;;  %v4205_v33 = vrot.slane %v7226_v20, 9  ;;  %v1519_v9 = vrot.slane %v7227_v5, 5 }
  0x7d   : > { %4793 = vmatprep.subr.msk.bf16.mxu0 %vm412_vm0, %v5777_v63  ;;  %v4239_v29 = vcombine.low %v1478_v7, %v1481_v1  ;;  %v1530_v13 = vsel %vm5156_vm5, %v1528_v49, %v1529_v41  ;;  %v1471_v22 = vsel %vm5156_vm5, %v4198_v43, %v1470_v54  ;;  %v1472_v38 = vrot.slane %v1470_v54, 4  ;;  %v7231_v41 = vld [vmem:[#allocation40_spill] sm:$0xff]  ;;  %v7232_v43 = vld [vmem:[#allocation7_spill] sm:$0xff]  ;;  %v4922_v1 = vld [vmem:[%s7076_s1 + $0x30] sm:$0xff]  }
  0x7e   : > { %v5834_v39 = vcombine.low %v1527_v26, %v1530_v13  ;;  %v1520_v14 = vsel %vm5156_vm5, %v4205_v33, %v1519_v9  ;;  %v1521_v61 = vrot.slane %v1519_v9, 4  ;;  %v1522_v11 = vrot.slane %v7229_v35, 5  ;;  %v7233_v26 = vld [vmem:[#allocation8_spill] sm:$0xff]  ;;  %v7235_v9 = vld [vmem:[#allocation9_spill] sm:$0xff]  ;;  %v7236_v13 = vld [vmem:[#allocation10_spill] sm:$0xff] }
  0x7f   : > { %v5840_v52 = vsel %vm412_vm0, %v4240_v57, 0  ;;  %v1474_v31 = vsel %vm5156_vm5, %v1472_v38, %v1473_v19  ;;  %v4197_v48 = vrot.slane %v7230_v2, 9  ;;  %v1463_v28 = vrot.slane %v5492_v8, 5  ;;  %4495 = vmatmul.mubr.msk.bf16.gmra.mxu0 %vm412_vm0, %v4918_v40  ;;  %v4919_v19 = vld [vmem:[%s7076_s1 + $0x58] sm:$0xff]   ;;  %v272_v35 = vld [vmem:[%s5139_s9 + $0xc8] sm:$0x1] }
  0x80   : > { %7228 = vst [vmem:[#allocation28_spill] sm:$0xff] %v5834_v39  ;;  %v4238_v25 = vcombine.low %v1471_v22, %v1474_v31  ;;  %v1523_v16 = vsel %vm5156_vm5, %v1521_v61, %v1522_v11  ;;  %v1466_v60 = vrot.slane %v5591_v42, 5  ;;  %v4204_v7 = vrot.slane %v7231_v41, 9  ;;  %4496 = vmatprep.mubr.msk.bf16.mxu0 %vm412_vm0, %v4920_v62 }
  0x81   : > { %v5854_v58 = vcombine.low %v1520_v14, %v1523_v16  ;;  %v1464_v8 = vsel %vm5156_vm5, %v4197_v48, %v1463_v28  ;;  %v1465_v0 = vrot.slane %v1463_v28, 4  ;;  %v1512_v40 = vrot.slane %v5539_v27, 5  ;;  %v4921_v14 = vld [vmem:[%s7076_s1 + $0x60] sm:$0xff]   ;;  %v7238_v16 = vld [vmem:[#allocation14_spill] sm:$0xff] }
  0x82   : > { %4521 = vmatmul.mubr.msk.bf16.gmra.mxu1 %vm412_vm0, %v5761_v59  ;;  %v1515_v42 = vrot.slane %v5615_v37, 5  ;;  %v4196_v57 = vrot.slane %v5554_v51, 9  ;;  %v1456_v59 = vrot.slane %v5557_v34, 5  ;;  %v1459_v54 = vrot.slane %v5652_v45, 5  ;;  %v7237_v28 = vld [vmem:[#allocation12_spill] sm:$0xff] }
  0x83   : > { %4569 = vmatpush3.bf16.xpose.msra.mxu1 %v7232_v43  ;;  %4522 = vmatprep.mubr.msk.bf16.mxu1 %vm412_vm0, %v4917_v18  ;;  %v1467_v49 = vsel %vm5156_vm5, %v1465_v0, %v1466_v60  ;;  %v1513_v27 = vsel %vm5156_vm5, %v4204_v7, %v1512_v40  ;;  %v1514_v50 = vrot.slane %v1512_v40, 4  ;;  %v5889_v5 = vsel %vm412_vm0, %v4239_v29, 0  ;;  %v4926_v60 = vld [vmem:[%s7076_s1 + $0x80] sm:$0xff]   ;;  %v4923_v7 = vld [vmem:[%s7076_s1 + $0x68] sm:$0xff]  }
  0x84   : > { %4541 = vmatpush3.bf16.xpose.msra.mxu0 %v5840_v52  ;;  %4800 = vmatprep.subr.msk.bf16.mxu1 %vm412_vm0, %v7233_v26  ;;  %v4237_v51 = vcombine.low %v1464_v8, %v1467_v49  ;;  %v1457_v34 = vsel %vm5156_vm5, %v4196_v57, %v1456_v59  ;;  %v1458_v37 = vrot.slane %v1456_v59, 4  ;;  %7234 = vst [vmem:[#allocation22_spill] sm:$0xff] %v5889_v5  ;;  %v2251_v22 = vshrl.u32 %v5685_v17, 16  ;;  %v7239_v59 = vld [vmem:[#allocation16_spill] sm:$0xff]  ;;  %v7240_v49 = vld [vmem:[#allocation18_spill] sm:$0xff] }
  0x85   : > { %4794 = vmatprep.subr.msk.bf16.mxu0 %vm412_vm0, %v5806_v46  ;;  %v1516_v21 = vsel %vm5156_vm5, %v1514_v50, %v1515_v42  ;;  %v2254_v29 = vshll.u32 %v5685_v17, 16  ;;  %v2260_v38 = vshll.u32 %v5697_v12, 16  ;;  %v5912_v61 = vsel %vm412_vm0, %v4238_v25, 0 }
  0x86   : > { %v5884_v45 = vcombine.low %v1513_v27, %v1516_v21  ;;  %v1460_v20 = vsel %vm5156_vm5, %v1458_v37, %v1459_v54  ;;  %v2253_v11 = vrot.slane %v2251_v22, 4  ;;  %v5924_v25 = vsel %vm412_vm0, %v4237_v51, 0  ;;  %v4925_v54 = vld [vmem:[%s7076_s1 + $0x70] sm:$0xff]   ;;  %v7241_v37 = vld [vmem:[#allocation21_spill] sm:$0xff] }
  0x87   : > { %v4236_v33 = vcombine.low %v1457_v34, %v1460_v20  ;;  %4497 = vmatmul.mubr.msk.bf16.gmra.mxu0 %vm412_vm0, %v4920_v62  ;;  %v2264_v62 = vshrl.u32 %v5697_v12, 16  ;;  %v2256_v31 = vrot.slane %v2254_v29, 5  ;;  %v2262_v2 = vrot.slane %v2260_v38, 5  ;;  %v4928_v20 = vld [vmem:[%s7076_s1 + $0x88] sm:$0xff]   ;;  %v7245_v38 = vld [vmem:[#allocation11_spill] sm:$0xff] }
  0x88   : > { %4498 = vmatprep.mubr.msk.bf16.mxu0 %vm412_vm0, %v4922_v1  ;;  %v2270_v41 = vshll.u32 %v272_v35, 16  ;;  %v2573_v21 = vrot.slane %v5697_v12, 5  ;;  %v2576_v29 = vrot.slane %v272_v35, 5  ;;  %v7244_v12 = vld [vmem:[#allocation35_spill] sm:$0xff] }
  0x89   : > { %v2266_v48 = vrot.slane %v2264_v62, 4  ;;  %v2257_v8 = vor.u32 %v2256_v31, %v2253_v11  ;;  %v1696_v51 = vsel %vm412_vm0, %v4236_v33, 0  ;;  %v4326_v33 = vrot.slane %v5685_v17, 9  ;;  %v7243_v62 = vld [vmem:[#allocation29_spill] sm:$0xff]  ;;  %v4930_v11 = vld [vmem:[%s7076_s1 + $0x90] sm:$0xff]   ;;  %v7246_v31 = vld [vmem:[#allocation39_spill] sm:$0xff] }
  0x8a   : > { %4523 = vmatmul.mubr.msk.bf16.gmra.mxu1 %vm412_vm0, %v4917_v18  ;;  %v4924_v18 = vld [vmem:[%s7076_s1 + $0x38] sm:$0xff]   ;;  %v2272_v57 = vrot.slane %v2270_v41, 5  ;;  %v2575_v22 = vrot.slane %v2573_v21, 4  ;;  %v6010_v41 = vsel %vm412_vm0, %v5884_v45, 0 }
  0x8b   : > { %4571 = vmatpush3.bf16.xpose.msra.mxu1 %v7235_v9  ;;  %4524 = vmatprep.mubr.msk.bf16.mxu1 %vm412_vm0, %v4919_v19  ;;  %v2267_v0 = vor.u32 %v2266_v48, %v2262_v2  ;;  %v2258_v40 = vrot.slane %v2257_v8, 4  ;;  %v2574_v17 = vsel %vm5156_vm5, %v4326_v33, %v2573_v21  ;;  %v7248_v48 = vld [vmem:[#allocation15_spill] sm:$0xff]  ;;  %v7249_v8 = vld [vmem:[#allocation17_spill] sm:$0xff]  ;;  %v4937_v21 = vld [vmem:[%s7076_s1 + $0xe0] sm:$0xff]  }
  0x8c   : > { %4543 = vmatpush3.bf16.xpose.msra.mxu0 %v5889_v5  ;;  %4801 = vmatprep.subr.msk.bf16.mxu1 %vm412_vm0, %v7236_v13  ;;  %v7256_v33 = vld [vmem:[#allocation43_spill] sm:$0xff] }
  0x8d   : > { %4795 = vmatprep.subr.msk.bf16.mxu0 %vm412_vm0, %v5834_v39  ;;  %v2268_v42 = vrot.slane %v2267_v0, 4  ;;  %v2263_v27 = vsel %vm5225_vm6, %v2258_v40, %v2262_v2  ;;  %v7247_v2 = vld [vmem:[#allocation13_spill] sm:$0xff]  ;;  %v4933_v0 = vld [vmem:[%s7076_s1 + $0xd0] sm:$0xff]   ;;  %v4934_v40 = vld [vmem:[%s7076_s1 + $0xa0] sm:$0xff]  }
  0x8f   : > { %4499 = vmatmul.mubr.msk.bf16.gmra.mxu0 %vm412_vm0, %v4922_v1  ;;  %v2273_v50 = vsel %vm5225_vm6, %v2268_v42, %v2272_v57  ;;  %v7242_v1 = vld [vmem:[#allocation27_spill] sm:$0xff]  ;;  %v7251_v42 = vld [vmem:[#allocation26_spill] sm:$0xff]  ;;  %v7252_v57 = vld [vmem:[#allocation32_spill] sm:$0xff] }
  0x90   : > { %4500 = vmatprep.mubr.msk.bf16.mxu0 %vm412_vm0, %v4924_v18  ;;  %v5952_v34 = vcombine.low %v2263_v27, %v2273_v50  ;;  %v4935_v27 = vld [vmem:[%s7076_s1 + $0xd8] sm:$0xff]   ;;  %v4936_v50 = vld [vmem:[%s7076_s1 + $0xa8] sm:$0xff]  }
  0x92   : > { %4525 = vmatmul.mubr.msk.bf16.gmra.mxu1 %vm412_vm0, %v4919_v19  ;;  %v4927_v19 = vld [vmem:[%s7076_s1 + $0x78] sm:$0xff]  }
  0x93   : > { %4573 = vmatpush3.bf16.xpose.msra.mxu1 %v7237_v28  ;;  %4526 = vmatprep.mubr.msk.bf16.mxu1 %vm412_vm0, %v4921_v14 }
  0x94   : > { %4545 = vmatpush3.bf16.xpose.msra.mxu0 %v5912_v61  ;;  %4802 = vmatprep.subr.msk.bf16.mxu1 %vm412_vm0, %v7238_v16 }
  0x95   : > { %4796 = vmatprep.subr.msk.bf16.mxu0 %vm412_vm0, %v5854_v58 }
  0x97   : > { %4501 = vmatmul.mubr.msk.bf16.gmra.mxu0 %vm412_vm0, %v4924_v18  ;;  %v5972_v18 = vsel %vm412_vm0, %v5687_v23, 0  ;;  %v2577_v23 = vsel %vm5156_vm5, %v2575_v22, %v2576_v29  ;;  %v4939_v22 = vld [vmem:[%s7076_s1 + $0xe8] sm:$0xff]   ;;  %v4940_v29 = vld [vmem:[%s7076_s1 + $0xb8] sm:$0xff]  }
  0x98   : > { %4550 = vmatprep.mubr.msk.bf16.mxu0 %vm412_vm0, %v4926_v60  ;;  %v5990_v35 = vcombine.low %v2574_v17, %v2577_v23  ;;  %v6081_v17 = vld [vmem:[%s5139_s9 + $0xcc] sm:$0xf]  ;;  %v6084_v23 = vld [vmem:[%s5139_s9 + $0xd0] sm:$0xf] }
  0x9a   : > { %4527 = vmatmul.mubr.msk.bf16.gmra.mxu1 %vm412_vm0, %v4921_v14  ;;  %v4929_v14 = vld [vmem:[%s7076_s1 + $0xc0] sm:$0xff]  }
  0x9b   : > { %4575 = vmatpush3.bf16.xpose.msra.mxu1 %v7239_v59  ;;  %4528 = vmatprep.mubr.msk.bf16.mxu1 %vm412_vm0, %v4923_v7 }
  0x9c   : > { %4547 = vmatpush3.bf16.xpose.msra.mxu0 %v5924_v25  ;;  %4803 = vmatprep.subr.msk.bf16.mxu1 %vm412_vm0, %v7240_v49 }
  0x9d   : > { %4797 = vmatprep.subr.msk.bf16.mxu0 %vm412_vm0, %v5884_v45  ;;  %v7250_v45 = vld [vmem:[#allocation20_spill] sm:$0xff] }
  0xa2   : > { %4529 = vmatmul.mubr.msk.bf16.gmra.mxu1 %vm412_vm0, %v4923_v7  ;;  %v4932_v7 = vld [vmem:[%s7076_s1 + $0x98] sm:$0xff]  }
  0xa3   : > { %4577 = vmatpush3.bf16.xpose.msra.mxu1 %v7241_v37  ;;  %4530 = vmatprep.mubr.msk.bf16.mxu1 %vm412_vm0, %v4925_v54 }
  0xa4   : > { %4549 = vmatpush3.bf16.xpose.msra.mxu0 %v1696_v51  ;;  %4804 = vmatprep.subr.msk.bf16.mxu1 %vm412_vm0, %v7242_v1  ;;  %v7254_v51 = vld [vmem:[#allocation38_spill] sm:$0xff] }
  0xa5   : > { %4806 = vmatprep.subr.msk.bf16.mxu0 %vm412_vm0, %v5952_v34 }
  0xaa   : > { %4531 = vmatmul.mubr.msk.bf16.gmra.mxu1 %vm412_vm0, %v4925_v54  ;;  %v7253_v54 = vld [vmem:[#allocation34_spill] sm:$0xff] }
  0xab   : > { %4579 = vmatpush3.bf16.xpose.msra.mxu1 %v7243_v62  ;;  %4532 = vmatprep.mubr.msk.bf16.mxu1 %vm412_vm0, %v4927_v19 }
  0xac   : > { %4551 = vmatmul.mubr.msk.bf16.vlgmr.msra.gmra.mxu0 %vm412_vm0, %v4926_v60  ;;  %4805 = vmatprep.subr.msk.bf16.mxu1 %vm412_vm0, %v7244_v12  ;;  %v4931_v60 = vld [vmem:[%s7076_s1 + $0xc8] sm:$0xff]  }
  0xad   : > { %4599 = vmatpush3.bf16.xpose.msra.mxu0 %v5972_v18  ;;  %4552 = vmatprep.mubr.msk.bf16.mxu0 %vm412_vm0, %v4928_v20 }
  0xae   : > { %4807 = vmatprep.subr.msk.bf16.mxu0 %vm412_vm0, %v7245_v38 }
  0xb2   : > { %4533 = vmatmul.mubr.msk.bf16.gmra.mxu1 %vm412_vm0, %v4927_v19  ;;  %v4938_v19 = vld [vmem:[%s7076_s1 + $0xb0] sm:$0xff]  }
  0xb3   : > { %4581 = vmatpush3.bf16.xpose.msra.mxu1 %v7246_v31  ;;  %4582 = vmatprep.mubr.msk.bf16.mxu1 %vm412_vm0, %v4929_v14  ;;  %v3186_v31 = vshrl.u32 %v6084_v23, 16 }
  0xb4   : > { %4553 = vmatmul.mubr.msk.bf16.gmra.mxu0 %vm412_vm0, %v4928_v20  ;;  %4814 = vmatprep.subr.msk.bf16.mxu1 %vm412_vm0, %v5990_v35  ;;  %v7255_v20 = vld [vmem:[#allocation41_spill] sm:$0xff] }
  0xb5   : > { %4601 = vmatpush3.bf16.xpose.msra.mxu0 %v7247_v2  ;;  %4554 = vmatprep.mubr.msk.bf16.mxu0 %vm412_vm0, %v4930_v11 }
  0xb6   : > { %4808 = vmatprep.subr.msk.bf16.mxu0 %vm412_vm0, %v7248_v48 }
  0xba   : > { %4583 = vmatmul.mubr.msk.bf16.vlgmr.msra.gmra.mxu1 %vm412_vm0, %v4929_v14  ;;  %v3173_v14 = vshrl.u32 %v6081_v17, 16 }
  0xbb   : > { %4631 = vmatpush3.bf16.xpose.msra.mxu1 %v6010_v41  ;;  %4584 = vmatprep.mubr.msk.bf16.mxu1 %vm412_vm0, %v4931_v60 }
  0xbc   : > { %4555 = vmatmul.mubr.msk.bf16.gmra.mxu0 %vm412_vm0, %v4930_v11  ;;  %4815 = vmatprep.subr.msk.bf16.mxu1 %vm412_vm0, %v5637_v44  ;;  %v3176_v11 = vshll.u32 %v6081_v17, 16 }
  0xbd   : > { %4603 = vmatpush3.bf16.xpose.msra.mxu0 %v7249_v8  ;;  %4556 = vmatprep.mubr.msk.bf16.mxu0 %vm412_vm0, %v4932_v7 }
  0xbe   : > { %4809 = vmatprep.subr.msk.bf16.mxu0 %vm412_vm0, %v7250_v45 }
  0xc2   : > { %4585 = vmatmul.mubr.msk.bf16.gmra.mxu1 %vm412_vm0, %v4931_v60  ;;  %v3182_v60 = vshll.u32 %v6084_v23, 16 }
  0xc3   : > { %4633 = vmatpush3.bf16.xpose.msra.mxu1 %v5691_v15  ;;  %4586 = vmatprep.mubr.msk.bf16.mxu1 %vm412_vm0, %v4933_v0 }
  0xc4   : > { %4557 = vmatmul.mubr.msk.bf16.gmra.mxu0 %vm412_vm0, %v4932_v7  ;;  %4816 = vmatprep.subr.msk.bf16.mxu1 %vm412_vm0, %v5709_v6  ;;  %v4941_v7 = vld [vmem:[%s7076_s1 + $0xf0] sm:$0xff]  }
  0xc5   : > { %4605 = vmatpush3.bf16.xpose.msra.mxu0 %v7251_v42  ;;  %4558 = vmatprep.mubr.msk.bf16.mxu0 %vm412_vm0, %v4934_v40 }
  0xc6   : > { %4810 = vmatprep.subr.msk.bf16.mxu0 %vm412_vm0, %v7252_v57 }
  0xca   : > { %4587 = vmatmul.mubr.msk.bf16.gmra.mxu1 %vm412_vm0, %v4933_v0  ;;  %v4942_v0 = vld [vmem:[%s7076_s1 + $0x100] sm:$0xff]  }
  0xcb   : > { %4635 = vmatpush3.bf16.xpose.msra.mxu1 %v5744_v56  ;;  %4588 = vmatprep.mubr.msk.bf16.mxu1 %vm412_vm0, %v4935_v27 }
  0xcc   : > { %4559 = vmatmul.mubr.msk.bf16.gmra.mxu0 %vm412_vm0, %v4934_v40  ;;  %4817 = vmatprep.subr.msk.bf16.mxu1 %vm412_vm0, %v5753_v55  ;;  %v3175_v40 = vrot.slane %v3173_v14, 4 }
  0xcd   : > { %4607 = vmatpush3.bf16.xpose.msra.mxu0 %v7253_v54  ;;  %4560 = vmatprep.mubr.msk.bf16.mxu0 %vm412_vm0, %v4936_v50 }
  0xce   : > { %4811 = vmatprep.subr.msk.bf16.mxu0 %vm412_vm0, %v7254_v51 }
  0xd2   : > { %4589 = vmatmul.mubr.msk.bf16.gmra.mxu1 %vm412_vm0, %v4935_v27  ;;  %v3178_v27 = vrot.slane %v3176_v11, 5 }
  0xd3   : > { %4637 = vmatpush3.bf16.xpose.msra.mxu1 %v5783_v36  ;;  %4590 = vmatprep.mubr.msk.bf16.mxu1 %vm412_vm0, %v4937_v21 }
  0xd4   : > { %4561 = vmatmul.mubr.msk.bf16.gmra.mxu0 %vm412_vm0, %v4936_v50  ;;  %4818 = vmatprep.subr.msk.bf16.mxu1 %vm412_vm0, %v5777_v63  ;;  %v3184_v50 = vrot.slane %v3182_v60, 5  ;;  %v3179_v14 = vor.u32 %v3178_v27, %v3175_v40  ;;  %v4947_v27 = vld [vmem:[%s7076_s1 + $0x110] sm:$0xff]  }
  0xd5   : > { %4609 = vmatpush3.bf16.xpose.msra.mxu0 %v7255_v20  ;;  %4562 = vmatprep.mubr.msk.bf16.mxu0 %vm412_vm0, %v4938_v19 }
  0xd6   : > { %4812 = vmatprep.subr.msk.bf16.mxu0 %vm412_vm0, %v7256_v33  ;;  %v3180_v60 = vrot.slane %v3179_v14, 4 }
  0xd8   : > { %v3185_v40 = vsel %vm5225_vm6, %v3180_v60, %v3184_v50 }
  0xda   : > { %4591 = vmatmul.mubr.msk.bf16.gmra.mxu1 %vm412_vm0, %v4937_v21  ;;  %v3188_v21 = vrot.slane %v3186_v31, 4  ;;  %v4943_v31 = vld [vmem:[%s7076_s1 + $0xf8] sm:$0xff]  }
  0xdb   : > { %4639 = vmatpush3.bf16.xpose.msra.mxu1 %v5840_v52  ;;  %4592 = vmatprep.mubr.msk.bf16.mxu1 %vm412_vm0, %v4939_v22 }
  0xdc   : > { %4563 = vmatmul.mubr.msk.bf16.gmra.mxu0 %vm412_vm0, %v4938_v19  ;;  %4819 = vmatprep.subr.msk.bf16.mxu1 %vm412_vm0, %v5806_v46  ;;  %v4384_v19 = vcombine.low %v6081_v17, %v6084_v23  ;;  %v6109_v46 = vld [vmem:[%s5139_s9 + $0xd4] sm:$0x1]  ;;  %s189_s9 = sand.u32 1, %s5037_s16  }
  0xdd   : > { %4611 = vmatpush3.bf16.xpose.msra.mxu0 %v5618_v30  ;;  %4564 = vmatprep.mubr.msk.bf16.mxu0 %vm412_vm0, %v4940_v29  ;;  %v3192_v11 = vshll.u32 %v6109_v46, 16  ;;  %s6868_s12 = sshll.u32 %s189_s9, 3  ;;  %s3967_s29 = scalar_lea.sflag [#allocation4], %s189_s9 }
  0xde   : > { %4813 = vmatprep.subr.msk.bf16.mxu0 %vm412_vm0, %v5644_v32  ;;  %s191_s13 = scalar_lea.vmem [#allocation3], %s6868_s12 }
  0xdf   : > { %s3991_s28 = sshll.u32 %s191_s13, 4  ;;  %s3992_s28 = int_to_ptr.vmem [resolvable:$true] %s3991_s28 }
  0xe0   : > { %s4985_s30 = scalar_lea.vmem %s3992_s28, 128  ;;  %p4992_p0 = scmp.lt.s32.totalorder %s3992_s28, %s4990_s6 }
  0xe1   : > { %p4986_p11 = scmp.ne.s32.totalorder %s3992_s28, %s4985_s30  ;;  %p4993_p1 = scmp.lt.s32.totalorder %s4991_s7, %s4985_s30 }
  0xe2   : > { %4593 = vmatmul.mubr.msk.bf16.gmra.mxu1 %vm412_vm0, %v4939_v22  ;;  %v3189_v22 = vor.u32 %v3188_v21, %v3184_v50  ;;  %v4965_v50 = vld [vmem:[%s7076_s1 + $0x198] sm:$0xff]  }
  0xe3   : > { %4641 = vmatpush3.bf16.xpose.msra.mxu1 %v5889_v5  ;;  %4594 = vmatprep.mubr.msk.bf16.mxu1 %vm412_vm0, %v4941_v7  ;;  %v3194_v5 = vrot.slane %v3192_v11, 5  ;;  %p4987_p12 = pnand %p4986_p11, %p5111_p5  ;;  %p4994_p2 = por %p4993_p1, %p4992_p0 }
  0xe4   : > { %4565 = vmatmul.mubr.msk.bf16.gmra.mxu0 %vm412_vm0, %v4940_v29  ;;  %4820 = vmatprep.subr.msk.bf16.mxu1 %vm412_vm0, %v5834_v39  ;;  %v4945_v29 = vld [vmem:[%s7076_s1 + $0x108] sm:$0xff]   ;;  %v3190_v39 = vrot.slane %v3189_v22, 4 }
  0xe5   : > { %4613 = vmatpush3.bf16.xpose.msra.mxu0 %v5666_v53  ;;  %4614 = vmatprep.mubr.msk.bf16.mxu0 %vm412_vm0, %v4942_v0  ;;  %v465_v53 = vsel %vm412_vm0, %v7244_v12, 0  ;;  %v4946_v12 = vld [vmem:[%s7076_s1 + $0x140] sm:$0xff]   ;;  %p4988_p13 = pneg %p4987_p12 }
  0xe6   : > { %4822 = vmatprep.subr.msk.bf16.mxu0 %vm412_vm0, %v4384_v19 }
  0xe7   : > { %p4995_p3 = pnand %p4994_p2, %p4988_p13 }
  0xea   : > { %4595 = vmatmul.mubr.msk.bf16.gmra.mxu1 %vm412_vm0, %v4941_v7  ;;  %v3195_v7 = vsel %vm5225_vm6, %v3190_v39, %v3194_v5  ;;  %v4949_v39 = vld [vmem:[%s7076_s1 + $0x118] sm:$0xff]   ;;  %v4955_v5 = vld [vmem:[%s7076_s1 + $0x130] sm:$0xff]  }
  0xeb   : > { %4643 = vmatpush3.bf16.xpose.msra.mxu1 %v5912_v61  ;;  %4596 = vmatprep.mubr.msk.bf16.mxu1 %vm412_vm0, %v4943_v31 }
  0xec   : > { %4615 = vmatmul.mubr.msk.bf16.vlgmr.msra.gmra.mxu0 %vm412_vm0, %v4942_v0  ;;  %4821 = vmatprep.subr.msk.bf16.mxu1 %vm412_vm0, %v5854_v58  ;;  %v4417_v0 = vcombine.low %v3185_v40, %v3195_v7  ;;  %v4966_v40 = vld [vmem:[%s7076_s1 + $0x1d0] sm:$0xff]  }
  0xed   : > { %4663 = vmatpush3.bf16.xpose.msra.mxu0 %v465_v53  ;;  %4616 = vmatprep.mubr.msk.bf16.mxu0 %vm412_vm0, %v4945_v29 }
  0xee   : > { %4823 = vmatprep.subr.msk.bf16.mxu0 %vm412_vm0, %v5715_v24  ;;  %v1206_v24 = vsel %vm412_vm0, %v5644_v32, 0  ;;  %v4950_v32 = vld [vmem:[%s7076_s1 + $0x150] sm:$0xff]  }
  0xf2   : > { %4597 = vmatmul.mubr.msk.bf16.gmra.mxu1 %vm412_vm0, %v4943_v31 }
  0xf3   : > { %4645 = vmatpush3.bf16.xpose.msra.mxu1 %v5924_v25  ;;  %4646 = vmatprep.mubr.msk.bf16.mxu1 %vm412_vm0, %v4946_v12 }
  0xf4   : > { %4617 = vmatmul.mubr.msk.bf16.gmra.mxu0 %vm412_vm0, %v4945_v29  ;;  %4830 = vmatprep.subr.msk.bf16.mxu1 %vm412_vm0, %v4417_v0  ;;  %v4967_v0 = vld [vmem:[%s7076_s1 + $0x1a0] sm:$0xff]  }
  0xf5   : > { %4665 = vmatpush3.bf16.xpose.msra.mxu0 %v5724_v3  ;;  %4618 = vmatprep.mubr.msk.bf16.mxu0 %vm412_vm0, %v4947_v27  ;;  %v4951_v3 = vld [vmem:[%s7076_s1 + $0x120] sm:$0xff]  }
  0xf6   : > { %4824 = vmatprep.subr.msk.bf16.mxu0 %vm412_vm0, %v7223_v4  ;;  %v4952_v4 = vld [vmem:[%s7076_s1 + $0x158] sm:$0xff]  }
  0xfa   : > { %4647 = vmatmul.mubr.msk.bf16.vlgmr.msra.gmra.mxu1 %vm412_vm0, %v4946_v12 }
  0xfb   : > { %4695 = vmatpush3.bf16.xpose.msra.mxu1 %v1206_v24  ;;  %4648 = vmatprep.mubr.msk.bf16.mxu1 %vm412_vm0, %v4948_v47 }
  0xfc   : > { %4619 = vmatmul.mubr.msk.bf16.gmra.mxu0 %vm412_vm0, %v4947_v27  ;;  %4831 = vmatprep.subr.msk.bf16.mxu1 %vm412_vm0, %v5952_v34 }
  0xfd   : > { %4667 = vmatpush3.bf16.xpose.msra.mxu0 %v7232_v43  ;;  %4620 = vmatprep.mubr.msk.bf16.mxu0 %vm412_vm0, %v4949_v39  ;;  %v4953_v43 = vld [vmem:[%s7076_s1 + $0x128] sm:$0xff]  }
  0xfe   : > { %4825 = vmatprep.subr.msk.bf16.mxu0 %vm412_vm0, %v7233_v26  ;;  %v4954_v26 = vld [vmem:[%s7076_s1 + $0x160] sm:$0xff]  }
 0x102   : > { %4649 = vmatmul.mubr.msk.bf16.gmra.mxu1 %vm412_vm0, %v4948_v47 }
 0x103   : > { %4697 = vmatpush3.bf16.xpose.msra.mxu1 %v5972_v18  ;;  %4650 = vmatprep.mubr.msk.bf16.mxu1 %vm412_vm0, %v4950_v32  ;;  %v4959_v18 = vld [vmem:[%s7076_s1 + $0x180] sm:$0xff]  }
 0x104   : > { %4621 = vmatmul.mubr.msk.bf16.gmra.mxu0 %vm412_vm0, %v4949_v39  ;;  %4832 = vmatprep.subr.msk.bf16.mxu1 %vm412_vm0, %v7245_v38 }
 0x105   : > { %4669 = vmatpush3.bf16.xpose.msra.mxu0 %v7235_v9  ;;  %4622 = vmatprep.mubr.msk.bf16.mxu0 %vm412_vm0, %v4951_v3  ;;  %v4956_v9 = vld [vmem:[%s7076_s1 + $0x168] sm:$0xff]  }
 0x106   : > { %4826 = vmatprep.subr.msk.bf16.mxu0 %vm412_vm0, %v7236_v13  ;;  %v3495_v13 = vrot.slane %v6084_v23, 5 }
 0x108   : > { %v3497_v25 = vrot.slane %v3495_v13, 4 }
 0x10a   : > { %4651 = vmatmul.mubr.msk.bf16.gmra.mxu1 %vm412_vm0, %v4950_v32 }
 0x10b   : > { %4699 = vmatpush3.bf16.xpose.msra.mxu1 %v7247_v2  ;;  %4652 = vmatprep.mubr.msk.bf16.mxu1 %vm412_vm0, %v4952_v4  ;;  %v4960_v2 = vld [vmem:[%s7076_s1 + $0x178] sm:$0xff]  }
 0x10c   : > { %4623 = vmatmul.mubr.msk.bf16.gmra.mxu0 %vm412_vm0, %v4951_v3  ;;  %4833 = vmatprep.subr.msk.bf16.mxu1 %vm412_vm0, %v7248_v48 }
 0x10d   : > { %4671 = vmatpush3.bf16.xpose.msra.mxu0 %v7237_v28  ;;  %4624 = vmatprep.mubr.msk.bf16.mxu0 %vm412_vm0, %v4953_v43  ;;  %v4957_v28 = vld [vmem:[%s7076_s1 + $0x138] sm:$0xff]  }
 0x10e   : > { %4827 = vmatprep.subr.msk.bf16.mxu0 %vm412_vm0, %v7238_v16  ;;  %v4426_v16 = vrot.slane %v6081_v17, 9 }
 0x110   : > { %v3496_v34 = vsel %vm5156_vm5, %v4426_v16, %v3495_v13  ;;  %v4969_v13 = vld [vmem:[%s7076_s1 + $0x1a8] sm:$0xff]  }
 0x112   : > { %4653 = vmatmul.mubr.msk.bf16.gmra.mxu1 %vm412_vm0, %v4952_v4 }
 0x113   : > { %4701 = vmatpush3.bf16.xpose.msra.mxu1 %v7249_v8  ;;  %4654 = vmatprep.mubr.msk.bf16.mxu1 %vm412_vm0, %v4954_v26  ;;  %v4961_v8 = vld [vmem:[%s7076_s1 + $0x188] sm:$0xff]  }
 0x114   : > { %4625 = vmatmul.mubr.msk.bf16.gmra.mxu0 %vm412_vm0, %v4953_v43  ;;  %4834 = vmatprep.subr.msk.bf16.mxu1 %vm412_vm0, %v7250_v45 }
 0x115   : > { %4673 = vmatpush3.bf16.xpose.msra.mxu0 %v7239_v59  ;;  %4626 = vmatprep.mubr.msk.bf16.mxu0 %vm412_vm0, %v4955_v5  ;;  %v3498_v59 = vrot.slane %v6109_v46, 5 }
 0x116   : > { %4828 = vmatprep.subr.msk.bf16.mxu0 %vm412_vm0, %v7240_v49  ;;  %v4958_v49 = vld [vmem:[%s7076_s1 + $0x170] sm:$0xff]  }
 0x117   : > { %v3499_v46 = vsel %vm5156_vm5, %v3497_v25, %v3498_v59 }
 0x118   : > { %v4451_v38 = vcombine.low %v3496_v34, %v3499_v46 }
 0x11a   : > { %4655 = vmatmul.mubr.msk.bf16.gmra.mxu1 %vm412_vm0, %v4954_v26  ;;  %v4968_v26 = vld [vmem:[%s7076_s1 + $0x1d8] sm:$0xff]  }
 0x11b   : > { %4703 = vmatpush3.bf16.xpose.msra.mxu1 %v7251_v42  ;;  %4656 = vmatprep.mubr.msk.bf16.mxu1 %vm412_vm0, %v4956_v9 }
 0x11c   : > { %4627 = vmatmul.mubr.msk.bf16.gmra.mxu0 %vm412_vm0, %v4955_v5  ;;  %4835 = vmatprep.subr.msk.bf16.mxu1 %vm412_vm0, %v7252_v57 }
 0x11d   : > { %4675 = vmatpush3.bf16.xpose.msra.mxu0 %v7241_v37  ;;  %4628 = vmatprep.mubr.msk.bf16.mxu0 %vm412_vm0, %v4957_v28 }
 0x11e   : > { %4829 = vmatprep.subr.msk.bf16.mxu0 %vm412_vm0, %v7242_v1 }
 0x11f   : > { %v519_v37 = vpop.f32.mrf.mxu0 }
 0x121   : > { %v521_v1 = vpop.f32.mrf.mxu0 }
 0x122   : > { %4657 = vmatmul.mubr.msk.bf16.gmra.mxu1 %vm412_vm0, %v4956_v9 }
 0x123   : > { %4705 = vmatpush3.bf16.xpose.msra.mxu1 %v7253_v54  ;;  %4658 = vmatprep.mubr.msk.bf16.mxu1 %vm412_vm0, %v4958_v49  ;;  %v523_v10 = vpop.f32.mrf.mxu0 }
 0x124   : > { %4629 = vmatmul.mubr.msk.bf16.gmra.mxu0 %vm412_vm0, %v4957_v28  ;;  %4836 = vmatprep.subr.msk.bf16.mxu1 %vm412_vm0, %v7254_v51  ;;  %v4963_v51 = vld [vmem:[%s7076_s1 + $0x190] sm:$0xff]  }
 0x125   : > { %4677 = vmatpush3.bf16.xpose.msra.mxu0 %v7243_v62  ;;  %4678 = vmatprep.mubr.msk.bf16.mxu0 %vm412_vm0, %v4959_v18  ;;  %v525_v48 = vpop.f32.mrf.mxu0  ;;  %v1723_v62 = vsel %vm412_vm0, %v5854_v58, 0  ;;  %v4962_v58 = vld [vmem:[%s7076_s1 + $0x1c0] sm:$0xff]  }
 0x126   : > { %4838 = vmatprep.subr.msk.bf16.mxu0 %vm412_vm0, %v4451_v38 }
 0x127   : > { %v529_v45 = vpop.f32.mrf.mxu0 }
 0x129   : > { %v531_v42 = vpop.f32.mrf.mxu0 }
 0x12a   : > { %4659 = vmatmul.mubr.msk.bf16.gmra.mxu1 %vm412_vm0, %v4958_v49 }
 0x12b   : > { %4707 = vmatpush3.bf16.xpose.msra.mxu1 %v7255_v20  ;;  %4660 = vmatprep.mubr.msk.bf16.mxu1 %vm412_vm0, %v4960_v2  ;;  %v533_v57 = vpop.f32.mrf.mxu0 }
 0x12c   : > { %4679 = vmatmul.mubr.msk.bf16.vlgmr.msra.gmra.mxu0 %vm412_vm0, %v4959_v18  ;;  %4837 = vmatprep.subr.msk.bf16.mxu1 %vm412_vm0, %v7256_v33 }
 0x12d   : > { %4727 = vmatpush3.bf16.xpose.msra.mxu0 %v1723_v62  ;;  %4680 = vmatprep.mubr.msk.bf16.mxu0 %vm412_vm0, %v4961_v8  ;;  %v535_v54 = vpop.f32.mrf.mxu0 }
 0x12e   : > { %4840 = vmatprep.subr.msk.bf16.mxu0 %vm412_vm0, %v5990_v35 }
 0x12f   : > { %v539_v20 = vpop.f32.mrf.mxu0 }
 0x131   : > { %v6285_v33 = vpop.f32.mrf.mxu0 }
 0x132   : > { %4661 = vmatmul.mubr.msk.bf16.gmra.mxu1 %vm412_vm0, %v4960_v2 }
 0x133   : > { %4709 = vmatpush3.bf16.xpose.msra.mxu1 %v5618_v30  ;;  %4710 = vmatprep.mubr.msk.bf16.mxu1 %vm412_vm0, %v4962_v58  ;;  %v6291_v17 = vpop.f32.mrf.mxu0  ;;  %v4964_v30 = vld [vmem:[%s7076_s1 + $0x1c8] sm:$0xff]  }
 0x134   : > { %4681 = vmatmul.mubr.msk.bf16.gmra.mxu0 %vm412_vm0, %v4961_v8  ;;  %4839 = vmatprep.subr.msk.bf16.mxu1 %vm412_vm0, %v4451_v38 }
 0x135   : > { %4729 = vmatpush3.bf16.xpose.msra.mxu0 %v6010_v41  ;;  %4682 = vmatprep.mubr.msk.bf16.mxu0 %vm412_vm0, %v4963_v51  ;;  %v6298_v23 = vpop.f32.mrf.mxu0 }
 0x136   : > { %4842 = vmatprep.subr.msk.bf16.mxu0 %vm412_vm0, %v5637_v44 }
 0x137   : > { %v6303_v21 = vpop.f32.mrf.mxu0 }
 0x139   : > { %v6309_v22 = vpop.f32.mrf.mxu0 }
 0x13a   : > { %v1260_v19 = vpop.f32.mrf.mxu1  ;;  %4711 = vmatmul.mubr.msk.bf16.vlgmr.msra.gmra.mxu1 %vm412_vm0, %v4962_v58 }
 0x13b   : > { %v6306_v14 = vadd.f32 %v1260_v19, %v519_v37  ;;  %4766 = vmatpush3.bf16.xpose.msra.mxu1 %v1723_v62  ;;  %4712 = vmatprep.mubr.msk.bf16.mxu1 %vm412_vm0, %v4964_v30  ;;  %v6318_v29 = vpop.f32.mrf.mxu0 }
 0x13c   : > { %v1262_v11 = vpop.f32.mrf.mxu1  ;;  %4683 = vmatmul.mubr.msk.bf16.gmra.mxu0 %vm412_vm0, %v4963_v51  ;;  %4841 = vmatprep.subr.msk.bf16.mxu1 %vm412_vm0, %v5990_v35  ;;  %v4972_v51 = vld [vmem:[%s7076_s1 + $0x1e8] sm:$0xff]  }
 0x13d   : > { %v6314_v31 = vadd.f32 %v1262_v11, %v521_v1  ;;  %4731 = vmatpush3.bf16.xpose.msra.mxu0 %v5691_v15  ;;  %4684 = vmatprep.mubr.msk.bf16.mxu0 %vm412_vm0, %v4965_v50  ;;  %v6327_v7 = vpop.f32.mrf.mxu0 }
 0x13e   : > { %v1264_v60 = vpop.f32.mrf.mxu1  ;;  %4844 = vmatprep.subr.msk.bf16.mxu0 %vm412_vm0, %v5709_v6 }
 0x13f   : > { %v6322_v53 = vadd.f32 %v1264_v60, %v523_v10  ;;  %v6334_v27 = vpop.f32.mrf.mxu0  ;;  %v4971_v10 = vld [vmem:[%s7076_s1 + $0x1b0] sm:$0xff]  }
 0x140   : > { %v1266_v35 = vpop.f32.mrf.mxu1  ;;  %v4974_v60 = vld [vmem:[%s7076_s1 + $0x1f0] sm:$0xff]  }
 0x141   : > { %v6329_v12 = vadd.f32 %v1266_v35, %v525_v48  ;;  %v6341_v39 = vpop.f32.mrf.mxu0  ;;  %v4975_v35 = vld [vmem:[%s7076_s1 + $0x200] sm:$0xff]  }
 0x142   : > { %v1270_v47 = vpop.f32.mrf.mxu1  ;;  %4713 = vmatmul.mubr.msk.bf16.gmra.mxu1 %vm412_vm0, %v4964_v30 }
 0x143   : > { %v6337_v24 = vadd.f32 %v1270_v47, %v529_v45  ;;  %4767 = vmatpush3.bf16.xpose.msra.mxu1 %v6010_v41  ;;  %4714 = vmatprep.mubr.msk.bf16.mxu1 %vm412_vm0, %v4966_v40  ;;  %v6350_v4 = vpop.f32.mrf.mxu0 }
 0x144   : > { %v1272_v32 = vpop.f32.mrf.mxu1  ;;  %4685 = vmatmul.mubr.msk.bf16.gmra.mxu0 %vm412_vm0, %v4965_v50  ;;  %4843 = vmatprep.subr.msk.bf16.mxu1 %vm412_vm0, %v5637_v44 }
 0x145   : > { %v6346_v3 = vadd.f32 %v1272_v32, %v531_v42  ;;  %4733 = vmatpush3.bf16.xpose.msra.mxu0 %v5744_v56  ;;  %4686 = vmatprep.mubr.msk.bf16.mxu0 %vm412_vm0, %v4967_v0  ;;  %v6359_v5 = vpop.f32.mrf.mxu0 }
 0x146   : > { %v1274_v43 = vpop.f32.mrf.mxu1  ;;  %4846 = vmatprep.subr.msk.bf16.mxu0 %vm412_vm0, %v5753_v55 }
 0x147   : > { %v6354_v41 = vadd.f32 %v1274_v43, %v533_v57  ;;  %v6366_v28 = vpop.f32.mrf.mxu0 }
 0x148   : > { %v1276_v44 = vpop.f32.mrf.mxu1 }
 0x149   : > { %v6361_v9 = vadd.f32 %v1276_v44, %v535_v54  ;;  %v6373_v59 = vpop.f32.mrf.mxu0 }
 0x14a   : > { %v1280_v16 = vpop.f32.mrf.mxu1  ;;  %4715 = vmatmul.mubr.msk.bf16.gmra.mxu1 %vm412_vm0, %v4966_v40 }
 0x14b   : > { %v6369_v25 = vadd.f32 %v1280_v16, %v539_v20  ;;  %4768 = vmatpush3.bf16.xpose.msra.mxu1 %v5691_v15  ;;  %4716 = vmatprep.mubr.msk.bf16.mxu1 %vm412_vm0, %v4968_v26  ;;  %v6383_v46 = vpop.f32.mrf.mxu0 }
 0x14c   : > { %v1282_v49 = vpop.f32.mrf.mxu1  ;;  %4687 = vmatmul.mubr.msk.bf16.gmra.mxu0 %vm412_vm0, %v4967_v0  ;;  %4845 = vmatprep.subr.msk.bf16.mxu1 %vm412_vm0, %v5709_v6  ;;  %v4970_v6 = vld [vmem:[%s7076_s1 + $0x1e0] sm:$0xff]  }
 0x14d   : > { %v6379_v34 = vadd.f32 %v1282_v49, %v6285_v33  ;;  %4735 = vmatpush3.bf16.xpose.msra.mxu0 %v5783_v36  ;;  %4688 = vmatprep.mubr.msk.bf16.mxu0 %vm412_vm0, %v4969_v13  ;;  %v6393_v37 = vpop.f32.mrf.mxu0 }
 0x14e   : > { %v1284_v15 = vpop.f32.mrf.mxu1  ;;  %4848 = vmatprep.subr.msk.bf16.mxu0 %vm412_vm0, %v5777_v63 }
 0x14f   : > { %v6388_v18 = vadd.f32 %v1284_v15, %v6291_v17  ;;  %v6401_v2 = vpop.f32.mrf.mxu0  ;;  %v4973_v17 = vld [vmem:[%s7076_s1 + $0x1b8] sm:$0xff]  }
 0x150   : > { %v1286_v38 = vpop.f32.mrf.mxu1 }
 0x151   : > { %v6396_v1 = vadd.f32 %v1286_v38, %v6298_v23  ;;  %v6409_v45 = vpop.f32.mrf.mxu0 }
 0x152   : > { %v1290_v48 = vpop.f32.mrf.mxu1  ;;  %4717 = vmatmul.mubr.msk.bf16.gmra.mxu1 %vm412_vm0, %v4968_v26 }
 0x153   : > { %v6405_v8 = vadd.f32 %v1290_v48, %v6303_v21  ;;  %4769 = vmatpush3.bf16.xpose.msra.mxu1 %v5744_v56  ;;  %4718 = vmatprep.mubr.msk.bf16.mxu1 %vm412_vm0, %v4970_v6  ;;  %v583_v57 = vpop.f32.mrf.mxu0  ;;  %v7257_v56 = vld [vmem:[#allocation19_spill] sm:$0xff] }
 0x154   : > { %v1292_v62 = vpop.f32.mrf.mxu1  ;;  %4689 = vmatmul.mubr.msk.bf16.gmra.mxu0 %vm412_vm0, %v4969_v13  ;;  %4847 = vmatprep.subr.msk.bf16.mxu1 %vm412_vm0, %v5753_v55  ;;  %v4977_v13 = vld [vmem:[%s7076_s1 + $0x208] sm:$0xff]  }
 0x155   : > { %v6415_v42 = vadd.f32 %v1292_v62, %v6309_v22  ;;  %4737 = vmatpush3.bf16.xpose.msra.mxu0 %v5840_v52  ;;  %4690 = vmatprep.mubr.msk.bf16.mxu0 %vm412_vm0, %v4971_v10  ;;  %v585_v20 = vpop.f32.mrf.mxu0  ;;  %v7258_v22 = vld [vmem:[#allocation22_spill] sm:$0xff] }
 0x156   : > { %v1294_v58 = vpop.f32.mrf.mxu1  ;;  %4850 = vmatprep.subr.msk.bf16.mxu0 %vm412_vm0, %v7257_v56 }
 0x157   : > { %v6422_v54 = vadd.f32 %v1294_v58, %v6318_v29  ;;  %v589_v21 = vpop.f32.mrf.mxu0  ;;  %v7259_v29 = vld [vmem:[#allocation28_spill] sm:$0xff] }
 0x158   : > { %v1296_v55 = vpop.f32.mrf.mxu1 }
 0x159   : > { %v6428_v33 = vadd.f32 %v1296_v55, %v6327_v7  ;;  %v591_v40 = vpop.f32.mrf.mxu0 }
 0x15a   : > { %v1300_v30 = vpop.f32.mrf.mxu1  ;;  %4719 = vmatmul.mubr.msk.bf16.gmra.mxu1 %vm412_vm0, %v4970_v6 }
 0x15b   : > { %v6435_v23 = vadd.f32 %v1300_v30, %v6334_v27  ;;  %4770 = vmatpush3.bf16.xpose.msra.mxu1 %v5783_v36  ;;  %4720 = vmatprep.mubr.msk.bf16.mxu1 %vm412_vm0, %v4972_v51 }
 0x15c   : > { %v1302_v50 = vpop.f32.mrf.mxu1  ;;  %4691 = vmatmul.mubr.msk.bf16.gmra.mxu0 %vm412_vm0, %v4971_v10  ;;  %4849 = vmatprep.subr.msk.bf16.mxu1 %vm412_vm0, %v5777_v63 }
 0x15d   : > { %v6443_v19 = vadd.f32 %v1302_v50, %v6341_v39  ;;  %4739 = vmatpush3.bf16.xpose.msra.mxu0 %v7258_v22  ;;  %4692 = vmatprep.mubr.msk.bf16.mxu0 %vm412_vm0, %v4973_v17  ;;  %v593_v39 = vpop.f32.mrf.mxu0 }
 0x15e   : > { %v1304_v11 = vpop.f32.mrf.mxu1  ;;  %4852 = vmatprep.subr.msk.bf16.mxu0 %vm412_vm0, %v7259_v29 }
 0x15f   : > { %v6450_v36 = vadd.f32 %v1304_v11, %v6350_v4 }
 0x160   : > { %v1306_v63 = vpop.f32.mrf.mxu1 }
 0x161   : > { %v6456_v7 = vadd.f32 %v1306_v63, %v6359_v5  ;;  %v595_v5 = vpop.f32.mrf.mxu0 }
 0x162   : > { %v1310_v0 = vpop.f32.mrf.mxu1  ;;  %4721 = vmatmul.mubr.msk.bf16.gmra.mxu1 %vm412_vm0, %v4972_v51 }
 0x163   : > { %v6463_v27 = vadd.f32 %v1310_v0, %v6366_v28  ;;  %4771 = vmatpush3.bf16.xpose.msra.mxu1 %v5840_v52  ;;  %4722 = vmatprep.mubr.msk.bf16.mxu1 %vm412_vm0, %v4974_v60  ;;  %v4976_v52 = vld [vmem:[%s7076_s1 + $0x1f8] sm:$0xff]  }
 0x164   : > { %v1312_v47 = vpop.f32.mrf.mxu1  ;;  %4693 = vmatmul.mubr.msk.bf16.gmra.mxu0 %vm412_vm0, %v4973_v17  ;;  %4851 = vmatprep.subr.msk.bf16.mxu1 %vm412_vm0, %v7257_v56 }
 0x165   : > { %v6471_v32 = vadd.f32 %v1312_v47, %v6373_v59  ;;  %4741 = vmatpush3.bf16.xpose.msra.mxu0 %v5912_v61  ;;  %4742 = vmatprep.mubr.msk.bf16.mxu0 %vm412_vm0, %v4975_v35 }
 0x166   : > { %v1314_v4 = vpop.f32.mrf.mxu1 }
 0x167   : > { %v6476_v43 = vadd.f32 %v1314_v4, %v6383_v46 }
 0x168   : > { %v1316_v26 = vpop.f32.mrf.mxu1 }
 0x169   : > { %v6482_v44 = vadd.f32 %v1316_v26, %v6393_v37 }
 0x16a   : > { %v1320_v28 = vpop.f32.mrf.mxu1  ;;  %4723 = vmatmul.mubr.msk.bf16.gmra.mxu1 %vm412_vm0, %v4974_v60 }
 0x16b   : > { %v6489_v16 = vadd.f32 %v1320_v28, %v6401_v2  ;;  %4772 = vmatpush3.bf16.xpose.msra.mxu1 %v7258_v22  ;;  %4724 = vmatprep.mubr.msk.bf16.mxu1 %vm412_vm0, %v4976_v52  ;;  %v4978_v2 = vld [vmem:[%s7076_s1 + $0x220] sm:$0xff]  }
 0x16c   : > { %v1322_v59 = vpop.f32.mrf.mxu1  ;;  %v1777_v49 = vpop.f32.mrf.mxu0  ;;  %4743 = vmatmul.mubr.msk.bf16.vlgmr.msra.gmra.mxu0 %vm412_vm0, %v4975_v35  ;;  %4853 = vmatprep.subr.msk.bf16.mxu1 %vm412_vm0, %v7259_v29 }
 0x16d   : > { %v6497_v46 = vadd.f32 %v1322_v59, %v6409_v45  ;;  %v1856_v15 = vadd.f32 %v1777_v49, %v6306_v14  ;;  %4744 = vmatprep.mubr.msk.bf16.mxu0 %vm412_vm0, %v4977_v13  ;;  %v4979_v14 = vld [vmem:[%s7076_s1 + $0x210] sm:$0xff]  }
 0x16e   : > { %v1324_v6 = vpop.f32.mrf.mxu1  ;;  %v1779_v37 = vpop.f32.mrf.mxu0 }
 0x16f   : > { %v6501_v38 = vadd.f32 %v1324_v6, %v583_v57  ;;  %v1857_v10 = vadd.f32 %v1779_v37, %v6314_v31 }
 0x170   : > { %v1326_v48 = vpop.f32.mrf.mxu1  ;;  %v1781_v62 = vpop.f32.mrf.mxu0 }
 0x171   : > { %v6507_v58 = vadd.f32 %v1326_v48, %v585_v20  ;;  %v1858_v45 = vadd.f32 %v1781_v62, %v6322_v53 }
 0x172   : > { %v1330_v56 = vpop.f32.mrf.mxu1  ;;  %4725 = vmatmul.mubr.msk.bf16.gmra.mxu1 %vm412_vm0, %v4976_v52  ;;  %v1783_v57 = vpop.f32.mrf.mxu0 }
 0x173   : > { %v6514_v51 = vadd.f32 %v1330_v56, %v589_v21  ;;  %4773 = vmatpush3.bf16.xpose.msra.mxu1 %v5912_v61  ;;  %v1859_v31 = vadd.f32 %v1783_v57, %v6329_v12  ;;  %4750 = vmatprep.mubr.msk.bf16.mxu1 %vm412_vm0, %v4978_v2  ;;  %v4980_v12 = vld [vmem:[%s7076_s1 + $0x228] sm:$0xff]  }
 0x174   : > { %v1332_v55 = vpop.f32.mrf.mxu1  ;;  %v1787_v20 = vpop.f32.mrf.mxu0  ;;  %4745 = vmatmul.mubr.msk.bf16.gmra.mxu0 %vm412_vm0, %v4977_v13 }
 0x175   : > { %v6520_v53 = vadd.f32 %v1332_v55, %v591_v40  ;;  %v1860_v17 = vadd.f32 %v1787_v20, %v6337_v24  ;;  %4746 = vmatprep.mubr.msk.bf16.mxu0 %vm412_vm0, %v4979_v14  ;;  %v4981_v24 = vld [vmem:[%s7076_s1 + $0x218] sm:$0xff]  }
 0x176   : > { %v1334_v30 = vpop.f32.mrf.mxu1  ;;  %v1789_v50 = vpop.f32.mrf.mxu0 }
 0x177   : > { %v6524_v21 = vadd.f32 %v1334_v30, %v593_v39  ;;  %v1861_v61 = vadd.f32 %v1789_v50, %v6346_v3 }
 0x178   : > { %v1336_v22 = vpop.f32.mrf.mxu1  ;;  %v1791_v11 = vpop.f32.mrf.mxu0 }
 0x179   : > { %v6530_v29 = vadd.f32 %v1336_v22, %v595_v5  ;;  %v1862_v60 = vadd.f32 %v1791_v11, %v6354_v41 }
 0x17a   : > { %v2075_v63 = vpop.f32.mrf.mxu1  ;;  %4751 = vmatmul.mubr.msk.bf16.vlgmr.msra.gmra.mxu1 %vm412_vm0, %v4978_v2  ;;  %v1793_v40 = vpop.f32.mrf.mxu0 }
 0x17b   : > { %v6537_v35 = vadd.f32 %v2075_v63, %v1856_v15  ;;  %v1863_v3 = vadd.f32 %v1793_v40, %v6361_v9  ;;  %4752 = vmatprep.mubr.msk.bf16.mxu1 %vm412_vm0, %v4980_v12  ;;  %v4982_v9 = vld [vmem:[%s7076_s1 + $0x230] sm:$0xff]  }
 0x17c   : > { %v2077_v0 = vpop.f32.mrf.mxu1  ;;  %v1797_v47 = vpop.f32.mrf.mxu0  ;;  %4747 = vmatmul.mubr.msk.bf16.gmra.mxu0 %vm412_vm0, %v4979_v14 }
 0x17d   : > { %v6542_v39 = vadd.f32 %v2077_v0, %v1857_v10  ;;  %v1864_v41 = vadd.f32 %v1797_v47, %v6369_v25  ;;  %4748 = vmatprep.mubr.msk.bf16.mxu0 %vm412_vm0, %v4981_v24 }
 0x17e   : > { %v2079_v4 = vpop.f32.mrf.mxu1  ;;  %v1799_v52 = vpop.f32.mrf.mxu0 }
 0x17f   : > { %v6546_v26 = vadd.f32 %v2079_v4, %v1858_v45  ;;  %v1865_v5 = vadd.f32 %v1799_v52, %v6379_v34 }
 0x180   : > { %v2081_v13 = vpop.f32.mrf.mxu1  ;;  %v1801_v28 = vpop.f32.mrf.mxu0 }
 0x181   : > { %v6552_v59 = vadd.f32 %v2081_v13, %v1859_v31  ;;  %v1866_v49 = vadd.f32 %v1801_v28, %v6388_v18 }
 0x182   : > { %v2085_v15 = vpop.f32.mrf.mxu1  ;;  %4753 = vmatmul.mubr.msk.bf16.gmra.mxu1 %vm412_vm0, %v4980_v12  ;;  %v1803_v25 = vpop.f32.mrf.mxu0 }
 0x183   : > { %v6556_v6 = vadd.f32 %v2085_v15, %v1860_v17  ;;  %v1867_v37 = vadd.f32 %v1803_v25, %v6396_v1  ;;  %4754 = vmatprep.mubr.msk.bf16.mxu1 %vm412_vm0, %v4982_v9  ;;  %v4983_v1 = vld [vmem:[%s7076_s1 + $0x238] sm:$0xff]  }
 0x184   : > { %v2087_v34 = vpop.f32.mrf.mxu1  ;;  %v1807_v10 = vpop.f32.mrf.mxu0  ;;  %4749 = vmatmul.mubr.msk.bf16.gmra.mxu0 %vm412_vm0, %v4981_v24 }
 0x185   : > { %v6561_v2 = vadd.f32 %v2087_v34, %v1861_v61  ;;  %v1868_v48 = vadd.f32 %v1807_v10, %v6405_v8 }
 0x186   : > { %v2089_v62 = vpop.f32.mrf.mxu1  ;;  %v1809_v18 = vpop.f32.mrf.mxu0 }
 0x187   : > { %v6564_v45 = vadd.f32 %v2089_v62, %v1862_v60  ;;  %v1869_v14 = vadd.f32 %v1809_v18, %v6415_v42 }
 0x188   : > { %v2091_v56 = vpop.f32.mrf.mxu1  ;;  %v1811_v57 = vpop.f32.mrf.mxu0 }
 0x189   : > { %v6570_v31 = vadd.f32 %v2091_v56, %v1863_v3  ;;  %v1870_v55 = vadd.f32 %v1811_v57, %v6422_v54 }
 0x18a   : > { %v2095_v20 = vpop.f32.mrf.mxu1  ;;  %4755 = vmatmul.mubr.msk.bf16.gmra.mxu1 %vm412_vm0, %v4982_v9  ;;  %v1813_v8 = vpop.f32.mrf.mxu0 }
 0x18b   : > { %v6574_v17 = vadd.f32 %v2095_v20, %v1864_v41  ;;  %v1871_v30 = vadd.f32 %v1813_v8, %v6428_v33  ;;  %4756 = vmatprep.mubr.msk.bf16.mxu1 %vm412_vm0, %v4983_v1 }
 0x18c   : > { %v2097_v42 = vpop.f32.mrf.mxu1  ;;  %v1817_v50 = vpop.f32.mrf.mxu0 }
 0x18d   : > { %v6578_v61 = vadd.f32 %v2097_v42, %v1865_v5  ;;  %v1872_v12 = vadd.f32 %v1817_v50, %v6435_v23 }
 0x18e   : > { %v2099_v22 = vpop.f32.mrf.mxu1  ;;  %v1819_v11 = vpop.f32.mrf.mxu0 }
 0x18f   : > { %v6581_v60 = vadd.f32 %v2099_v22, %v1866_v49  ;;  %v1873_v54 = vadd.f32 %v1819_v11, %v6443_v19 }
 0x190   : > { %v2101_v24 = vpop.f32.mrf.mxu1  ;;  %v1821_v63 = vpop.f32.mrf.mxu0 }
 0x191   : > { %v6584_v40 = vadd.f32 %v2101_v24, %v1867_v37  ;;  %v1874_v33 = vadd.f32 %v1821_v63, %v6450_v36 }
 0x192   : > { %v2105_v3 = vpop.f32.mrf.mxu1  ;;  %4757 = vmatmul.mubr.msk.bf16.gmra.mxu1 %vm412_vm0, %v4983_v1  ;;  %v1823_v0 = vpop.f32.mrf.mxu0 }
 0x193   : > { %v6588_v47 = vadd.f32 %v2105_v3, %v1868_v48  ;;  %v1875_v23 = vadd.f32 %v1823_v0, %v6456_v7 }
 0x194   : > { %v2107_v41 = vpop.f32.mrf.mxu1  ;;  %v1827_v4 = vpop.f32.mrf.mxu0 }
 0x195   : > { %v6591_v52 = vadd.f32 %v2107_v41, %v1869_v14  ;;  %v1876_v19 = vadd.f32 %v1827_v4, %v6463_v27 }
 0x196   : > { %v2109_v5 = vpop.f32.mrf.mxu1  ;;  %v1829_v9 = vpop.f32.mrf.mxu0 }
 0x197   : > { %v6594_v13 = vadd.f32 %v2109_v5, %v1870_v55  ;;  %v1877_v36 = vadd.f32 %v1829_v9, %v6471_v32 }
 0x198   : > { %v2111_v28 = vpop.f32.mrf.mxu1  ;;  %v1831_v49 = vpop.f32.mrf.mxu0 }
 0x199   : > { %v6597_v15 = vadd.f32 %v2111_v28, %v1871_v30  ;;  %v1878_v25 = vadd.f32 %v1831_v49, %v6476_v43 }
 0x19a   : > { %v2115_v37 = vpop.f32.mrf.mxu1  ;;  %v1833_v7 = vpop.f32.mrf.mxu0 }
 0x19b   : > { %v6600_v34 = vadd.f32 %v2115_v37, %v1872_v12  ;;  %v1879_v10 = vadd.f32 %v1833_v7, %v6482_v44 }
 0x19c   : > { %v2117_v48 = vpop.f32.mrf.mxu1  ;;  %v1837_v27 = vpop.f32.mrf.mxu0 }
 0x19d   : > { %v6603_v62 = vadd.f32 %v2117_v48, %v1873_v54  ;;  %v1880_v18 = vadd.f32 %v1837_v27, %v6489_v16 }
 0x19e   : > { %v2119_v14 = vpop.f32.mrf.mxu1  ;;  %v1839_v32 = vpop.f32.mrf.mxu0 }
 0x19f   : > { %v6606_v1 = vadd.f32 %v2119_v14, %v1874_v33  ;;  %v1881_v56 = vadd.f32 %v1839_v32, %v6497_v46 }
 0x1a0   : > { %v2121_v57 = vpop.f32.mrf.mxu1  ;;  %v1841_v43 = vpop.f32.mrf.mxu0 }
 0x1a1   : > { %v6609_v55 = vadd.f32 %v2121_v57, %v1875_v23  ;;  %v1882_v20 = vadd.f32 %v1841_v43, %v6501_v38 }
 0x1a2   : > { %v2125_v8 = vpop.f32.mrf.mxu1  ;;  %v1843_v44 = vpop.f32.mrf.mxu0 }
 0x1a3   : > { %v6612_v30 = vadd.f32 %v2125_v8, %v1876_v19  ;;  %v1883_v42 = vadd.f32 %v1843_v44, %v6507_v58 }
 0x1a4   : > { %v2127_v50 = vpop.f32.mrf.mxu1  ;;  %v1847_v16 = vpop.f32.mrf.mxu0 }
 0x1a5   : > { %v6615_v12 = vadd.f32 %v2127_v50, %v1877_v36  ;;  %v1884_v22 = vadd.f32 %v1847_v16, %v6514_v51 }
 0x1a6   : > { %v2129_v11 = vpop.f32.mrf.mxu1  ;;  %v1849_v46 = vpop.f32.mrf.mxu0 }
 0x1a7   : > { %v6618_v54 = vadd.f32 %v2129_v11, %v1878_v25  ;;  %v1885_v24 = vadd.f32 %v1849_v46, %v6520_v53 }
 0x1a8   : > { %v2131_v63 = vpop.f32.mrf.mxu1  ;;  %v1851_v38 = vpop.f32.mrf.mxu0 }
 0x1a9   : > { %v6621_v33 = vadd.f32 %v2131_v63, %v1879_v10  ;;  %v1886_v3 = vadd.f32 %v1851_v38, %v6524_v21 }
 0x1aa   : > { %v2135_v0 = vpop.f32.mrf.mxu1  ;;  %v1853_v58 = vpop.f32.mrf.mxu0 }
 0x1ab   : > { %v6624_v23 = vadd.f32 %v2135_v0, %v1880_v18  ;;  %v1887_v41 = vadd.f32 %v1853_v58, %v6530_v29 }
 0x1ac   : > { %v2137_v4 = vpop.f32.mrf.mxu1  ;;  %v2395_v51 = vpop.f32.mrf.mxu0 }
 0x1ad   : > { %v6627_v19 = vadd.f32 %v2137_v4, %v1881_v56  ;;  %v2474_v5 = vadd.f32 %v2395_v51, %v6537_v35 }
 0x1ae   : > { %v2139_v9 = vpop.f32.mrf.mxu1  ;;  %v2397_v53 = vpop.f32.mrf.mxu0 }
 0x1af   : > { %v6630_v36 = vadd.f32 %v2139_v9, %v1882_v20  ;;  %v2475_v28 = vadd.f32 %v2397_v53, %v6542_v39 }
 0x1b0   : > { %v2141_v49 = vpop.f32.mrf.mxu1  ;;  %v2399_v21 = vpop.f32.mrf.mxu0 }
 0x1b1   : > { %v6633_v25 = vadd.f32 %v2141_v49, %v1883_v42  ;;  %v2476_v37 = vadd.f32 %v2399_v21, %v6546_v26 }
 0x1b2   : > { %v2145_v7 = vpop.f32.mrf.mxu1  ;;  %v2401_v29 = vpop.f32.mrf.mxu0 }
 0x1b3   : > { %v6636_v10 = vadd.f32 %v2145_v7, %v1884_v22  ;;  %v2477_v48 = vadd.f32 %v2401_v29, %v6552_v59 }
 0x1b4   : > { %v2147_v27 = vpop.f32.mrf.mxu1  ;;  %v2405_v35 = vpop.f32.mrf.mxu0 }
 0x1b5   : > { %v6639_v18 = vadd.f32 %v2147_v27, %v1885_v24  ;;  %v2478_v14 = vadd.f32 %v2405_v35, %v6556_v6 }
 0x1b6   : > { %v2149_v32 = vpop.f32.mrf.mxu1  ;;  %v2407_v39 = vpop.f32.mrf.mxu0 }
 0x1b7   : > { %v6642_v56 = vadd.f32 %v2149_v32, %v1886_v3  ;;  %v2479_v57 = vadd.f32 %v2407_v39, %v6561_v2 }
 0x1b8   : > { %v2151_v43 = vpop.f32.mrf.mxu1  ;;  %v2409_v26 = vpop.f32.mrf.mxu0 }
 0x1b9   : > { %v6645_v20 = vadd.f32 %v2151_v43, %v1887_v41  ;;  %v2480_v8 = vadd.f32 %v2409_v26, %v6564_v45 }
 0x1ba   : > { %v2699_v44 = vpop.f32.mrf.mxu1  ;;  %v2411_v59 = vpop.f32.mrf.mxu0 }
 0x1bb   : > { %v6648_v42 = vadd.f32 %v2699_v44, %v2474_v5  ;;  %v2481_v50 = vadd.f32 %v2411_v59, %v6570_v31 }
 0x1bc   : > { %v2701_v16 = vpop.f32.mrf.mxu1  ;;  %v2415_v6 = vpop.f32.mrf.mxu0 }
 0x1bd   : > { %v6651_v22 = vadd.f32 %v2701_v16, %v2475_v28  ;;  %v2482_v11 = vadd.f32 %v2415_v6, %v6574_v17 }
 0x1be   : > { %v2703_v46 = vpop.f32.mrf.mxu1  ;;  %v2417_v2 = vpop.f32.mrf.mxu0 }
 0x1bf   : > { %v6654_v24 = vadd.f32 %v2703_v46, %v2476_v37  ;;  %v2483_v63 = vadd.f32 %v2417_v2, %v6578_v61 }
 0x1c0   : > { %v2705_v38 = vpop.f32.mrf.mxu1  ;;  %v2419_v45 = vpop.f32.mrf.mxu0 }
 0x1c1   : > { %v6657_v3 = vadd.f32 %v2705_v38, %v2477_v48  ;;  %v2484_v0 = vadd.f32 %v2419_v45, %v6581_v60 }
 0x1c2   : > { %v2709_v58 = vpop.f32.mrf.mxu1  ;;  %v2421_v31 = vpop.f32.mrf.mxu0 }
 0x1c3   : > { %v6660_v41 = vadd.f32 %v2709_v58, %v2478_v14  ;;  %v2485_v4 = vadd.f32 %v2421_v31, %v6584_v40 }
 0x1c4   : > { %v2711_v51 = vpop.f32.mrf.mxu1  ;;  %v2425_v17 = vpop.f32.mrf.mxu0 }
 0x1c5   : > { %v6663_v5 = vadd.f32 %v2711_v51, %v2479_v57  ;;  %v2486_v9 = vadd.f32 %v2425_v17, %v6588_v47 }
 0x1c6   : > { %v2713_v53 = vpop.f32.mrf.mxu1  ;;  %v2427_v61 = vpop.f32.mrf.mxu0 }
 0x1c7   : > { %v6666_v28 = vadd.f32 %v2713_v53, %v2480_v8  ;;  %v2487_v49 = vadd.f32 %v2427_v61, %v6591_v52 }
 0x1c8   : > { %v2715_v21 = vpop.f32.mrf.mxu1  ;;  %v2429_v60 = vpop.f32.mrf.mxu0 }
 0x1c9   : > { %v6669_v37 = vadd.f32 %v2715_v21, %v2481_v50  ;;  %v2488_v7 = vadd.f32 %v2429_v60, %v6594_v13 }
 0x1ca   : > { %v2719_v29 = vpop.f32.mrf.mxu1  ;;  %v2431_v40 = vpop.f32.mrf.mxu0 }
 0x1cb   : > { %v6672_v48 = vadd.f32 %v2719_v29, %v2482_v11  ;;  %v2489_v27 = vadd.f32 %v2431_v40, %v6597_v15 }
 0x1cc   : > { %v2721_v35 = vpop.f32.mrf.mxu1  ;;  %v2435_v47 = vpop.f32.mrf.mxu0 }
 0x1cd   : > { %v6675_v14 = vadd.f32 %v2721_v35, %v2483_v63  ;;  %v2490_v32 = vadd.f32 %v2435_v47, %v6600_v34 }
 0x1ce   : > { %v2723_v39 = vpop.f32.mrf.mxu1  ;;  %v2437_v52 = vpop.f32.mrf.mxu0 }
 0x1cf   : > { %v6678_v57 = vadd.f32 %v2723_v39, %v2484_v0  ;;  %v2491_v43 = vadd.f32 %v2437_v52, %v6603_v62 }
 0x1d0   : > { %v2725_v26 = vpop.f32.mrf.mxu1  ;;  %v2439_v13 = vpop.f32.mrf.mxu0 }
 0x1d1   : > { %v6681_v8 = vadd.f32 %v2725_v26, %v2485_v4  ;;  %v2492_v44 = vadd.f32 %v2439_v13, %v6606_v1 }
 0x1d2   : > { %v2729_v59 = vpop.f32.mrf.mxu1  ;;  %v2441_v15 = vpop.f32.mrf.mxu0 }
 0x1d3   : > { %v6684_v50 = vadd.f32 %v2729_v59, %v2486_v9  ;;  %v2493_v16 = vadd.f32 %v2441_v15, %v6609_v55 }
 0x1d4   : > { %v2731_v6 = vpop.f32.mrf.mxu1  ;;  %v2445_v34 = vpop.f32.mrf.mxu0 }
 0x1d5   : > { %v6687_v11 = vadd.f32 %v2731_v6, %v2487_v49  ;;  %v2494_v46 = vadd.f32 %v2445_v34, %v6612_v30 }
 0x1d6   : > { %v2733_v2 = vpop.f32.mrf.mxu1  ;;  %v2447_v62 = vpop.f32.mrf.mxu0 }
 0x1d7   : > { %v6690_v63 = vadd.f32 %v2733_v2, %v2488_v7  ;;  %v2495_v38 = vadd.f32 %v2447_v62, %v6615_v12 }
 0x1d8   : > { %v2735_v45 = vpop.f32.mrf.mxu1  ;;  %v2449_v1 = vpop.f32.mrf.mxu0 }
 0x1d9   : > { %v6693_v0 = vadd.f32 %v2735_v45, %v2489_v27  ;;  %v2496_v58 = vadd.f32 %v2449_v1, %v6618_v54 }
 0x1da   : > { %v2739_v31 = vpop.f32.mrf.mxu1  ;;  %v2451_v55 = vpop.f32.mrf.mxu0 }
 0x1db   : > { %v6696_v4 = vadd.f32 %v2739_v31, %v2490_v32  ;;  %v2497_v51 = vadd.f32 %v2451_v55, %v6621_v33 }
 0x1dc   : > { %v2741_v17 = vpop.f32.mrf.mxu1  ;;  %v2455_v30 = vpop.f32.mrf.mxu0 }
 0x1dd   : > { %v6699_v9 = vadd.f32 %v2741_v17, %v2491_v43  ;;  %v2498_v53 = vadd.f32 %v2455_v30, %v6624_v23 }
 0x1de   : > { %v2743_v61 = vpop.f32.mrf.mxu1  ;;  %v2457_v12 = vpop.f32.mrf.mxu0 }
 0x1df   : > { %v6702_v49 = vadd.f32 %v2743_v61, %v2492_v44  ;;  %v2499_v21 = vadd.f32 %v2457_v12, %v6627_v19 }
 0x1e0   : > { %v2745_v60 = vpop.f32.mrf.mxu1  ;;  %v2459_v54 = vpop.f32.mrf.mxu0 }
 0x1e1   : > { %v6705_v7 = vadd.f32 %v2745_v60, %v2493_v16  ;;  %v2500_v29 = vadd.f32 %v2459_v54, %v6630_v36 }
 0x1e2   : > { %v2749_v40 = vpop.f32.mrf.mxu1  ;;  %v2461_v33 = vpop.f32.mrf.mxu0 }
 0x1e3   : > { %v6708_v27 = vadd.f32 %v2749_v40, %v2494_v46  ;;  %v2501_v35 = vadd.f32 %v2461_v33, %v6633_v25 }
 0x1e4   : > { %v2751_v47 = vpop.f32.mrf.mxu1  ;;  %v2465_v23 = vpop.f32.mrf.mxu0 }
 0x1e5   : > { %v6711_v32 = vadd.f32 %v2751_v47, %v2495_v38  ;;  %v2502_v39 = vadd.f32 %v2465_v23, %v6636_v10 }
 0x1e6   : > { %v2753_v52 = vpop.f32.mrf.mxu1  ;;  %v2467_v19 = vpop.f32.mrf.mxu0 }
 0x1e7   : > { %v6714_v43 = vadd.f32 %v2753_v52, %v2496_v58  ;;  %v2503_v26 = vadd.f32 %v2467_v19, %v6639_v18 }
 0x1e8   : > { %v2755_v13 = vpop.f32.mrf.mxu1  ;;  %v2469_v36 = vpop.f32.mrf.mxu0 }
 0x1e9   : > { %v6717_v44 = vadd.f32 %v2755_v13, %v2497_v51  ;;  %v2504_v59 = vadd.f32 %v2469_v36, %v6642_v56 }
 0x1ea   : > { %v2759_v15 = vpop.f32.mrf.mxu1  ;;  %v2471_v25 = vpop.f32.mrf.mxu0 }
 0x1eb   : > { %v6720_v16 = vadd.f32 %v2759_v15, %v2498_v53  ;;  %v2505_v6 = vadd.f32 %v2471_v25, %v6645_v20 }
 0x1ec   : > { %v2761_v34 = vpop.f32.mrf.mxu1  ;;  %v6723_v10 = vpop.f32.mrf.mxu0 }
 0x1ed   : > { %v6725_v46 = vadd.f32 %v2761_v34, %v2499_v21 }
 0x1ee   : > { %v2763_v2 = vpop.f32.mrf.mxu1  ;;  %v6727_v62 = vpop.f32.mrf.mxu0 }
 0x1ef   : > { %7260 = vst [vmem:[#allocation23_spill] sm:$0xff] %v6725_v46  ;;  %v6729_v18 = vadd.f32 %v2763_v2, %v2500_v29 }
 0x1f0   : > { %v2765_v38 = vpop.f32.mrf.mxu1  ;;  %v6731_v45 = vpop.f32.mrf.mxu0 }
 0x1f1   : > { %7261 = vst [vmem:[#allocation36_spill] sm:$0xff] %v6729_v18  ;;  %v6733_v56 = vadd.f32 %v2765_v38, %v2501_v35 }
 0x1f2   : > { %v2769_v1 = vpop.f32.mrf.mxu1  ;;  %v6735_v58 = vpop.f32.mrf.mxu0 }
 0x1f3   : > { %7262 = vst [vmem:[#allocation24_spill] sm:$0xff] %v6733_v56  ;;  %v6737_v31 = vadd.f32 %v2769_v1, %v2502_v39 }
 0x1f4   : > { %v2771_v20 = vpop.f32.mrf.mxu1  ;;  %v3007_v55 = vpop.f32.mrf.mxu0 }
 0x1f5   : > { %v6739_v51 = vadd.f32 %v2771_v20, %v2503_v26  ;;  %v6742_v17 = vadd.f32 %v3007_v55, %v6660_v41 }
 0x1f6   : > { %v2773_v30 = vpop.f32.mrf.mxu1  ;;  %v6744_v53 = vpop.f32.mrf.mxu0 }
 0x1f7   : > { %7263 = vst [vmem:[#allocation6_spill] sm:$0xff] %v6739_v51  ;;  %v6746_v61 = vadd.f32 %v2773_v30, %v2504_v59 }
 0x1f8   : > { %v2775_v12 = vpop.f32.mrf.mxu1  ;;  %v3011_v21 = vpop.f32.mrf.mxu0 }
 0x1f9   : > { %v6748_v60 = vadd.f32 %v2775_v12, %v2505_v6  ;;  %v6751_v54 = vadd.f32 %v3011_v21, %v6666_v28 }
 0x1fa   : > { %v6753_v29 = vpop.f32.mrf.mxu1  ;;  %v6755_v40 = vpop.f32.mrf.mxu0 }
 0x1fb   : > { %7264 = vst [vmem:[#allocation25_spill] sm:$0xff] %v6748_v60 }
 0x1fc   : > { %v6757_v33 = vpop.f32.mrf.mxu1  ;;  %v3017_v41 = vpop.f32.mrf.mxu0 }
 0x1fd   : > { %v6760_v35 = vadd.f32 %v3017_v41, %v6672_v48 }
 0x1fe   : > { %v6762_v47 = vpop.f32.mrf.mxu1  ;;  %v3019_v23 = vpop.f32.mrf.mxu0 }
 0x1ff   : > { %v6765_v39 = vadd.f32 %v3019_v23, %v6675_v14 }
 0x200   : > { %v6767_v52 = vpop.f32.mrf.mxu1  ;;  %v3021_v28 = vpop.f32.mrf.mxu0 }
 0x201   : > { %v6770_v19 = vadd.f32 %v3021_v28, %v6678_v57 }
 0x202   : > { %v6772_v26 = vpop.f32.mrf.mxu1  ;;  %v3023_v13 = vpop.f32.mrf.mxu0 }
 0x203   : > { %v6775_v36 = vadd.f32 %v3023_v13, %v6681_v8 }
 0x204   : > { %v6777_v48 = vpop.f32.mrf.mxu1  ;;  %v3027_v59 = vpop.f32.mrf.mxu0 }
 0x205   : > { %v3088_v15 = vadd.f32 %v3027_v59, %v6684_v50 }
 0x206   : > { %v6780_v25 = vpop.f32.mrf.mxu1  ;;  %v3029_v14 = vpop.f32.mrf.mxu0 }
 0x207   : > { %v3089_v6 = vadd.f32 %v3029_v14, %v6687_v11 }
 0x208   : > { %v6783_v34 = vpop.f32.mrf.mxu1  ;;  %v3031_v57 = vpop.f32.mrf.mxu0 }
 0x209   : > { %v3090_v2 = vadd.f32 %v3031_v57, %v6690_v63 }
 0x20a   : > { %v6786_v38 = vpop.f32.mrf.mxu1  ;;  %v3033_v1 = vpop.f32.mrf.mxu0 }
 0x20b   : > { %v3091_v8 = vadd.f32 %v3033_v1, %v6693_v0 }
 0x20c   : > { %v6789_v20 = vpop.f32.mrf.mxu1  ;;  %v6791_v55 = vpop.f32.mrf.mxu0 }
 0x20e   : > { %v6793_v50 = vpop.f32.mrf.mxu1  ;;  %v6795_v30 = vpop.f32.mrf.mxu0 }
 0x210   : > { %v6797_v12 = vpop.f32.mrf.mxu1  ;;  %v6799_v11 = vpop.f32.mrf.mxu0 }
 0x212   : > { %v3347_v21 = vpop.f32.mrf.mxu1  ;;  %v6801_v41 = vpop.f32.mrf.mxu0 }
 0x213   : > { %v6803_v63 = vadd.f32 %v3347_v21, %v3088_v15 }
 0x214   : > { %v3349_v23 = vpop.f32.mrf.mxu1  ;;  %v6805_v28 = vpop.f32.mrf.mxu0 }
 0x215   : > { %7265 = vst [vmem:[#allocation37_spill] sm:$0xff] %v6803_v63  ;;  %v6807_v0 = vadd.f32 %v3349_v23, %v3089_v6 }
 0x216   : > { %v3351_v13 = vpop.f32.mrf.mxu1  ;;  %v6809_v59 = vpop.f32.mrf.mxu0 }
 0x217   : > { %7266 = vst [vmem:[#allocation30_spill] sm:$0xff] %v6807_v0  ;;  %v6811_v14 = vadd.f32 %v3351_v13, %v3090_v2 }
 0x218   : > { %v3353_v57 = vpop.f32.mrf.mxu1  ;;  %v6813_v1 = vpop.f32.mrf.mxu0 }
 0x219   : > { %7267 = vst [vmem:[#allocation31_spill] sm:$0xff] %v6811_v14  ;;  %v6815_v60 = vadd.f32 %v3353_v57, %v3091_v8 }
 0x21a   : > { %v6817_v51 = vpop.f32.mrf.mxu1  ;;  %v6819_v56 = vpop.f32.mrf.mxu0 }
 0x21b   : > { %7268 = vst [vmem:[#allocation42_spill] sm:$0xff] %v6815_v60 }
 0x21c   : > { %v6821_v15 = vpop.f32.mrf.mxu1  ;;  %v6823_v21 = vpop.f32.mrf.mxu0 }
 0x21e   : > { %v6825_v6 = vpop.f32.mrf.mxu1  ;;  %v6827_v23 = vpop.f32.mrf.mxu0 }
 0x21f   : > { %7269 = vst [vmem:[#allocation33_spill] sm:$0xff] %v6827_v23 }
 0x220   : > { %v6829_v2 = vpop.f32.mrf.mxu1  ;;  %v6831_v13 = vpop.f32.mrf.mxu0 }
 0x221   : > { %7270 = vst [vmem:[#allocation40_spill] sm:$0xff] %v6831_v13 }
 0x222   : > { %v6833_v14 = vpop.f32.mrf.mxu1  ;;  %v6835_v8 = vpop.f32.mrf.mxu0 }
 0x223   : > { %7271 = vst [vmem:[#allocation7_spill] sm:$0xff] %v6833_v14  ;;  %7272 = vst [vmem:[#allocation8_spill] sm:$0xff] %v6835_v8  ;;  %v3076_v8 = vadd.f32 %v6723_v10, %v6648_v42 }
 0x224   : > { %v6837_v57 = vpop.f32.mrf.mxu1  ;;  %v3067_v60 = vpop.f32.mrf.mxu0 }
 0x225   : > { %7273 = vst [vmem:[#allocation9_spill] sm:$0xff] %v6837_v57  ;;  %v6840_v0 = vadd.f32 %v3067_v60, %v6737_v31  ;;  %v3077_v31 = vadd.f32 %v6727_v62, %v6651_v22  ;;  %v3396_v60 = vadd.f32 %v6753_v29, %v3076_v8  ;;  %v3079_v22 = vadd.f32 %v6735_v58, %v6657_v3 }
 0x226   : > { %v6842_v63 = vpop.f32.mrf.mxu1  ;;  %v6844_v18 = vpop.f32.mrf.mxu0 }
 0x227   : > { %7274 = vst [vmem:[#allocation10_spill] sm:$0xff] %v6840_v0  ;;  %7275 = vst [vmem:[#allocation12_spill] sm:$0xff] %v6844_v18 }
 0x228   : > { %v6846_v23 = vpop.f32.mrf.mxu1  ;;  %v3071_v46 = vpop.f32.mrf.mxu0 }
 0x229   : > { %v6849_v13 = vadd.f32 %v3071_v46, %v6746_v61  ;;  %v3078_v46 = vadd.f32 %v6731_v45, %v6654_v24  ;;  %v3397_v61 = vadd.f32 %v6757_v33, %v3077_v31  ;;  %v3399_v45 = vadd.f32 %v6767_v52, %v3079_v22 }
 0x22a   : > { %v6853_v14 = vpop.f32.mrf.mxu1  ;;  %v6855_v57 = vpop.f32.mrf.mxu0 }
 0x22b   : > { %7276 = vst [vmem:[#allocation14_spill] sm:$0xff] %v6849_v13  ;;  %7277 = vst [vmem:[#allocation16_spill] sm:$0xff] %v6855_v57  ;;  %v3398_v62 = vadd.f32 %v6762_v47, %v3078_v46  ;;  %v3400_v47 = vadd.f32 %v6772_v26, %v6742_v17  ;;  %v3402_v26 = vadd.f32 %v6780_v25, %v6751_v54 }
 0x22c   : > { %v6861_v0 = vpop.f32.mrf.mxu1  ;;  %v3621_v18 = vpop.f32.mrf.mxu0  ;;  %v3093_v54 = vadd.f32 %v6795_v30, %v6699_v9 }
 0x22d   : > { %v3700_v10 = vadd.f32 %v3621_v18, %v3396_v60  ;;  %v3081_v18 = vadd.f32 %v6744_v53, %v6663_v5 }
 0x22e   : > { %v6870_v42 = vpop.f32.mrf.mxu1  ;;  %v3623_v13 = vpop.f32.mrf.mxu0  ;;  %v3413_v9 = vadd.f32 %v6821_v15, %v3093_v54  ;;  %v7283_v54 = vld [vmem:[#allocation36_spill] sm:$0xff] }
 0x22f   : > { %7278 = vst [vmem:[#allocation18_spill] sm:$0xff] %v6870_v42  ;;  %v3701_v29 = vadd.f32 %v3623_v13, %v3397_v61  ;;  %v3861_v3 = vmul.f32 %v3700_v10, %v3700_v10  ;;  %v3401_v52 = vadd.f32 %v6777_v48, %v3081_v18 }
 0x230   : > { %v6875_v8 = vpop.f32.mrf.mxu1  ;;  %v3625_v24 = vpop.f32.mrf.mxu0 }
 0x231   : > { %v4468_v33 = vpack.c.bf16 %v3701_v29, %v3700_v10  ;;  %v3702_v31 = vadd.f32 %v3625_v24, %v3398_v62  ;;  %v3796_v57 = vadd.f32 %v3701_v29, %v3700_v10  ;;  %v3862_v58 = vmul.f32 %v3701_v29, %v3701_v29 }
 0x232   : > { %v6880_v60 = vpop.f32.mrf.mxu1  ;;  %v3627_v42 = vpop.f32.mrf.mxu0  ;;  %v3083_v10 = vadd.f32 %v6755_v40, %v6669_v37  ;;  %v3092_v37 = vadd.f32 %v6791_v55, %v6696_v4  ;;  %v3094_v55 = vadd.f32 %v6799_v11, %v6702_v49  ;;  %v3098_v49 = vadd.f32 %v6813_v1, %v6714_v43 }
 0x233   : > { %v3703_v13 = vadd.f32 %v3627_v42, %v3399_v45  ;;  %3797 = vadd.xlane.f32.xlu0 %v3796_v57  ;;  %3965 = vst [vmem:[%s191_s13] sm:$0xff] %v4468_v33  ;;  %v3893_v22 = vadd.f32 %v3862_v58, %v3861_v3  ;;  %v3863_v53 = vmul.f32 %v3702_v31, %v3702_v31 }
 0x234   : > { %v6888_v46 = vpop.f32.mrf.mxu1  ;;  %v3631_v61 = vpop.f32.mrf.mxu0  ;;  %v3403_v42 = vadd.f32 %v6783_v34, %v3083_v10  ;;  %v3404_v45 = vadd.f32 %v6786_v38, %v6760_v35  ;;  %v3405_v33 = vadd.f32 %v6789_v20, %v6765_v39  ;;  %v3406_v34 = vadd.f32 %v6793_v50, %v6770_v19 }
 0x235   : > { %v3704_v5 = vadd.f32 %v3631_v61, %v3400_v47  ;;  %v3864_v62 = vmul.f32 %v3703_v13, %v3703_v13  ;;  %v3799_v24 = vadd.f32 %v3703_v13, %v3702_v31  ;;  %v3407_v35 = vadd.f32 %v6797_v12, %v6775_v36 }
 0x236   : > { %v6892_v29 = vpop.f32.mrf.mxu1  ;;  %v3633_v17 = vpop.f32.mrf.mxu0  ;;  %v3412_v39 = vadd.f32 %v6817_v51, %v3092_v37  ;;  %v3095_v47 = vadd.f32 %v6801_v41, %v6705_v7  ;;  %v3096_v19 = vadd.f32 %v6805_v28, %v6708_v27  ;;  %v3097_v51 = vadd.f32 %v6809_v59, %v6711_v32  ;;  %v7282_v37 = vld [vmem:[#allocation9_spill] sm:$0xff] }
 0x237   : > { %v3705_v57 = vadd.f32 %v3633_v17, %v3401_v52  ;;  %3894 = vadd.xlane.f32.xlu0 %v3893_v22  ;;  %v3896_v48 = vadd.f32 %v3864_v62, %v3863_v53  ;;  %v3865_v25 = vmul.f32 %v3704_v5, %v3704_v5  ;;  %v3099_v11 = vadd.f32 %v6819_v56, %v6717_v44 }
 0x238   : > { %v6903_v40 = vpop.f32.mrf.mxu1  ;;  %v3635_v31 = vpop.f32.mrf.mxu0  ;;  %v3414_v7 = vadd.f32 %v6825_v6, %v3094_v55  ;;  %v3415_v32 = vadd.f32 %v6829_v2, %v3095_v47  ;;  %v3100_v59 = vadd.f32 %v6823_v21, %v6720_v16  ;;  %v7280_v6 = vld [vmem:[#allocation33_spill] sm:$0xff] }
 0x239   : > { %v3866_v18 = vmul.f32 %v3705_v57, %v3705_v57  ;;  %3897 = vadd.xlane.f32.xlu1 %v3896_v48  ;;  %v3802_v3 = vadd.f32 %v3705_v57, %v3704_v5  ;;  %v3706_v4 = vadd.f32 %v3635_v31, %v3402_v26  ;;  %v7281_v48 = vld [vmem:[#allocation7_spill] sm:$0xff]  ;;  %v3417_v31 = vadd.f32 %v7282_v37, %v3097_v51  ;;  %v7285_v51 = vld [vmem:[#allocation37_spill] sm:$0xff] }
 0x23a   : > { %v3661_v38 = vpop.f32.mrf.mxu1  ;;  %v3637_v20 = vpop.f32.mrf.mxu0  ;;  %v3416_v2 = vadd.f32 %v7281_v48, %v3096_v19  ;;  %v7289_v48 = vld [vmem:[#allocation24_spill] sm:$0xff] }
 0x23b   : > { %v3707_v30 = vadd.f32 %v3637_v20, %v3403_v42  ;;  %3800 = vadd.xlane.f32.xlu0 %v3799_v24  ;;  %v3899_v58 = vadd.f32 %v3866_v18, %v3865_v25  ;;  %v3716_v36 = vadd.f32 %v3661_v38, %v3412_v39  ;;  %v3867_v41 = vmul.f32 %v3706_v4, %v3706_v4  ;;  %v7279_v24 = vld [vmem:[#allocation23_spill] sm:$0xff]  ;;  %v7284_v25 = vld [vmem:[#allocation40_spill] sm:$0xff] }
 0x23c   : > { %v3663_v50 = vpop.f32.mrf.mxu1  ;;  %v3641_v12 = vpop.f32.mrf.mxu0  ;;  %v3101_v10 = vadd.f32 %v7280_v6, %v7279_v24  ;;  %v3102_v18 = vadd.f32 %v7284_v25, %v7283_v54 }
 0x23d   : > { %v3717_v15 = vadd.f32 %v3663_v50, %v3413_v9  ;;  %v3868_v13 = vmul.f32 %v3707_v30, %v3707_v30  ;;  %3803 = vadd.xlane.f32.xlu1 %v3802_v3  ;;  %v3708_v27 = vadd.f32 %v3641_v12, %v3404_v45  ;;  %v3805_v61 = vadd.f32 %v3707_v30, %v3706_v4 }
 0x23e   : > { %v3665_v52 = vpop.f32.mrf.mxu1  ;;  %v3643_v28 = vpop.f32.mrf.mxu0  ;;  %v3877_v1 = vmul.f32 %v3716_v36, %v3716_v36  ;;  %v3418_v30 = vadd.f32 %v6842_v63, %v3098_v49 }
 0x23f   : > { %v3878_v22 = vmul.f32 %v3717_v15, %v3717_v15  ;;  %v3709_v43 = vadd.f32 %v3643_v28, %v3405_v33  ;;  %v3718_v5 = vadd.f32 %v3665_v52, %v3414_v7  ;;  %v3820_v56 = vadd.f32 %v3717_v15, %v3716_v36 }
 0x240   : > { %v3667_v44 = vpop.f32.mrf.mxu1  ;;  %v3645_v53 = vpop.f32.mrf.mxu0  ;;  %v3902_v62 = vadd.f32 %v3868_v13, %v3867_v41  ;;  %v3869_v42 = vmul.f32 %v3708_v27, %v3708_v27  ;;  %v3419_v7 = vadd.f32 %v6846_v23, %v3099_v11 }
 0x241   : > { %v3719_v17 = vadd.f32 %v3667_v44, %v3415_v32  ;;  %v3870_v26 = vmul.f32 %v3709_v43, %v3709_v43  ;;  %v3710_v57 = vadd.f32 %v3645_v53, %v3406_v34  ;;  %3806 = vadd.xlane.f32.xlu1 %v3805_v61  ;;  %3821 = vadd.xlane.f32.xlu0 %v3820_v56  ;;  %v7287_v44 = vld [vmem:[#allocation31_spill] sm:$0xff] }
 0x242   : > { %v3671_v45 = vpop.f32.mrf.mxu1  ;;  %v3647_v16 = vpop.f32.mrf.mxu0  ;;  %v3917_v21 = vadd.f32 %v3878_v22, %v3877_v1  ;;  %v3808_v33 = vadd.f32 %v3709_v43, %v3708_v27  ;;  %v3879_v38 = vmul.f32 %v3718_v5, %v3718_v5  ;;  %v7286_v27 = vld [vmem:[#allocation30_spill] sm:$0xff]  ;;  %v3420_v61 = vadd.f32 %v6853_v14, %v3100_v59 }
 0x243   : > { %v3880_v3 = vmul.f32 %v3719_v17, %v3719_v17  ;;  %v3711_v39 = vadd.f32 %v3647_v16, %v3407_v35  ;;  %v3720_v4 = vadd.f32 %v3671_v45, %v3416_v2  ;;  %v3823_v55 = vadd.f32 %v3719_v17, %v3718_v5  ;;  %v7290_v2 = vld [vmem:[#allocation8_spill] sm:$0xff] }
 0x244   : > { %v3673_v20 = vpop.f32.mrf.mxu1  ;;  %v3651_v34 = vpop.f32.mrf.mxu0  ;;  %v6935_v9 = vadd.f32 %v3870_v26, %v3869_v42  ;;  %v3871_v19 = vmul.f32 %v3710_v57, %v3710_v57  ;;  %v7288_v26 = vld [vmem:[#allocation42_spill] sm:$0xff]  ;;  %v3103_v42 = vadd.f32 %v7290_v2, %v7289_v48 }
 0x245   : > { %v3721_v47 = vadd.f32 %v3673_v20, %v3417_v31  ;;  %v3872_v36 = vmul.f32 %v3711_v39, %v3711_v39  ;;  %3900 = vadd.xlane.f32.xlu0 %v3899_v58  ;;  %v3712_v12 = vadd.f32 %v3651_v34, %v7285_v51  ;;  %3824 = vadd.xlane.f32.xlu1 %v3823_v55 }
 0x246   : > { %v3675_v50 = vpop.f32.mrf.mxu1  ;;  %v3653_v15 = vpop.f32.mrf.mxu0  ;;  %v3920_v13 = vadd.f32 %v3880_v3, %v3879_v38  ;;  %v3811_v35 = vadd.f32 %v3711_v39, %v3710_v57  ;;  %v3881_v63 = vmul.f32 %v3720_v4, %v3720_v4  ;;  %v3421_v58 = vadd.f32 %v6861_v0, %v3101_v10  ;;  %v7291_v0 = vld [vmem:[#allocation18_spill] sm:$0xff] }
 0x247   : > { %v3882_v41 = vmul.f32 %v3721_v47, %v3721_v47  ;;  %v3722_v52 = vadd.f32 %v3675_v50, %v3418_v30  ;;  %v3713_v28 = vadd.f32 %v3653_v15, %v7286_v27  ;;  %v3826_v22 = vadd.f32 %v3721_v47, %v3720_v4  ;;  %v7292_v30 = vld [vmem:[#allocation6_spill] sm:$0xff]  ;;  %v7296_v27 = vld [vmem:[#allocation16_spill] sm:$0xff] }
 0x248   : > { %v3677_v49 = vpop.f32.mrf.mxu1  ;;  %v3655_v32 = vpop.f32.mrf.mxu0  ;;  %v6942_v43 = vadd.f32 %v3872_v36, %v3871_v19  ;;  %v3873_v53 = vmul.f32 %v3712_v12, %v3712_v12  ;;  %v3422_v10 = vadd.f32 %v7291_v0, %v3102_v18  ;;  %v3423_v25 = vadd.f32 %v6875_v8, %v3103_v42  ;;  %v7293_v18 = vld [vmem:[#allocation12_spill] sm:$0xff]  ;;  %v7294_v36 = vld [vmem:[#allocation10_spill] sm:$0xff] }
 0x249   : > { %v3723_v1 = vadd.f32 %v3677_v49, %v3419_v7  ;;  %v3874_v5 = vmul.f32 %v3713_v28, %v3713_v28  ;;  %v3714_v56 = vadd.f32 %v3655_v32, %v7287_v44  ;;  %3918 = vadd.xlane.f32.xlu0 %v3917_v21  ;;  %3903 = vadd.xlane.f32.xlu1 %v3902_v62 }
 0x24a   : > { %v3681_v23 = vpop.f32.mrf.mxu1  ;;  %v3657_v11 = vpop.f32.mrf.mxu0  ;;  %v3923_v24 = vadd.f32 %v3882_v41, %v3881_v63  ;;  %v3814_v6 = vadd.f32 %v3713_v28, %v3712_v12  ;;  %v3883_v14 = vmul.f32 %v3722_v52, %v3722_v52  ;;  %v3105_v47 = vadd.f32 %v7293_v18, %v7292_v30  ;;  %v7297_v63 = vld [vmem:[#allocation14_spill] sm:$0xff] }
 0x24b   : > { %v3884_v59 = vmul.f32 %v3723_v1, %v3723_v1  ;;  %v3724_v17 = vadd.f32 %v3681_v23, %v3420_v61  ;;  %v3715_v57 = vadd.f32 %v3657_v11, %v7288_v26  ;;  %v3829_v16 = vadd.f32 %v3723_v1, %v3722_v52  ;;  %v7295_v52 = vld [vmem:[#allocation25_spill] sm:$0xff] }
 0x24c   : > { %v3683_v45 = vpop.f32.mrf.mxu1  ;;  %v3911_v37 = vadd.f32 %v3874_v5, %v3873_v53  ;;  %v3875_v54 = vmul.f32 %v3714_v56, %v3714_v56  ;;  %v3424_v50 = vadd.f32 %v6880_v60, %v7294_v36  ;;  %v3425_v8 = vadd.f32 %v6888_v46, %v3105_v47 }
 0x24d   : > { %v3725_v31 = vadd.f32 %v3683_v45, %v3421_v58  ;;  %v3876_v21 = vmul.f32 %v3715_v57, %v3715_v57  ;;  %v3926_v62 = vadd.f32 %v3884_v59, %v3883_v14  ;;  %v3885_v3 = vmul.f32 %v3724_v17, %v3724_v17  ;;  %3809 = vadd.xlane.f32.xlu0 %v3808_v33 }
 0x24e   : > { %v3685_v39 = vpop.f32.mrf.mxu1  ;;  %3921 = vadd.xlane.f32.xlu1 %v3920_v13  ;;  %v3817_v38 = vadd.f32 %v3715_v57, %v3714_v56  ;;  %v3107_v28 = vadd.f32 %v7296_v27, %v7295_v52  ;;  %v3426_v49 = vadd.f32 %v6892_v29, %v7297_v63 }
 0x24f   : > { %v3886_v4 = vmul.f32 %v3725_v31, %v3725_v31  ;;  %v3726_v20 = vadd.f32 %v3685_v39, %v3422_v10  ;;  %v3832_v34 = vadd.f32 %v3725_v31, %v3724_v17  ;;  %v3914_v55 = vadd.f32 %v3876_v21, %v3875_v54 }
 0x250   : > { %v3687_v19 = vpop.f32.mrf.mxu1  ;;  %v3427_v58 = vadd.f32 %v6903_v40, %v3107_v28 }
 0x251   : > { %v3727_v51 = vadd.f32 %v3687_v19, %v3423_v25  ;;  %v3929_v12 = vadd.f32 %v3886_v4, %v3885_v3  ;;  %3827 = vadd.xlane.f32.xlu0 %v3826_v22  ;;  %v3887_v33 = vmul.f32 %v3726_v20, %v3726_v20 }
 0x252   : > { %v3691_v15 = vpop.f32.mrf.mxu1  ;;  %3812 = vadd.xlane.f32.xlu1 %v3811_v35 }
 0x253   : > { %v3888_v13 = vmul.f32 %v3727_v51, %v3727_v51  ;;  %v3728_v7 = vadd.f32 %v3691_v15, %v3424_v50  ;;  %v3835_v41 = vadd.f32 %v3727_v51, %v3726_v20 }
 0x254   : > { %v3693_v61 = vpop.f32.mrf.mxu1 }
 0x255   : > { %v3729_v32 = vadd.f32 %v3693_v61, %v3425_v8  ;;  %v3932_v60 = vadd.f32 %v3888_v13, %v3887_v33  ;;  %3906 = vadd.xlane.f32.xlu0 %v6935_v9  ;;  %v3889_v46 = vmul.f32 %v3728_v7, %v3728_v7 }
 0x256   : > { %v3695_v1 = vpop.f32.mrf.mxu1  ;;  %3830 = vadd.xlane.f32.xlu1 %v3829_v16 }
 0x257   : > { %v3890_v35 = vmul.f32 %v3729_v32, %v3729_v32  ;;  %v3730_v22 = vadd.f32 %v3695_v1, %v3426_v49  ;;  %v3838_v5 = vadd.f32 %v3729_v32, %v3728_v7 }
 0x258   : > { %v3697_v44 = vpop.f32.mrf.mxu1 }
 0x259   : > { %v3731_v56 = vadd.f32 %v3697_v44, %v3427_v58  ;;  %v3935_v53 = vadd.f32 %v3890_v35, %v3889_v46  ;;  %3924 = vadd.xlane.f32.xlu0 %v3923_v24  ;;  %v3891_v23 = vmul.f32 %v3730_v22, %v3730_v22 }
 0x25a   : > { %3909 = vadd.xlane.f32.xlu1 %v6942_v43 }
 0x25b   : > { %v3892_v29 = vmul.f32 %v3731_v56, %v3731_v56  ;;  %v3841_v11 = vadd.f32 %v3731_v56, %v3730_v22 }
 0x25d   : > { %v3938_v14 = vadd.f32 %v3892_v29, %v3891_v23  ;;  %3815 = vadd.xlane.f32.xlu0 %v3814_v6 }
 0x25e   : > { %3927 = vadd.xlane.f32.xlu1 %v3926_v62 }
 0x261   : > { %3833 = vadd.xlane.f32.xlu0 %v3832_v34 }
 0x262   : > { %3818 = vadd.xlane.f32.xlu1 %v3817_v38 }
 0x265   : > { %3912 = vadd.xlane.f32.xlu0 %v3911_v37 }
 0x266   : > { %3836 = vadd.xlane.f32.xlu1 %v3835_v41 }
 0x269   : > { %3930 = vadd.xlane.f32.xlu0 %v3929_v12 }
 0x26a   : > { %3915 = vadd.xlane.f32.xlu1 %v3914_v55 }
 0x26d   : > { %3839 = vadd.xlane.f32.xlu0 %v3838_v5 }
 0x26e   : > { %3933 = vadd.xlane.f32.xlu1 %v3932_v60 }
 0x271   : > { %3936 = vadd.xlane.f32.xlu0 %v3935_v53 }
 0x272   : > { %3842 = vadd.xlane.f32.xlu1 %v3841_v11 }
 0x276   : > { %3939 = vadd.xlane.f32.xlu1 %v3938_v14 }
 0x277   : > { %4998 = shalt.err (!%p4995_p3)
}
 0x278   : > { %s4999_s19 = scalar_lea.hbm %s3989_s23, 128  ;;  %s5003_s11 = scalar_lea.hbm %s7077_s2, 256 }
 0x279   : > { %p5000_p4 = scmp.ne.s32.totalorder %s3989_s23, %s4999_s19  ;;  %p5004_p9 = scmp.lt.s32.totalorder %s3989_s23, %s7077_s2 }
 0x27a   : > { %p5005_p10 = scmp.lt.s32.totalorder %s5003_s11, %s4999_s19 }
 0x27b   : > { %p5001_p7 = pnand %p5000_p4, %p5111_p5 }
 0x27c   : > { %p5006_p11 = por %p5005_p10, %p5004_p9 }
 0x27d   : > { %p5002_p8 = pneg %p5001_p7 }
 0x27f   : > { %p5007_p12 = pnand %p5006_p11, %p5002_p8 }
 0x281   : > { %5010 = shalt.err (!%p5007_p12)
}
 0x282   : > { %4855 = dma.vmem_to_hbm [thread:$0]  (%p5111_p5), %s3992_s28, 128, %s3989_s23, %s3967_s29   ;;  %vm3844_vm7 = vcmask 7168  }
 0x283   : > { %s4466_s13 = sshll.u32 %s5123_s27, 7 }
 0x284   : > { %s6987_s22 = scalar_lea.vmem %s7078_s3, %s4466_s13  ;;  %s6994_s25 = scalar_lea.vmem %s7079_s4, %s4466_s13 }
 0x2bc   : > { %v3798_v40 = vpop.xlane.xlu0 %3797 }
 0x2bd   : > { %3845 = vst.msk [vmem:[%s6987_s22] sm:$0xff] %vm3844_vm7, %v3798_v40 }
 0x2c0   : > { %v3895_v9 = vpop.xlane.xlu0 %3894 }
 0x2c1   : > { %3941 = vst.msk [vmem:[%s6994_s25] sm:$0xff] %vm3844_vm7, %v3895_v9 }
 0x2c2   : > { %v3898_v43 = vpop.xlane.xlu1 %3897 }
 0x2c3   : > { %3942 = vst.msk [vmem:[%s6994_s25 + $0x8] sm:$0xff] %vm3844_vm7, %v3898_v43 }
 0x2c4   : > { %v3801_v24 = vpop.xlane.xlu0 %3800 }
 0x2c5   : > { %3846 = vst.msk [vmem:[%s6987_s22 + $0x8] sm:$0xff] %vm3844_vm7, %v3801_v24 }
 0x2c6   : > { %v3804_v6 = vpop.xlane.xlu1 %3803 }
 0x2c7   : > { %3847 = vst.msk [vmem:[%s6987_s22 + $0x10] sm:$0xff] %vm3844_vm7, %v3804_v6 }
 0x2ca   : > { %v3807_v59 = vpop.xlane.xlu1 %3806  ;;  %v3822_v17 = vpop.xlane.xlu0 %3821 }
 0x2cb   : > { %3848 = vst.msk [vmem:[%s6987_s22 + $0x18] sm:$0xff] %vm3844_vm7, %v3807_v59  ;;  %3853 = vst.msk [vmem:[%s6987_s22 + $0x40] sm:$0xff] %vm3844_vm7, %v3822_v17 }
 0x2ce   : > { %v3901_v26 = vpop.xlane.xlu0 %3900  ;;  %v3825_v57 = vpop.xlane.xlu1 %3824 }
 0x2cf   : > { %3943 = vst.msk [vmem:[%s6994_s25 + $0x10] sm:$0xff] %vm3844_vm7, %v3901_v26  ;;  %3854 = vst.msk [vmem:[%s6987_s22 + $0x48] sm:$0xff] %vm3844_vm7, %v3825_v57 }
 0x2d2   : > { %v3919_v48 = vpop.xlane.xlu0 %3918  ;;  %v3904_v2 = vpop.xlane.xlu1 %3903 }
 0x2d3   : > { %3949 = vst.msk [vmem:[%s6994_s25 + $0x40] sm:$0xff] %vm3844_vm7, %v3919_v48  ;;  %3944 = vst.msk [vmem:[%s6994_s25 + $0x18] sm:$0xff] %vm3844_vm7, %v3904_v2 }
 0x2d6   : > { %v3810_v42 = vpop.xlane.xlu0 %3809 }
 0x2d7   : > { %v3922_v0 = vpop.xlane.xlu1 %3921  ;;  %3849 = vst.msk [vmem:[%s6987_s22 + $0x20] sm:$0xff] %vm3844_vm7, %v3810_v42 }
 0x2d8   : > { %3950 = vst.msk [vmem:[%s6994_s25 + $0x48] sm:$0xff] %vm3844_vm7, %v3922_v0 }
 0x2da   : > { %v3828_v10 = vpop.xlane.xlu0 %3827 }
 0x2db   : > { %v3813_v45 = vpop.xlane.xlu1 %3812  ;;  %3855 = vst.msk [vmem:[%s6987_s22 + $0x50] sm:$0xff] %vm3844_vm7, %v3828_v10 }
 0x2dc   : > { %3850 = vst.msk [vmem:[%s6987_s22 + $0x28] sm:$0xff] %vm3844_vm7, %v3813_v45 }
 0x2de   : > { %v3907_v16 = vpop.xlane.xlu0 %3906 }
 0x2df   : > { %v3831_v37 = vpop.xlane.xlu1 %3830  ;;  %3945 = vst.msk [vmem:[%s6994_s25 + $0x20] sm:$0xff] %vm3844_vm7, %v3907_v16 }
 0x2e0   : > { %3856 = vst.msk [vmem:[%s6987_s22 + $0x58] sm:$0xff] %vm3844_vm7, %v3831_v37 }
 0x2e2   : > { %v3925_v31 = vpop.xlane.xlu0 %3924 }
 0x2e3   : > { %v3910_v54 = vpop.xlane.xlu1 %3909  ;;  %3951 = vst.msk [vmem:[%s6994_s25 + $0x50] sm:$0xff] %vm3844_vm7, %v3925_v31 }
 0x2e4   : > { %3946 = vst.msk [vmem:[%s6994_s25 + $0x28] sm:$0xff] %vm3844_vm7, %v3910_v54 }
 0x2e6   : > { %v3816_v21 = vpop.xlane.xlu0 %3815 }
 0x2e7   : > { %v3928_v62 = vpop.xlane.xlu1 %3927  ;;  %3851 = vst.msk [vmem:[%s6987_s22 + $0x30] sm:$0xff] %vm3844_vm7, %v3816_v21 }
 0x2e8   : > { %3952 = vst.msk [vmem:[%s6994_s25 + $0x58] sm:$0xff] %vm3844_vm7, %v3928_v62 }
 0x2ea   : > { %v3834_v25 = vpop.xlane.xlu0 %3833 }
 0x2eb   : > { %v3819_v3 = vpop.xlane.xlu1 %3818  ;;  %3857 = vst.msk [vmem:[%s6987_s22 + $0x60] sm:$0xff] %vm3844_vm7, %v3834_v25 }
 0x2ec   : > { %3852 = vst.msk [vmem:[%s6987_s22 + $0x38] sm:$0xff] %vm3844_vm7, %v3819_v3 }
 0x2ee   : > { %v3913_v39 = vpop.xlane.xlu0 %3912 }
 0x2ef   : > { %v3837_v38 = vpop.xlane.xlu1 %3836  ;;  %3947 = vst.msk [vmem:[%s6994_s25 + $0x30] sm:$0xff] %vm3844_vm7, %v3913_v39 }
 0x2f0   : > { %3858 = vst.msk [vmem:[%s6987_s22 + $0x68] sm:$0xff] %vm3844_vm7, %v3837_v38 }
 0x2f2   : > { %v3931_v4 = vpop.xlane.xlu0 %3930 }
 0x2f3   : > { %v3916_v20 = vpop.xlane.xlu1 %3915  ;;  %3953 = vst.msk [vmem:[%s6994_s25 + $0x60] sm:$0xff] %vm3844_vm7, %v3931_v4 }
 0x2f4   : > { %3948 = vst.msk [vmem:[%s6994_s25 + $0x38] sm:$0xff] %vm3844_vm7, %v3916_v20 }
 0x2f6   : > { %v3840_v34 = vpop.xlane.xlu0 %3839 }
 0x2f7   : > { %v3934_v55 = vpop.xlane.xlu1 %3933  ;;  %3859 = vst.msk [vmem:[%s6987_s22 + $0x70] sm:$0xff] %vm3844_vm7, %v3840_v34 }
 0x2f8   : > { %3954 = vst.msk [vmem:[%s6994_s25 + $0x68] sm:$0xff] %vm3844_vm7, %v3934_v55 }
 0x2fa   : > { %v3937_v30 = vpop.xlane.xlu0 %3936 }
 0x2fb   : > { %v3843_v18 = vpop.xlane.xlu1 %3842  ;;  %3955 = vst.msk [vmem:[%s6994_s25 + $0x70] sm:$0xff] %vm3844_vm7, %v3937_v30 }
 0x2fc   : > { %3860 = vst.msk [vmem:[%s6987_s22 + $0x78] sm:$0xff] %vm3844_vm7, %v3843_v18 }
 0x2ff   : > { %v3940_v47 = vpop.xlane.xlu1 %3939 }
 0x300   : > { %3956 = vst.msk [vmem:[%s6994_s25 + $0x78] sm:$0xff] %vm3844_vm7, %v3940_v47 }
 0x301 PF: > { %p4861_p5 = scmp.ge.s32.totalorder %s5045_s18, 2  ;;  %s4009_s27 = sand.u32 1, %s5033_s15  }
 0x302   : > { %s4010_s23 = scalar_lea.sflag [#allocation4], %s4009_s27 }
 0x303   : > { %p4858_p13 = pnand %p4861_p5, %p5115_p6 }
 0x305   : > { %p4859_p0 = pneg %p4858_p13 }
 0x307   : > { %5028 = dma.done.wait (%p4859_p0), %s4010_s23, 128  }
 0x308   : > { %5030 = vsyncadd (%p4859_p0), %s4010_s23, 4294967168  ;;  %p15_p1 = scmp.ge.s32.totalorder %s5098_s21, 4   ;;  %s7298_s15 = smov %s5037_s16 }
 0x309   : > { %s7299_s16 = smov %s5041_s17  ;;  %s7300_s17 = smov %s5109_s24 }
 0x30a   : > { %s7301_s18 = smov %s5098_s21  ;;  %17 = sbr.rel (!%p15_p1) target bundleno = 3 (0x3), region = 95 }
 0x30f   :  { %4031 = vsyncpa [#allocation4], 1 }
 0x310   :  { %4033 = vsyncpa [#allocation4 + $0x1], 1 }

</bundles_post_ra>
